<compile_context>
chip_gen: v7x
topology: tpu7x:2x2x1
jax: 0.10.0
libtpu: 0.0.40
codegen_flags: <defaults>
</compile_context>

<pallas_src>
import jax
import jax.numpy as jnp
from jax.experimental import pallas as pl
from jax.experimental.pallas import tpu as pltpu

BN_EPS = 1e-5
BN_SCALE = 1.0 / (1.0 + BN_EPS) ** 0.5  # eval BN with running (0, 1) stats
H = 256                                  # hidden / MLP width


def _vmem():
    return pl.BlockSpec(memory_space=pltpu.MemorySpace.VMEM)


def _smem():
    return pl.BlockSpec(memory_space=pltpu.MemorySpace.SMEM)


def _bf16_dot(x, w_ref):
    return jnp.dot(x.astype(jnp.bfloat16), w_ref[...],
                   preferred_element_type=jnp.float32)


# ----------------------------------------------------------------------------
# Kernel A: all_mlp (Linear+ReLU) fused with GRU layer-1 input projection.
#   rows = S * B_pad, so the layer-1 gate matmul runs once with full MXU row
#   occupancy instead of S tiny M=B matmuls inside the recurrence.
# ----------------------------------------------------------------------------
def _allmlp_gates_kernel(x_ref, w_ref, b_ref, wih_ref, bih_ref, gx_ref):
    rec = jnp.maximum(_bf16_dot(x_ref[...], w_ref) + b_ref[...], 0.0)
    gx_ref[...] = _bf16_dot(rec, wih_ref) + bih_ref[...]


def allmlp_gates(x, p):
    rows = x.shape[0]
    ng = p["gru_wih1"].shape[1]
    return pl.pallas_call(
        _allmlp_gates_kernel,
        out_shape=jax.ShapeDtypeStruct((rows, ng), jnp.float32),
        in_specs=[_vmem()] * 5,
        out_specs=_vmem(),
    )(x, p["all_w"], p["all_b"], p["gru_wih1"], p["gru_bih1"])


# ----------------------------------------------------------------------------
# Kernel B: 2-layer GRU over time, whole sequence in one kernel invocation.
#   Per-sequence length masking freezes (h1, h2) once t >= length, emulating
#   pack_padded_sequence so the final state equals PyTorch's hn[-1].
#   Loop bound = max(length) (SMEM scalar) so trailing padded steps are skipped.
# ----------------------------------------------------------------------------
def _gru_kernel(gx_ref, len_ref, maxlen_ref,
                whh1_ref, bhh1_ref, w2_ref, b2_ref,
                hn_ref, h1_sc, h2_sc):
    h1_sc[...] = jnp.zeros_like(h1_sc)
    h2_sc[...] = jnp.zeros_like(h2_sc)
    lengths = len_ref[...]                                   # (Bp, 1) int32

    @pl.loop(0, maxlen_ref[0])
    def _(t):
        h1 = h1_sc[...]
        h2 = h2_sc[...]
        mask = lengths > t                                   # (Bp, 1)

        # layer 1: input gates gx were precomputed in kernel A -> 1 matmul.
        gx = gx_ref[t]                                       # (Bp, 3H) f32
        gh = _bf16_dot(h1, whh1_ref) + bhh1_ref[...]
        r1 = jax.nn.sigmoid(gx[:, :H] + gh[:, :H])
        z1 = jax.nn.sigmoid(gx[:, H:2 * H] + gh[:, H:2 * H])
        n1 = jnp.tanh(gx[:, 2 * H:] + r1 * gh[:, 2 * H:])
        h1n = jnp.where(mask, (1.0 - z1) * n1 + z1 * h1, h1)

        # layer 2: stacked [Wih;Whh] -> (2H, 4H), gives (r,z) fused and the two
        # halves of the n-gate separately -> 1 matmul.
        xh = jnp.concatenate([h1n, h2], axis=-1)             # (Bp, 2H)
        g2 = _bf16_dot(xh, w2_ref) + b2_ref[...]             # (Bp, 4H)
        r2 = jax.nn.sigmoid(g2[:, :H])
        z2 = jax.nn.sigmoid(g2[:, H:2 * H])
        n2 = jnp.tanh(g2[:, 2 * H:3 * H] + r2 * g2[:, 3 * H:])
        h2n = jnp.where(mask, (1.0 - z2) * n2 + z2 * h2, h2)

        h1_sc[...] = h1n
        h2_sc[...] = h2n

    hn_ref[...] = h2_sc[...]


def gru_last_hidden(gx1, lengths, max_len, p):
    _, bp, _ = gx1.shape
    return pl.pallas_call(
        _gru_kernel,
        out_shape=jax.ShapeDtypeStruct((bp, H), jnp.float32),
        in_specs=[_vmem(),            # gx1 (S, Bp, 3H)
                  _vmem(),            # lengths (Bp, 1)
                  _smem(),            # max_len (1,)
                  _vmem(), _vmem(),   # whh1, bhh1
                  _vmem(), _vmem()],  # w2_stack, b2_stack
        out_specs=_vmem(),
        scratch_shapes=[pltpu.VMEM((bp, H), jnp.float32),
                        pltpu.VMEM((bp, H), jnp.float32)],
    )(gx1, lengths, max_len,
      p["gru_whh1"], p["gru_bhh1"], p["gru_w2_stack"], p["gru_b2_stack"])


# ----------------------------------------------------------------------------
# Kernel C: FM(+BN), wide/deep MLP heads and the regressor, fully fused.
#   fuse = [wide, deep, hn] @ [Ww; Wd; Wr]  (one matmul, K=3H)
#   Output lane-padded to 128 columns (only first 3 are real).
# ----------------------------------------------------------------------------
def _heads_regressor_kernel(fmx_ref, deep_ref, hn_ref,
                            fms_ref, widew_ref, wideb_ref,
                            deepw_ref, deepb_ref, bns_ref, bnt_ref,
                            wf_ref, w1_ref, b1_ref, w2_ref, b2_ref, o_ref):
    # FactorizationMachine + eval BatchNorm1d(20)
    x = fmx_ref[...]                                          # (Bp, 6, 20)
    cross = 0.5 * (jnp.sum(x, axis=1) ** 2 - jnp.sum(x * x, axis=1)) * fms_ref[...]

    # wide / deep MLP heads: Linear + BN(eval, affine) + ReLU
    wide = _bf16_dot(cross, widew_ref) + wideb_ref[...]
    wide = jnp.maximum(wide * bns_ref[...] + bnt_ref[...], 0.0)
    deep = _bf16_dot(deep_ref[...], deepw_ref) + deepb_ref[...]
    deep = jnp.maximum(deep * bns_ref[...] + bnt_ref[...], 0.0)

    # Regressor: fuse (one stacked matmul) -> Linear+BN+ReLU -> Linear (padded)
    fuse_in = jnp.concatenate([wide, deep, hn_ref[...]], axis=-1)   # (Bp, 3H)
    fuse = _bf16_dot(fuse_in, wf_ref)
    hid = _bf16_dot(fuse, w1_ref) + b1_ref[...]
    hid = jnp.maximum(hid * bns_ref[...] + bnt_ref[...], 0.0)
    o_ref[...] = _bf16_dot(hid, w2_ref) + b2_ref[...]


def heads_regressor(fm_x, deep_input, hn, p):
    bp = hn.shape[0]
    nout = p["reg_w2"].shape[1]
    return pl.pallas_call(
        _heads_regressor_kernel,
        out_shape=jax.ShapeDtypeStruct((bp, nout), jnp.float32),
        in_specs=[_vmem()] * 15,
        out_specs=_vmem(),
    )(fm_x, deep_input, hn,
      p["fm_bn_scale"], p["wide_w"], p["wide_b"],
      p["deep_w"], p["deep_b"], p["bn256_scale"], p["bn256_shift"],
      p["reg_wfuse"], p["reg_w1"], p["reg_b1"], p["reg_w2"], p["reg_b2"])


# ----------------------------------------------------------------------------
# Parameter construction (deterministic, synthetic; weights pre-transposed to
# (in, out) and stored bf16 for the MXU; biases / BN affine kept f32).
# ----------------------------------------------------------------------------
def _xavier(key, shape):
    fan_in, fan_out = shape[0], shape[-1]
    std = (2.0 / (fan_in + fan_out)) ** 0.5
    return std * jax.random.normal(key, shape, dtype=jnp.float32)


def make_params(key, flags):
    drivers_num = flags["drivers_num"]
    wide_field_total = drivers_num + 7 + 288 + 1 + 1 + 1
    deep_ranges = [drivers_num, 7, 288]
    deep_dims = [20, 4, 20]
    link_ranges = [flags["num_components"], flags["highway_num"], flags["lane_num"],
                   flags["reversed"], flags["oneway"]]
    link_dims = [16, 5, 4, 2, 2]
    bf = jnp.bfloat16

    keys = iter(jax.random.split(key, 64))
    p = {}
    p["wide_table"] = _xavier(next(keys), (wide_field_total, 20))
    p["deep_tables"] = [_xavier(next(keys), (r + 1, d)) for r, d in zip(deep_ranges, deep_dims)]
    p["link_tables"] = [_xavier(next(keys), (r + 1, d)) for r, d in zip(link_ranges, link_dims)]

    p["wide_w"] = _xavier(next(keys), (20, H)).astype(bf)
    p["wide_b"] = jnp.zeros((1, H), jnp.float32)
    p["deep_w"] = _xavier(next(keys), (sum(deep_dims) + 2, H)).astype(bf)
    p["deep_b"] = jnp.zeros((1, H), jnp.float32)
    p["all_w"] = _xavier(next(keys), (sum(link_dims) + 3, H)).astype(bf)
    p["all_b"] = jnp.zeros((1, H), jnp.float32)

    # GRU layer 1: input projection (wih1/bih1) is applied in kernel A.
    p["gru_wih1"] = _xavier(next(keys), (H, 3 * H)).astype(bf)
    p["gru_whh1"] = _xavier(next(keys), (H, 3 * H)).astype(bf)
    p["gru_bih1"] = jnp.zeros((1, 3 * H), jnp.float32)
    p["gru_bhh1"] = jnp.zeros((1, 3 * H), jnp.float32)

    # GRU layer 2: stack [Wih; Whh] into a single (2H, 4H) matrix:
    #   columns = [r_pre, z_pre, gx_n (input half), gh_n (hidden half)]
    # so one MXU push yields everything needed for PyTorch gate semantics
    # (n = tanh(gx_n + r * gh_n)).
    wih2 = _xavier(next(keys), (H, 3 * H))
    whh2 = _xavier(next(keys), (H, 3 * H))
    bih2 = jnp.zeros((3 * H,), jnp.float32)
    bhh2 = jnp.zeros((3 * H,), jnp.float32)
    zhh = jnp.zeros((H, H), jnp.float32)
    top = jnp.concatenate([wih2[:, :2 * H], wih2[:, 2 * H:], zhh], axis=1)
    bot = jnp.concatenate([whh2[:, :2 * H], zhh, whh2[:, 2 * H:]], axis=1)
    p["gru_w2_stack"] = jnp.concatenate([top, bot], axis=0).astype(bf)       # (2H, 4H)
    p["gru_b2_stack"] = jnp.concatenate(
        [bih2[:2 * H] + bhh2[:2 * H], bih2[2 * H:], bhh2[2 * H:]]).reshape(1, 4 * H)

    # Regressor: stack the three bias-free fuse projections -> one (3H, H) matmul.
    ww = _xavier(next(keys), (H, H))
    wd = _xavier(next(keys), (H, H))
    wr = _xavier(next(keys), (H, H))
    p["reg_wfuse"] = jnp.concatenate([ww, wd, wr], axis=0).astype(bf)        # (3H, H)
    p["reg_w1"] = _xavier(next(keys), (H, H)).astype(bf)
    p["reg_b1"] = jnp.zeros((1, H), jnp.float32)
    w2 = _xavier(next(keys), (H, 3))
    p["reg_w2"] = jnp.pad(w2, ((0, 0), (0, 128 - 3))).astype(bf)             # lane-pad 3 -> 128
    p["reg_b2"] = jnp.zeros((1, 128), jnp.float32)

    # eval BatchNorm affine params (all BN(256) instances identical at init,
    # so a single scale/shift pair is shared; real trained params would differ).
    p["fm_bn_scale"] = jnp.full((1, 20), BN_SCALE, jnp.float32)
    p["bn256_scale"] = jnp.full((1, H), BN_SCALE, jnp.float32)
    p["bn256_shift"] = jnp.zeros((1, H), jnp.float32)
    return p


# ----------------------------------------------------------------------------
# Full WDR forward (embedding gathers / concats / padding are plain-JAX glue)
# ----------------------------------------------------------------------------
def wdr_forward(p, wide_index, wide_value, deep_category, deep_real,
                all_link_feature, all_num, all_flow, all_linkdistance, all_real):
    B, S, _ = all_link_feature.shape
    BP = ((B + 7) // 8) * 8                                   # pad batch to sublane tile

    def pad_b(x):
        return jnp.pad(x, [(0, BP - B)] + [(0, 0)] * (x.ndim - 1))

    # DeepFeaturesEmbedding -> (B, 44) ; deep_input (BP, 46)
    deep_emb = jnp.concatenate(
        [jnp.take(tab, deep_category[:, i], axis=0)
         for i, tab in enumerate(p["deep_tables"])], axis=1)
    deep_input = pad_b(jnp.concatenate([deep_emb, deep_real], axis=1))

    # wide embedding * value -> FM input (BP, 6, 20)
    wide_emb = jnp.take(p["wide_table"], wide_index, axis=0)
    fm_x = pad_b(wide_emb * wide_value[:, :, None])

    # LinkFeatureEmbedding + reals -> (BP, S, 32), time-major (S, BP, 32)
    link_emb = jnp.concatenate(
        [jnp.take(tab, all_link_feature[:, :, i], axis=0)
         for i, tab in enumerate(p["link_tables"])], axis=-1)
    all_input = jnp.concatenate([link_emb, all_real, all_flow, all_linkdistance], axis=2)
    all_input = pad_b(all_input).transpose(1, 0, 2)

    lengths = jnp.pad(all_num.astype(jnp.int32), (0, BP - B)).reshape(BP, 1)
    max_len = jnp.max(all_num).astype(jnp.int32).reshape(1)

    # Kernel A: all_mlp + hoisted GRU layer-1 input gates -> (S, BP, 3H)
    gx1 = allmlp_gates(all_input.reshape(S * BP, -1), p).reshape(S, BP, 3 * H)

    # Kernel B: 2-layer GRU over variable-length sequences -> hn (BP, H)
    hn = gru_last_hidden(gx1, lengths, max_len, p)

    # Kernel C: FM+BN, wide/deep heads, regressor -> (BP, 128); slice to (B, 3)
    out = heads_regressor(fm_x, deep_input, hn, p)
    return out[:B, :3]                                        # squeeze(1) is a no-op on (B,3)


# ----------------------------------------------------------------------------
if __name__ == "__main__":
    FLAGS = dict(drivers_num=10, num_components=5, highway_num=6,
                 lane_num=4, reversed=2, oneway=2)
    B, S = 2, 8

    root = jax.random.PRNGKey(0)
    pkey, dkey = jax.random.split(root)
    params = make_params(pkey, FLAGS)

    dkeys = iter(jax.random.split(dkey, 32))
    wide_field_total = FLAGS["drivers_num"] + 7 + 288 + 3
    wide_index = jax.random.randint(next(dkeys), (B, 6), 0, wide_field_total)
    wide_value = jax.random.uniform(next(dkeys), (B, 6), dtype=jnp.float32)
    deep_sizes = [FLAGS["drivers_num"] + 1, 8, 289]
    deep_category = jnp.stack(
        [jax.random.randint(next(dkeys), (B,), 0, n) for n in deep_sizes], axis=1)
    deep_real = jax.random.normal(next(dkeys), (B, 2), dtype=jnp.float32)
    link_sizes = [FLAGS["num_components"] + 1, FLAGS["highway_num"] + 1,
                  FLAGS["lane_num"] + 1, FLAGS["reversed"] + 1, FLAGS["oneway"] + 1]
    all_link_feature = jnp.stack(
        [jax.random.randint(next(dkeys), (B, S), 0, n) for n in link_sizes], axis=2)
    all_num = jnp.array([S, 5], dtype=jnp.int32)
    all_flow = jax.random.normal(next(dkeys), (B, S, 1), dtype=jnp.float32)
    all_linkdistance = jax.random.normal(next(dkeys), (B, S, 1), dtype=jnp.float32)
    all_real = jax.random.normal(next(dkeys), (B, S, 1), dtype=jnp.float32)

    fwd = jax.jit(wdr_forward)
    out = fwd(params, wide_index, wide_value, deep_category, deep_real,
              all_link_feature, all_num, all_flow, all_linkdistance, all_real)
    out = jax.block_until_ready(out)
    assert out.shape == (B, 3) and out.dtype == jnp.float32
    print("KERNEL_OK")
</pallas_src>

<mosaic_0001>
module attributes {stable_mosaic.version = 11 : i64} {
  func.func @_allmlp_gates_kernel(%arg0: memref<64x32xf32, #tpu.memory_space<vmem>>, %arg1: memref<32x256xbf16, #tpu.memory_space<vmem>>, %arg2: memref<1x256xf32, #tpu.memory_space<vmem>>, %arg3: memref<256x768xbf16, #tpu.memory_space<vmem>>, %arg4: memref<1x768xf32, #tpu.memory_space<vmem>>, %arg5: memref<64x768xf32, #tpu.memory_space<vmem>>) attributes {dimension_semantics = [], scalar_prefetch = 0 : i64, scratch_operands = 0 : i64, tpu.core_type = #tpu.core_type<tc>} {
    %c0 = arith.constant 0 : index
    %c0_0 = arith.constant 0 : index
    %0 = vector.load %arg0[%c0, %c0_0] : memref<64x32xf32, #tpu.memory_space<vmem>>, vector<64x32xf32>
    %1 = arith.truncf %0 : vector<64x32xf32> to vector<64x32xbf16>
    %c0_1 = arith.constant 0 : index
    %c0_2 = arith.constant 0 : index
    %2 = vector.load %arg1[%c0_1, %c0_2] : memref<32x256xbf16, #tpu.memory_space<vmem>>, vector<32x256xbf16>
    %cst = arith.constant dense<0.000000e+00> : vector<64x256xf32>
    %3 = tpu.matmul %1, %2, %cst {dimension_numbers = #tpu.dot_dimension_numbers<[1], [0], [0], [1], [0, 0, 1, 1], [], []>} : vector<64x32xbf16>, vector<32x256xbf16>, vector<64x256xf32> -> vector<64x256xf32>
    %c0_3 = arith.constant 0 : index
    %c0_4 = arith.constant 0 : index
    %4 = vector.load %arg2[%c0_3, %c0_4] : memref<1x256xf32, #tpu.memory_space<vmem>>, vector<1x256xf32>
    %5 = vector.broadcast %4 : vector<1x256xf32> to vector<64x256xf32>
    %6 = arith.addf %3, %5 : vector<64x256xf32>
    %cst_5 = arith.constant 0.000000e+00 : f32
    %7 = vector.broadcast %cst_5 : f32 to vector<64x256xf32>
    %8 = arith.maximumf %6, %7 : vector<64x256xf32>
    %9 = arith.truncf %8 : vector<64x256xf32> to vector<64x256xbf16>
    %c0_6 = arith.constant 0 : index
    %c0_7 = arith.constant 0 : index
    %10 = vector.load %arg3[%c0_6, %c0_7] : memref<256x768xbf16, #tpu.memory_space<vmem>>, vector<256x768xbf16>
    %cst_8 = arith.constant dense<0.000000e+00> : vector<64x768xf32>
    %11 = tpu.matmul %9, %10, %cst_8 {dimension_numbers = #tpu.dot_dimension_numbers<[1], [0], [0], [1], [0, 0, 1, 1], [], []>} : vector<64x256xbf16>, vector<256x768xbf16>, vector<64x768xf32> -> vector<64x768xf32>
    %c0_9 = arith.constant 0 : index
    %c0_10 = arith.constant 0 : index
    %12 = vector.load %arg4[%c0_9, %c0_10] : memref<1x768xf32, #tpu.memory_space<vmem>>, vector<1x768xf32>
    %13 = vector.broadcast %12 : vector<1x768xf32> to vector<64x768xf32>
    %14 = arith.addf %11, %13 : vector<64x768xf32>
    %c0_11 = arith.constant 0 : index
    %c0_12 = arith.constant 0 : index
    %15 = vector.load %arg5[%c0_11, %c0_12] : memref<64x768xf32, #tpu.memory_space<vmem>>, vector<64x768xf32>
    tpu.vector_store %arg5[%c0_11, %c0_12], %14 {strides = array<i32>} : memref<64x768xf32, #tpu.memory_space<vmem>>, vector<64x768xf32>,
    return
  }
}

module attributes {stable_mosaic.version = 11 : i64} {
  func.func @_gru_kernel(%arg0: memref<8x8x768xf32, #tpu.memory_space<vmem>>, %arg1: memref<8x1xi32, #tpu.memory_space<vmem>>, %arg2: memref<1xi32, #tpu.memory_space<smem>>, %arg3: memref<256x768xbf16, #tpu.memory_space<vmem>>, %arg4: memref<1x768xf32, #tpu.memory_space<vmem>>, %arg5: memref<512x1024xbf16, #tpu.memory_space<vmem>>, %arg6: memref<1x1024xf32, #tpu.memory_space<vmem>>, %arg7: memref<8x256xf32, #tpu.memory_space<vmem>>, %arg8: memref<8x256xf32, #tpu.memory_space<vmem>>, %arg9: memref<8x256xf32, #tpu.memory_space<vmem>>) attributes {dimension_semantics = [], scalar_prefetch = 0 : i64, scratch_operands = 2 : i64, tpu.core_type = #tpu.core_type<tc>} {
    %cst = arith.constant 0.000000e+00 : f32
    %0 = vector.broadcast %cst : f32 to vector<8x256xf32>
    %c0 = arith.constant 0 : index
    %c0_0 = arith.constant 0 : index
    %1 = vector.load %arg8[%c0, %c0_0] : memref<8x256xf32, #tpu.memory_space<vmem>>, vector<8x256xf32>
    tpu.vector_store %arg8[%c0, %c0_0], %0 {strides = array<i32>} : memref<8x256xf32, #tpu.memory_space<vmem>>, vector<8x256xf32>,
    %cst_1 = arith.constant 0.000000e+00 : f32
    %2 = vector.broadcast %cst_1 : f32 to vector<8x256xf32>
    %c0_2 = arith.constant 0 : index
    %c0_3 = arith.constant 0 : index
    %3 = vector.load %arg9[%c0_2, %c0_3] : memref<8x256xf32, #tpu.memory_space<vmem>>, vector<8x256xf32>
    tpu.vector_store %arg9[%c0_2, %c0_3], %2 {strides = array<i32>} : memref<8x256xf32, #tpu.memory_space<vmem>>, vector<8x256xf32>,
    %c0_4 = arith.constant 0 : index
    %c0_5 = arith.constant 0 : index
    %4 = vector.load %arg1[%c0_4, %c0_5] : memref<8x1xi32, #tpu.memory_space<vmem>>, vector<8x1xi32>
    %c0_6 = arith.constant 0 : index
    %5 = memref.load %arg2[%c0_6] : memref<1xi32, #tpu.memory_space<smem>>
    %c0_i32 = arith.constant 0 : i32
    %6 = arith.subi %5, %c0_i32 : i32
    %c1_i32 = arith.constant 1 : i32
    %c1_i32_7 = arith.constant 1 : i32
    %7 = arith.subi %c1_i32, %c1_i32_7 : i32
    %8 = arith.addi %6, %7 : i32
    %c1_i32_8 = arith.constant 1 : i32
    %9 = arith.divsi %8, %c1_i32_8 : i32
    %c1_i32_9 = arith.constant 1 : i32
    %c0_i32_10 = arith.constant 0 : i32
    %c0_i32_11 = arith.constant 0 : i32
    %10 = arith.subi %9, %c0_i32_11 : i32
    %11 = arith.addi %c0_i32_11, %10 : i32
    %c1_i32_12 = arith.constant 1 : i32
    scf.for %arg10 = %c0_i32_11 to %11 step %c1_i32_12  : i32 {
      %14 = arith.muli %arg10, %c1_i32_9 : i32
      %15 = arith.addi %c0_i32_10, %14 : i32
      %c0_17 = arith.constant 0 : index
      %c0_18 = arith.constant 0 : index
      %16 = vector.load %arg8[%c0_17, %c0_18] : memref<8x256xf32, #tpu.memory_space<vmem>>, vector<8x256xf32>
      %c0_19 = arith.constant 0 : index
      %c0_20 = arith.constant 0 : index
      %17 = vector.load %arg9[%c0_19, %c0_20] : memref<8x256xf32, #tpu.memory_space<vmem>>, vector<8x256xf32>
      %18 = vector.broadcast %15 : i32 to vector<8x1xi32>
      %19 = arith.cmpi sgt, %4, %18 : vector<8x1xi32>
      %20 = arith.index_cast %15 : i32 to index
      %c0_21 = arith.constant 0 : index
      %c0_22 = arith.constant 0 : index
      %21 = vector.load %arg0[%20, %c0_21, %c0_22] : memref<8x8x768xf32, #tpu.memory_space<vmem>>, vector<1x8x768xf32>
      %22 = vector.shape_cast %21 : vector<1x8x768xf32> to vector<8x768xf32>
      %23 = arith.truncf %16 : vector<8x256xf32> to vector<8x256xbf16>
      %c0_23 = arith.constant 0 : index
      %c0_24 = arith.constant 0 : index
      %24 = vector.load %arg3[%c0_23, %c0_24] : memref<256x768xbf16, #tpu.memory_space<vmem>>, vector<256x768xbf16>
      %cst_25 = arith.constant dense<0.000000e+00> : vector<8x768xf32>
      %25 = tpu.matmul %23, %24, %cst_25 {dimension_numbers = #tpu.dot_dimension_numbers<[1], [0], [0], [1], [0, 0, 1, 1], [], []>} : vector<8x256xbf16>, vector<256x768xbf16>, vector<8x768xf32> -> vector<8x768xf32>
      %c0_26 = arith.constant 0 : index
      %c0_27 = arith.constant 0 : index
      %26 = vector.load %arg4[%c0_26, %c0_27] : memref<1x768xf32, #tpu.memory_space<vmem>>, vector<1x768xf32>
      %27 = vector.broadcast %26 : vector<1x768xf32> to vector<8x768xf32>
      %28 = arith.addf %25, %27 : vector<8x768xf32>
      %29 = vector.extract_strided_slice %22 {offsets = [0, 0], sizes = [8, 256], strides = [1, 1]} : vector<8x768xf32> to vector<8x256xf32>
      %30 = vector.extract_strided_slice %28 {offsets = [0, 0], sizes = [8, 256], strides = [1, 1]} : vector<8x768xf32> to vector<8x256xf32>
      %31 = arith.addf %29, %30 : vector<8x256xf32>
      %32 = arith.negf %31 : vector<8x256xf32>
      %33 = math.exp %32 : vector<8x256xf32>
      %cst_28 = arith.constant 1.000000e+00 : f32
      %34 = vector.broadcast %cst_28 : f32 to vector<8x256xf32>
      %35 = arith.addf %34, %33 : vector<8x256xf32>
      %36 = arith.divf %34, %35 : vector<8x256xf32>
      %37 = vector.extract_strided_slice %22 {offsets = [0, 256], sizes = [8, 256], strides = [1, 1]} : vector<8x768xf32> to vector<8x256xf32>
      %38 = vector.extract_strided_slice %28 {offsets = [0, 256], sizes = [8, 256], strides = [1, 1]} : vector<8x768xf32> to vector<8x256xf32>
      %39 = arith.addf %37, %38 : vector<8x256xf32>
      %40 = arith.negf %39 : vector<8x256xf32>
      %41 = math.exp %40 : vector<8x256xf32>
      %cst_29 = arith.constant 1.000000e+00 : f32
      %42 = vector.broadcast %cst_29 : f32 to vector<8x256xf32>
      %43 = arith.addf %42, %41 : vector<8x256xf32>
      %44 = arith.divf %42, %43 : vector<8x256xf32>
      %45 = vector.extract_strided_slice %22 {offsets = [0, 512], sizes = [8, 256], strides = [1, 1]} : vector<8x768xf32> to vector<8x256xf32>
      %46 = vector.extract_strided_slice %28 {offsets = [0, 512], sizes = [8, 256], strides = [1, 1]} : vector<8x768xf32> to vector<8x256xf32>
      %47 = arith.mulf %36, %46 : vector<8x256xf32>
      %48 = arith.addf %45, %47 : vector<8x256xf32>
      %49 = math.tanh %48 : vector<8x256xf32>
      %cst_30 = arith.constant 1.000000e+00 : f32
      %50 = vector.broadcast %cst_30 : f32 to vector<8x256xf32>
      %51 = arith.subf %50, %44 : vector<8x256xf32>
      %52 = arith.mulf %51, %49 : vector<8x256xf32>
      %53 = arith.mulf %44, %16 : vector<8x256xf32>
      %54 = arith.addf %52, %53 : vector<8x256xf32>
      %55 = vector.shape_cast %19 : vector<8x1xi1> to vector<8x1xi1>
      %56 = vector.broadcast %55 : vector<8x1xi1> to vector<8x256xi1>
      %57 = arith.select %56, %54, %16 : vector<8x256xi1>, vector<8x256xf32>
      %58 = tpu.concatenate %57, %17 in 1 : vector<8x256xf32>, vector<8x256xf32> -> vector<8x512xf32>
      %59 = arith.truncf %58 : vector<8x512xf32> to vector<8x512xbf16>
      %c0_31 = arith.constant 0 : index
      %c0_32 = arith.constant 0 : index
      %60 = vector.load %arg5[%c0_31, %c0_32] : memref<512x1024xbf16, #tpu.memory_space<vmem>>, vector<512x1024xbf16>
      %cst_33 = arith.constant dense<0.000000e+00> : vector<8x1024xf32>
      %61 = tpu.matmul %59, %60, %cst_33 {dimension_numbers = #tpu.dot_dimension_numbers<[1], [0], [0], [1], [0, 0, 1, 1], [], []>} : vector<8x512xbf16>, vector<512x1024xbf16>, vector<8x1024xf32> -> vector<8x1024xf32>
      %c0_34 = arith.constant 0 : index
      %c0_35 = arith.constant 0 : index
      %62 = vector.load %arg6[%c0_34, %c0_35] : memref<1x1024xf32, #tpu.memory_space<vmem>>, vector<1x1024xf32>
      %63 = vector.broadcast %62 : vector<1x1024xf32> to vector<8x1024xf32>
      %64 = arith.addf %61, %63 : vector<8x1024xf32>
      %65 = vector.extract_strided_slice %64 {offsets = [0, 0], sizes = [8, 256], strides = [1, 1]} : vector<8x1024xf32> to vector<8x256xf32>
      %66 = arith.negf %65 : vector<8x256xf32>
      %67 = math.exp %66 : vector<8x256xf32>
      %cst_36 = arith.constant 1.000000e+00 : f32
      %68 = vector.broadcast %cst_36 : f32 to vector<8x256xf32>
      %69 = arith.addf %68, %67 : vector<8x256xf32>
      %70 = arith.divf %68, %69 : vector<8x256xf32>
      %71 = vector.extract_strided_slice %64 {offsets = [0, 256], sizes = [8, 256], strides = [1, 1]} : vector<8x1024xf32> to vector<8x256xf32>
      %72 = arith.negf %71 : vector<8x256xf32>
      %73 = math.exp %72 : vector<8x256xf32>
      %cst_37 = arith.constant 1.000000e+00 : f32
      %74 = vector.broadcast %cst_37 : f32 to vector<8x256xf32>
      %75 = arith.addf %74, %73 : vector<8x256xf32>
      %76 = arith.divf %74, %75 : vector<8x256xf32>
      %77 = vector.extract_strided_slice %64 {offsets = [0, 512], sizes = [8, 256], strides = [1, 1]} : vector<8x1024xf32> to vector<8x256xf32>
      %78 = vector.extract_strided_slice %64 {offsets = [0, 768], sizes = [8, 256], strides = [1, 1]} : vector<8x1024xf32> to vector<8x256xf32>
      %79 = arith.mulf %70, %78 : vector<8x256xf32>
      %80 = arith.addf %77, %79 : vector<8x256xf32>
      %81 = math.tanh %80 : vector<8x256xf32>
      %cst_38 = arith.constant 1.000000e+00 : f32
      %82 = vector.broadcast %cst_38 : f32 to vector<8x256xf32>
      %83 = arith.subf %82, %76 : vector<8x256xf32>
      %84 = arith.mulf %83, %81 : vector<8x256xf32>
      %85 = arith.mulf %76, %17 : vector<8x256xf32>
      %86 = arith.addf %84, %85 : vector<8x256xf32>
      %87 = vector.shape_cast %19 : vector<8x1xi1> to vector<8x1xi1>
      %88 = vector.broadcast %87 : vector<8x1xi1> to vector<8x256xi1>
      %89 = arith.select %88, %86, %17 : vector<8x256xi1>, vector<8x256xf32>
      %c0_39 = arith.constant 0 : index
      %c0_40 = arith.constant 0 : index
      %90 = vector.load %arg8[%c0_39, %c0_40] : memref<8x256xf32, #tpu.memory_space<vmem>>, vector<8x256xf32>
      tpu.vector_store %arg8[%c0_39, %c0_40], %57 {strides = array<i32>} : memref<8x256xf32, #tpu.memory_space<vmem>>, vector<8x256xf32>,
      %c0_41 = arith.constant 0 : index
      %c0_42 = arith.constant 0 : index
      %91 = vector.load %arg9[%c0_41, %c0_42] : memref<8x256xf32, #tpu.memory_space<vmem>>, vector<8x256xf32>
      tpu.vector_store %arg9[%c0_41, %c0_42], %89 {strides = array<i32>} : memref<8x256xf32, #tpu.memory_space<vmem>>, vector<8x256xf32>,
    }
    %c0_13 = arith.constant 0 : index
    %c0_14 = arith.constant 0 : index
    %12 = vector.load %arg9[%c0_13, %c0_14] : memref<8x256xf32, #tpu.memory_space<vmem>>, vector<8x256xf32>
    %c0_15 = arith.constant 0 : index
    %c0_16 = arith.constant 0 : index
    %13 = vector.load %arg7[%c0_15, %c0_16] : memref<8x256xf32, #tpu.memory_space<vmem>>, vector<8x256xf32>
    tpu.vector_store %arg7[%c0_15, %c0_16], %12 {strides = array<i32>} : memref<8x256xf32, #tpu.memory_space<vmem>>, vector<8x256xf32>,
    return
  }
}

module attributes {stable_mosaic.version = 11 : i64} {
  func.func @_heads_regressor_kernel(%arg0: memref<8x6x20xf32, #tpu.memory_space<vmem>>, %arg1: memref<8x46xf32, #tpu.memory_space<vmem>>, %arg2: memref<8x256xf32, #tpu.memory_space<vmem>>, %arg3: memref<1x20xf32, #tpu.memory_space<vmem>>, %arg4: memref<20x256xbf16, #tpu.memory_space<vmem>>, %arg5: memref<1x256xf32, #tpu.memory_space<vmem>>, %arg6: memref<46x256xbf16, #tpu.memory_space<vmem>>, %arg7: memref<1x256xf32, #tpu.memory_space<vmem>>, %arg8: memref<1x256xf32, #tpu.memory_space<vmem>>, %arg9: memref<1x256xf32, #tpu.memory_space<vmem>>, %arg10: memref<768x256xbf16, #tpu.memory_space<vmem>>, %arg11: memref<256x256xbf16, #tpu.memory_space<vmem>>, %arg12: memref<1x256xf32, #tpu.memory_space<vmem>>, %arg13: memref<256x128xbf16, #tpu.memory_space<vmem>>, %arg14: memref<1x128xf32, #tpu.memory_space<vmem>>, %arg15: memref<8x128xf32, #tpu.memory_space<vmem>>) attributes {dimension_semantics = [], scalar_prefetch = 0 : i64, scratch_operands = 0 : i64, tpu.core_type = #tpu.core_type<tc>} {
    %c0 = arith.constant 0 : index
    %c0_0 = arith.constant 0 : index
    %c0_1 = arith.constant 0 : index
    %0 = vector.load %arg0[%c0, %c0_0, %c0_1] : memref<8x6x20xf32, #tpu.memory_space<vmem>>, vector<8x6x20xf32>
    %cst = arith.constant dense<0.000000e+00> : vector<8x20xf32>
    %1 = vector.multi_reduction <add>, %0, %cst [1] : vector<8x6x20xf32> to vector<8x20xf32>
    %2 = arith.mulf %1, %1 : vector<8x20xf32>
    %3 = arith.mulf %0, %0 : vector<8x6x20xf32>
    %cst_2 = arith.constant dense<0.000000e+00> : vector<8x20xf32>
    %4 = vector.multi_reduction <add>, %3, %cst_2 [1] : vector<8x6x20xf32> to vector<8x20xf32>
    %5 = arith.subf %2, %4 : vector<8x20xf32>
    %cst_3 = arith.constant 5.000000e-01 : f32
    %6 = vector.broadcast %cst_3 : f32 to vector<8x20xf32>
    %7 = arith.mulf %6, %5 : vector<8x20xf32>
    %c0_4 = arith.constant 0 : index
    %c0_5 = arith.constant 0 : index
    %8 = vector.load %arg3[%c0_4, %c0_5] : memref<1x20xf32, #tpu.memory_space<vmem>>, vector<1x20xf32>
    %9 = vector.broadcast %8 : vector<1x20xf32> to vector<8x20xf32>
    %10 = arith.mulf %7, %9 : vector<8x20xf32>
    %11 = arith.truncf %10 : vector<8x20xf32> to vector<8x20xbf16>
    %c0_6 = arith.constant 0 : index
    %c0_7 = arith.constant 0 : index
    %12 = vector.load %arg4[%c0_6, %c0_7] : memref<20x256xbf16, #tpu.memory_space<vmem>>, vector<20x256xbf16>
    %cst_8 = arith.constant dense<0.000000e+00> : vector<8x256xf32>
    %13 = tpu.matmul %11, %12, %cst_8 {dimension_numbers = #tpu.dot_dimension_numbers<[1], [0], [0], [1], [0, 0, 1, 1], [], []>} : vector<8x20xbf16>, vector<20x256xbf16>, vector<8x256xf32> -> vector<8x256xf32>
    %c0_9 = arith.constant 0 : index
    %c0_10 = arith.constant 0 : index
    %14 = vector.load %arg5[%c0_9, %c0_10] : memref<1x256xf32, #tpu.memory_space<vmem>>, vector<1x256xf32>
    %15 = vector.broadcast %14 : vector<1x256xf32> to vector<8x256xf32>
    %16 = arith.addf %13, %15 : vector<8x256xf32>
    %c0_11 = arith.constant 0 : index
    %c0_12 = arith.constant 0 : index
    %17 = vector.load %arg8[%c0_11, %c0_12] : memref<1x256xf32, #tpu.memory_space<vmem>>, vector<1x256xf32>
    %18 = vector.broadcast %17 : vector<1x256xf32> to vector<8x256xf32>
    %19 = arith.mulf %16, %18 : vector<8x256xf32>
    %c0_13 = arith.constant 0 : index
    %c0_14 = arith.constant 0 : index
    %20 = vector.load %arg9[%c0_13, %c0_14] : memref<1x256xf32, #tpu.memory_space<vmem>>, vector<1x256xf32>
    %21 = vector.broadcast %20 : vector<1x256xf32> to vector<8x256xf32>
    %22 = arith.addf %19, %21 : vector<8x256xf32>
    %cst_15 = arith.constant 0.000000e+00 : f32
    %23 = vector.broadcast %cst_15 : f32 to vector<8x256xf32>
    %24 = arith.maximumf %22, %23 : vector<8x256xf32>
    %c0_16 = arith.constant 0 : index
    %c0_17 = arith.constant 0 : index
    %25 = vector.load %arg1[%c0_16, %c0_17] : memref<8x46xf32, #tpu.memory_space<vmem>>, vector<8x46xf32>
    %26 = arith.truncf %25 : vector<8x46xf32> to vector<8x46xbf16>
    %c0_18 = arith.constant 0 : index
    %c0_19 = arith.constant 0 : index
    %27 = vector.load %arg6[%c0_18, %c0_19] : memref<46x256xbf16, #tpu.memory_space<vmem>>, vector<46x256xbf16>
    %cst_20 = arith.constant dense<0.000000e+00> : vector<8x256xf32>
    %28 = tpu.matmul %26, %27, %cst_20 {dimension_numbers = #tpu.dot_dimension_numbers<[1], [0], [0], [1], [0, 0, 1, 1], [], []>} : vector<8x46xbf16>, vector<46x256xbf16>, vector<8x256xf32> -> vector<8x256xf32>
    %c0_21 = arith.constant 0 : index
    %c0_22 = arith.constant 0 : index
    %29 = vector.load %arg7[%c0_21, %c0_22] : memref<1x256xf32, #tpu.memory_space<vmem>>, vector<1x256xf32>
    %30 = vector.broadcast %29 : vector<1x256xf32> to vector<8x256xf32>
    %31 = arith.addf %28, %30 : vector<8x256xf32>
    %c0_23 = arith.constant 0 : index
    %c0_24 = arith.constant 0 : index
    %32 = vector.load %arg8[%c0_23, %c0_24] : memref<1x256xf32, #tpu.memory_space<vmem>>, vector<1x256xf32>
    %33 = vector.broadcast %32 : vector<1x256xf32> to vector<8x256xf32>
    %34 = arith.mulf %31, %33 : vector<8x256xf32>
    %c0_25 = arith.constant 0 : index
    %c0_26 = arith.constant 0 : index
    %35 = vector.load %arg9[%c0_25, %c0_26] : memref<1x256xf32, #tpu.memory_space<vmem>>, vector<1x256xf32>
    %36 = vector.broadcast %35 : vector<1x256xf32> to vector<8x256xf32>
    %37 = arith.addf %34, %36 : vector<8x256xf32>
    %cst_27 = arith.constant 0.000000e+00 : f32
    %38 = vector.broadcast %cst_27 : f32 to vector<8x256xf32>
    %39 = arith.maximumf %37, %38 : vector<8x256xf32>
    %c0_28 = arith.constant 0 : index
    %c0_29 = arith.constant 0 : index
    %40 = vector.load %arg2[%c0_28, %c0_29] : memref<8x256xf32, #tpu.memory_space<vmem>>, vector<8x256xf32>
    %41 = tpu.concatenate %24, %39, %40 in 1 : vector<8x256xf32>, vector<8x256xf32>, vector<8x256xf32> -> vector<8x768xf32>
    %42 = arith.truncf %41 : vector<8x768xf32> to vector<8x768xbf16>
    %c0_30 = arith.constant 0 : index
    %c0_31 = arith.constant 0 : index
    %43 = vector.load %arg10[%c0_30, %c0_31] : memref<768x256xbf16, #tpu.memory_space<vmem>>, vector<768x256xbf16>
    %cst_32 = arith.constant dense<0.000000e+00> : vector<8x256xf32>
    %44 = tpu.matmul %42, %43, %cst_32 {dimension_numbers = #tpu.dot_dimension_numbers<[1], [0], [0], [1], [0, 0, 1, 1], [], []>} : vector<8x768xbf16>, vector<768x256xbf16>, vector<8x256xf32> -> vector<8x256xf32>
    %45 = arith.truncf %44 : vector<8x256xf32> to vector<8x256xbf16>
    %c0_33 = arith.constant 0 : index
    %c0_34 = arith.constant 0 : index
    %46 = vector.load %arg11[%c0_33, %c0_34] : memref<256x256xbf16, #tpu.memory_space<vmem>>, vector<256x256xbf16>
    %cst_35 = arith.constant dense<0.000000e+00> : vector<8x256xf32>
    %47 = tpu.matmul %45, %46, %cst_35 {dimension_numbers = #tpu.dot_dimension_numbers<[1], [0], [0], [1], [0, 0, 1, 1], [], []>} : vector<8x256xbf16>, vector<256x256xbf16>, vector<8x256xf32> -> vector<8x256xf32>
    %c0_36 = arith.constant 0 : index
    %c0_37 = arith.constant 0 : index
    %48 = vector.load %arg12[%c0_36, %c0_37] : memref<1x256xf32, #tpu.memory_space<vmem>>, vector<1x256xf32>
    %49 = vector.broadcast %48 : vector<1x256xf32> to vector<8x256xf32>
    %50 = arith.addf %47, %49 : vector<8x256xf32>
    %c0_38 = arith.constant 0 : index
    %c0_39 = arith.constant 0 : index
    %51 = vector.load %arg8[%c0_38, %c0_39] : memref<1x256xf32, #tpu.memory_space<vmem>>, vector<1x256xf32>
    %52 = vector.broadcast %51 : vector<1x256xf32> to vector<8x256xf32>
    %53 = arith.mulf %50, %52 : vector<8x256xf32>
    %c0_40 = arith.constant 0 : index
    %c0_41 = arith.constant 0 : index
    %54 = vector.load %arg9[%c0_40, %c0_41] : memref<1x256xf32, #tpu.memory_space<vmem>>, vector<1x256xf32>
    %55 = vector.broadcast %54 : vector<1x256xf32> to vector<8x256xf32>
    %56 = arith.addf %53, %55 : vector<8x256xf32>
    %cst_42 = arith.constant 0.000000e+00 : f32
    %57 = vector.broadcast %cst_42 : f32 to vector<8x256xf32>
    %58 = arith.maximumf %56, %57 : vector<8x256xf32>
    %59 = arith.truncf %58 : vector<8x256xf32> to vector<8x256xbf16>
    %c0_43 = arith.constant 0 : index
    %c0_44 = arith.constant 0 : index
    %60 = vector.load %arg13[%c0_43, %c0_44] : memref<256x128xbf16, #tpu.memory_space<vmem>>, vector<256x128xbf16>
    %cst_45 = arith.constant dense<0.000000e+00> : vector<8x128xf32>
    %61 = tpu.matmul %59, %60, %cst_45 {dimension_numbers = #tpu.dot_dimension_numbers<[1], [0], [0], [1], [0, 0, 1, 1], [], []>} : vector<8x256xbf16>, vector<256x128xbf16>, vector<8x128xf32> -> vector<8x128xf32>
    %c0_46 = arith.constant 0 : index
    %c0_47 = arith.constant 0 : index
    %62 = vector.load %arg14[%c0_46, %c0_47] : memref<1x128xf32, #tpu.memory_space<vmem>>, vector<1x128xf32>
    %63 = vector.broadcast %62 : vector<1x128xf32> to vector<8x128xf32>
    %64 = arith.addf %61, %63 : vector<8x128xf32>
    %c0_48 = arith.constant 0 : index
    %c0_49 = arith.constant 0 : index
    %65 = vector.load %arg15[%c0_48, %c0_49] : memref<8x128xf32, #tpu.memory_space<vmem>>, vector<8x128xf32>
    tpu.vector_store %arg15[%c0_48, %c0_49], %64 {strides = array<i32>} : memref<8x128xf32, #tpu.memory_space<vmem>>, vector<8x128xf32>,
    return
  }
}

</mosaic_0001>

<bundles_post_ra>
// kernel: wdr_forward.3
= control target key start
LH: loop header
LB: loop body
LE: loop exit
PB: predicated region body
PF: predicated region fallthrough
CT: control target
= control target key end

     0   :  { %v1345_v1 = vmov 0   ;;  %vm69_vm0 = vcmask 261120   ;;  %s1982_s1 = inlined_call_operand.vmem [shape: bf16[32,256], index: 1, kind: input, shape index: {}]   ;;  %s1983_s0 = inlined_call_operand.vmem [shape: f32[64,32], index: 0, kind: input, shape index: {}]   ;;  %s1984_s3 = inlined_call_operand.vmem [shape: bf16[256,768], index: 3, kind: input, shape index: {}]   ;;  %s1985_s2 = inlined_call_operand.vmem [shape: f32[1,256], index: 2, kind: input, shape index: {}]   ;;  %s1986_s4 = inlined_call_operand.vmem [shape: f32[1,768], index: 4, kind: input, shape index: {}]   ;;  %s1987_s5 = inlined_call_operand.vmem [shape: f32[64,768], index: 5, kind: output, shape index: {}]  }
   0x1   :  { %v1195_v0 = vld [vmem:[%s1982_s1 + $0x4] ss:$8 sps:$4 sm:$0xff]   ;;  %114 = vmatprep.mubr.bf16.mxu0 %v1345_v1  ;;  %v1197_v2 = vld [vmem:[%s1982_s1] ss:$8 sps:$4 sm:$0xff]   ;;  %v1198_v3 = vld [vmem:[%s1982_s1 + $0x14] ss:$8 sps:$4 sm:$0xff]  }
   0x2   :  { %82 = vmatprep.subr.bf16.mxu0 %v1195_v0  ;;  %v1200_v4 = vld [vmem:[%s1982_s1 + $0x10] ss:$8 sps:$4 sm:$0xff]   ;;  %v21_v5 = vld [vmem:[%s1983_s0] sm:$0xff]  ;;  %v22_v6 = vld [vmem:[%s1983_s0 + $0x8] sm:$0xff] }
   0x3   :  { %83 = vmatpush1.bf16.msra.mxu0 %v1197_v2  ;;  %v29_v7 = vpack.c.bf16 %v22_v6, %v21_v5  ;;  %v1201_v8 = vld [vmem:[%s1984_s3 + $0x4] ss:$24 sps:$4 sm:$0xff]   ;;  %v1203_v9 = vld [vmem:[%s1984_s3 + $0x8] ss:$24 sps:$4 sm:$0xff]   ;;  %v1207_v12 = vld [vmem:[%s1984_s3 + $0x34] ss:$24 sps:$4 sm:$0xff]  }
   0x4   :  { %84 = vmatprep.subr.bf16.mxu0 %v1198_v3  ;;  %v1205_v10 = vld [vmem:[%s1984_s3 + $0xc] ss:$24 sps:$4 sm:$0xff]   ;;  %v1206_v11 = vld [vmem:[%s1984_s3] ss:$24 sps:$4 sm:$0xff]   ;;  %787 = vmatprep.subr.bf16.mxu1 %v1201_v8  ;;  %v23_v13 = vld [vmem:[%s1983_s0 + $0x10] sm:$0xff] }
   0x5   :  { %v24_v14 = vld [vmem:[%s1983_s0 + $0x18] sm:$0xff]  ;;  %788 = vmatpush1.bf16.msra.mxu1 %v1206_v11  ;;  %v1212_v17 = vld [vmem:[%s1984_s3 + $0x30] ss:$24 sps:$4 sm:$0xff]   ;;  %v1217_v19 = vld [vmem:[%s1984_s3 + $0x6c] ss:$24 sps:$4 sm:$0xff]  }
   0x6   :  { %v1209_v15 = vld [vmem:[%s1984_s3 + $0x38] ss:$24 sps:$4 sm:$0xff]   ;;  %789 = vmatprep.subr.bf16.mxu1 %v1207_v12  ;;  %v1211_v16 = vld [vmem:[%s1984_s3 + $0x3c] ss:$24 sps:$4 sm:$0xff]   ;;  %v30_v21 = vpack.c.bf16 %v24_v14, %v23_v13  ;;  %v1215_v23 = vld [vmem:[%s1984_s3 + $0x68] ss:$24 sps:$4 sm:$0xff]  }
   0x7   :  { %85 = vmatpush1.bf16.msra.mxu0 %v1200_v4  ;;  %v1213_v18 = vld [vmem:[%s1984_s3 + $0x64] ss:$24 sps:$4 sm:$0xff]   ;;  %v1218_v20 = vld [vmem:[%s1984_s3 + $0x60] ss:$24 sps:$4 sm:$0xff]   ;;  %v1219_v22 = vld [vmem:[%s1984_s3 + $0x94] ss:$24 sps:$4 sm:$0xff]  }
   0x8   :  { %860 = vmatprep.subr.bf16.mxu0 %v1205_v10  ;;  %v1223_v24 = vld [vmem:[%s1984_s3 + $0x9c] ss:$24 sps:$4 sm:$0xff]   ;;  %v25_v25 = vld [vmem:[%s1983_s0 + $0x20] sm:$0xff]  ;;  %v1224_v26 = vld [vmem:[%s1984_s3 + $0x90] ss:$24 sps:$4 sm:$0xff]  }
   0x9   :  { %790 = vmatpush1.bf16.msra.mxu1 %v1212_v17  ;;  %v26_v27 = vld [vmem:[%s1983_s0 + $0x28] sm:$0xff]  ;;  %v1225_v28 = vld [vmem:[%s1984_s3 + $0xc4] ss:$24 sps:$4 sm:$0xff]   ;;  %v1221_v29 = vld [vmem:[%s1984_s3 + $0x98] ss:$24 sps:$4 sm:$0xff]  }
   0xa   :  { %1062 = vmatmul.mubr.msk.bf16.vlgmr.msra.gmra.mrb[0].mxu0 %vm69_vm0, %v29_v7  ;;  %791 = vmatprep.subr.bf16.mxu1 %v1213_v18  ;;  %v1229_v30 = vld [vmem:[%s1984_s3 + $0xcc] ss:$24 sps:$4 sm:$0xff]   ;;  %v1230_v31 = vld [vmem:[%s1984_s3 + $0xc0] ss:$24 sps:$4 sm:$0xff]   ;;  %v31_v32 = vpack.c.bf16 %v26_v27, %v25_v25  ;;  %v1235_v35 = vld [vmem:[%s1984_s3 + $0xfc] ss:$24 sps:$4 sm:$0xff]   ;;  %v39_v18 = vlaneseq }
   0xb   :  { %124 = vmatprep.mubr.bf16.mxu0 %v1345_v1  ;;  %861 = vmatpush1.bf16.msra.mxu0 %v1203_v9  ;;  %v1231_v33 = vld [vmem:[%s1984_s3 + $0xf4] ss:$24 sps:$4 sm:$0xff]   ;;  %v1227_v34 = vld [vmem:[%s1984_s3 + $0xc8] ss:$24 sps:$4 sm:$0xff]   ;;  %v28_v38 = vld [vmem:[%s1983_s0 + $0x38] sm:$0xff] }
   0xc   :  { %862 = vmatprep.subr.bf16.mxu0 %v1211_v16  ;;  %v27_v36 = vld [vmem:[%s1983_s0 + $0x30] sm:$0xff]  ;;  %v1237_v39 = vld [vmem:[%s1984_s3 + $0x124] ss:$24 sps:$4 sm:$0xff]   ;;  %v1242_v42 = vld [vmem:[%s1984_s3 + $0x120] ss:$24 sps:$4 sm:$0xff]  }
   0xd   :  { %792 = vmatpush1.bf16.msra.mxu1 %v1218_v20  ;;  %v1236_v37 = vld [vmem:[%s1984_s3 + $0xf0] ss:$24 sps:$4 sm:$0xff]   ;;  %v1241_v41 = vld [vmem:[%s1984_s3 + $0x12c] ss:$24 sps:$4 sm:$0xff]   ;;  %v32_v43 = vpack.c.bf16 %v28_v38, %v27_v36  ;;  %v1247_v46 = vld [vmem:[%s1984_s3 + $0x15c] ss:$24 sps:$4 sm:$0xff]  }
   0xe   :  { %793 = vmatprep.subr.bf16.mxu1 %v1219_v22  ;;  %v1233_v40 = vld [vmem:[%s1984_s3 + $0xf8] ss:$24 sps:$4 sm:$0xff]   ;;  %v1243_v44 = vld [vmem:[%s1984_s3 + $0x154] ss:$24 sps:$4 sm:$0xff]   ;;  %v1239_v45 = vld [vmem:[%s1984_s3 + $0x128] ss:$24 sps:$4 sm:$0xff]  }
   0xf   :  { %863 = vmatpush1.bf16.msra.mxu0 %v1209_v15  ;;  %v1248_v47 = vld [vmem:[%s1984_s3 + $0x150] ss:$24 sps:$4 sm:$0xff]   ;;  %v1249_v48 = vld [vmem:[%s1984_s3 + $0x184] ss:$24 sps:$4 sm:$0xff]   ;;  %v1254_v51 = vld [vmem:[%s1984_s3 + $0x180] ss:$24 sps:$4 sm:$0xff]  }
  0x10   :  { %864 = vmatprep.subr.bf16.mxu0 %v1217_v19  ;;  %v1245_v49 = vld [vmem:[%s1984_s3 + $0x158] ss:$24 sps:$4 sm:$0xff]   ;;  %v1253_v50 = vld [vmem:[%s1984_s3 + $0x18c] ss:$24 sps:$4 sm:$0xff]   ;;  %v1251_v53 = vld [vmem:[%s1984_s3 + $0x188] ss:$24 sps:$4 sm:$0xff]  }
  0x11   :  { %794 = vmatpush1.bf16.msra.mxu1 %v1224_v26  ;;  %v1255_v52 = vld [vmem:[%s1984_s3 + $0x1b4] ss:$24 sps:$4 sm:$0xff]   ;;  %v1260_v55 = vld [vmem:[%s1984_s3 + $0x1b0] ss:$24 sps:$4 sm:$0xff]   ;;  %v1261_v57 = vld [vmem:[%s1984_s3 + $0x1e4] ss:$24 sps:$4 sm:$0xff]  }
  0x12   :  { %1063 = vmatmul.mubr.msk.bf16.gmra.mrb[4].mxu0 %vm69_vm0, %v30_v21  ;;  %795 = vmatprep.subr.bf16.mxu1 %v1225_v28  ;;  %v1259_v54 = vld [vmem:[%s1984_s3 + $0x1bc] ss:$24 sps:$4 sm:$0xff]   ;;  %v1257_v56 = vld [vmem:[%s1984_s3 + $0x1b8] ss:$24 sps:$4 sm:$0xff]   ;;  %v1265_v58 = vld [vmem:[%s1984_s3 + $0x1ec] ss:$24 sps:$4 sm:$0xff]  }
  0x13   :  { %134 = vmatprep.mubr.bf16.mxu0 %v1345_v1  ;;  %865 = vmatpush1.bf16.msra.mxu0 %v1215_v23  ;;  %v1266_v59 = vld [vmem:[%s1984_s3 + $0x1e0] ss:$24 sps:$4 sm:$0xff]   ;;  %v1267_v60 = vld [vmem:[%s1984_s3 + $0x214] ss:$24 sps:$4 sm:$0xff]   ;;  %v1272_v63 = vld [vmem:[%s1984_s3 + $0x210] ss:$24 sps:$4 sm:$0xff]  }
  0x14   :  { %866 = vmatprep.subr.bf16.mxu0 %v1223_v24  ;;  %v1263_v61 = vld [vmem:[%s1984_s3 + $0x1e8] ss:$24 sps:$4 sm:$0xff]   ;;  %v1271_v62 = vld [vmem:[%s1984_s3 + $0x21c] ss:$24 sps:$4 sm:$0xff]   ;;  %v1277_v2 = vld [vmem:[%s1984_s3 + $0x24c] ss:$24 sps:$4 sm:$0xff]  }
  0x15   :  { %796 = vmatpush1.bf16.msra.mxu1 %v1230_v31  ;;  %v1273_v0 = vld [vmem:[%s1984_s3 + $0x244] ss:$24 sps:$4 sm:$0xff]   ;;  %v1278_v3 = vld [vmem:[%s1984_s3 + $0x240] ss:$24 sps:$4 sm:$0xff]   ;;  %v1279_v4 = vld [vmem:[%s1984_s3 + $0x274] ss:$24 sps:$4 sm:$0xff]  }
  0x16   :  { %797 = vmatprep.subr.bf16.mxu1 %v1231_v33  ;;  %v1275_v5 = vld [vmem:[%s1984_s3 + $0x248] ss:$24 sps:$4 sm:$0xff]   ;;  %v1283_v6 = vld [vmem:[%s1984_s3 + $0x27c] ss:$24 sps:$4 sm:$0xff]   ;;  %v1281_v8 = vld [vmem:[%s1984_s3 + $0x278] ss:$24 sps:$4 sm:$0xff]  }
  0x17   :  { %867 = vmatpush1.bf16.msra.mxu0 %v1221_v29  ;;  %v1284_v7 = vld [vmem:[%s1984_s3 + $0x270] ss:$24 sps:$4 sm:$0xff]   ;;  %v1285_v9 = vld [vmem:[%s1984_s3 + $0x2a4] ss:$24 sps:$4 sm:$0xff]   ;;  %v1290_v12 = vld [vmem:[%s1984_s3 + $0x2a0] ss:$24 sps:$4 sm:$0xff]  }
  0x18   :  { %868 = vmatprep.subr.bf16.mxu0 %v1229_v30  ;;  %v1289_v10 = vld [vmem:[%s1984_s3 + $0x2ac] ss:$24 sps:$4 sm:$0xff]   ;;  %v1287_v11 = vld [vmem:[%s1984_s3 + $0x2a8] ss:$24 sps:$4 sm:$0xff]   ;;  %v1295_v14 = vld [vmem:[%s1984_s3 + $0x2dc] ss:$24 sps:$4 sm:$0xff]  }
  0x19   :  { %798 = vmatpush1.bf16.msra.mxu1 %v1236_v37  ;;  %v1291_v13 = vld [vmem:[%s1984_s3 + $0x2d4] ss:$24 sps:$4 sm:$0xff]   ;;  %v1293_v15 = vld [vmem:[%s1984_s3 + $0x2d8] ss:$24 sps:$4 sm:$0xff]   ;;  %v1615_v19 = vshrl.u32 %v39_v18, 7 }
  0x1a   :  { %1064 = vmatmul.mubr.msk.bf16.gmra.mrb[8].mxu0 %vm69_vm0, %v31_v32  ;;  %799 = vmatprep.subr.bf16.mxu1 %v1237_v39  ;;  %v1296_v16 = vld [vmem:[%s1984_s3 + $0x2d0] ss:$24 sps:$4 sm:$0xff]   ;;  %v1299_v17 = vld [vmem:[%s1984_s3 + $0x14] ss:$24 sps:$4 sm:$0xff]   ;;  %v37_v21 = vld [vmem:[%s1985_s2] sm:$0x3] }
  0x1b   :  { %144 = vmatprep.mubr.bf16.mxu0 %v1345_v1  ;;  %869 = vmatpush1.bf16.msra.mxu0 %v1227_v34  ;;  %v1269_v1 = vld [vmem:[%s1984_s3 + $0x218] ss:$24 sps:$4 sm:$0xff]   ;;  %v41_v20 = vsub.s32 0, %v1615_v19  ;;  %v45_v22 = vsub.s32 1, %v1615_v19 }
  0x1c   :  { %870 = vmatprep.subr.bf16.mxu0 %v1235_v35 }
  0x1d   :  { %800 = vmatpush1.bf16.msra.mxu1 %v1242_v42  ;;  %v1624_v23 = vrot.slane %v37_v21, %v41_v20  ;;  %v1628_v24 = vrot.slane %v37_v21, %v45_v22 }
  0x1e   :  { %801 = vmatprep.subr.bf16.mxu1 %v1243_v44 }
  0x1f   :  { %871 = vmatpush1.bf16.msra.mxu0 %v1233_v40  ;;  %v1297_v40 = vld [vmem:[%s1984_s3 + $0x10] ss:$24 sps:$4 sm:$0xff]  }
  0x20   :  { %872 = vmatprep.subr.bf16.mxu0 %v1241_v41 }
  0x21   :  { %802 = vmatpush1.bf16.msra.mxu1 %v1248_v47 }
  0x22   :  { %1065 = vmatmul.mubr.msk.bf16.gmra.mrb[12].mxu0 %vm69_vm0, %v32_v43  ;;  %803 = vmatprep.subr.bf16.mxu1 %v1249_v48  ;;  %v1302_v43 = vld [vmem:[%s1984_s3 + $0x44] ss:$24 sps:$4 sm:$0xff]  }
  0x23   :  { %873 = vmatpush1.bf16.msra.mxu0 %v1239_v45 }
  0x24   :  { %874 = vmatprep.subr.bf16.mxu0 %v1247_v46 }
  0x25   :  { %804 = vmatpush1.bf16.msra.mxu1 %v1254_v51  ;;  %v1300_v51 = vld [vmem:[%s1984_s3 + $0x40] ss:$24 sps:$4 sm:$0xff]  }
  0x26   :  { %805 = vmatprep.subr.bf16.mxu1 %v1255_v52 }
  0x27   :  { %875 = vmatpush1.bf16.msra.mxu0 %v1245_v49 }
  0x28   :  { %876 = vmatprep.subr.bf16.mxu0 %v1253_v50 }
  0x29   :  { %806 = vmatpush1.bf16.msra.mxu1 %v1260_v55 }
  0x2a   :  { %807 = vmatprep.subr.bf16.mxu1 %v1261_v57 }
  0x2b   :  { %877 = vmatpush1.bf16.msra.mxu0 %v1251_v53  ;;  %v1305_v53 = vld [vmem:[%s1984_s3 + $0x74] ss:$24 sps:$4 sm:$0xff]  }
  0x2c   :  { %878 = vmatprep.subr.bf16.mxu0 %v1259_v54 }
  0x2d   :  { %808 = vmatpush1.bf16.msra.mxu1 %v1266_v59 }
  0x2e   :  { %809 = vmatprep.subr.bf16.mxu1 %v1267_v60 }
  0x2f   :  { %879 = vmatpush1.bf16.msra.mxu0 %v1257_v56 }
  0x30   :  { %880 = vmatprep.subr.bf16.mxu0 %v1265_v58  ;;  %v1303_v58 = vld [vmem:[%s1984_s3 + $0x70] ss:$24 sps:$4 sm:$0xff]  }
  0x31   :  { %810 = vmatpush1.bf16.msra.mxu1 %v1272_v63 }
  0x32   :  { %811 = vmatprep.subr.bf16.mxu1 %v1273_v0 }
  0x33   :  { %881 = vmatpush1.bf16.msra.mxu0 %v1263_v61  ;;  %v1308_v61 = vld [vmem:[%s1984_s3 + $0xa4] ss:$24 sps:$4 sm:$0xff]  }
  0x34   :  { %882 = vmatprep.subr.bf16.mxu0 %v1271_v62 }
  0x35   :  { %812 = vmatpush1.bf16.msra.mxu1 %v1278_v3 }
  0x36   :  { %813 = vmatprep.subr.bf16.mxu1 %v1279_v4 }
  0x37   :  { %883 = vmatpush1.bf16.msra.mxu0 %v1269_v1 }
  0x38   :  { %884 = vmatprep.subr.bf16.mxu0 %v1277_v2 }
  0x39   :  { %814 = vmatpush1.bf16.msra.mxu1 %v1284_v7  ;;  %v1311_v7 = vld [vmem:[%s1984_s3 + $0xd4] ss:$24 sps:$4 sm:$0xff]  }
  0x3a   :  { %815 = vmatprep.subr.bf16.mxu1 %v1285_v9 }
  0x3b   :  { %885 = vmatpush1.bf16.msra.mxu0 %v1275_v5  ;;  %v1306_v5 = vld [vmem:[%s1984_s3 + $0xa0] ss:$24 sps:$4 sm:$0xff]  }
  0x3c   :  { %886 = vmatprep.subr.bf16.mxu0 %v1283_v6 }
  0x3d   :  { %816 = vmatpush1.bf16.msra.mxu1 %v1290_v12  ;;  %v1309_v12 = vld [vmem:[%s1984_s3 + $0xd0] ss:$24 sps:$4 sm:$0xff]  }
  0x3e   :  { %817 = vmatprep.subr.bf16.mxu1 %v1291_v13 }
  0x3f   :  { %887 = vmatpush1.bf16.msra.mxu0 %v1281_v8 }
  0x40   :  { %888 = vmatprep.subr.bf16.mxu0 %v1289_v10 }
  0x41   :  { %818 = vmatpush1.bf16.msra.mxu1 %v1296_v16 }
  0x42   :  { %1162 = vmatprep.subr.bf16.mxu1 %v1299_v17 }
  0x43   :  { %889 = vmatpush1.bf16.msra.mxu0 %v1287_v11 }
  0x44   :  { %890 = vmatprep.subr.bf16.mxu0 %v1295_v14 }
  0x47   :  { %891 = vmatpush1.bf16.msra.mxu0 %v1293_v15  ;;  %v1314_v15 = vld [vmem:[%s1984_s3 + $0x104] ss:$24 sps:$4 sm:$0xff]  }
  0x48   :  { %933 = vmatprep.subr.bf16.mxu0 %v1299_v17 }
  0xdd   :  { %v116_v25 = vpop.f32.mrb[0].mxu0 }
  0xde   :  { %v117_v26 = vadd.f32 %v116_v25, %v1624_v23  ;;  %v118_v27 = vpop.f32.mrb[1].mxu0 }
  0xdf   :  { %v119_v28 = vadd.f32 %v118_v27, %v1628_v24  ;;  %v120_v29 = vpop.f32.mrb[2].mxu0 }
  0xe0   :  { %v121_v30 = vadd.f32 %v120_v29, %v1624_v23  ;;  %v122_v31 = vpop.f32.mrb[3].mxu0  ;;  %v155_v33 = vmax.f32 %v117_v26, 0.0 }
  0xe1   :  { %v123_v32 = vadd.f32 %v122_v31, %v1628_v24  ;;  %v156_v35 = vmax.f32 %v119_v28, 0.0  ;;  %v1312_v28 = vld [vmem:[%s1984_s3 + $0x100] ss:$24 sps:$4 sm:$0xff]  }
  0xe2   :  { %v157_v34 = vmax.f32 %v121_v30, 0.0 }
  0xe3   :  { %v158_v36 = vmax.f32 %v123_v32, 0.0 }
  0xe4   :  { %v1634_v37 = vpack.c.bf16 %v157_v34, %v155_v33  ;;  %v1320_v33 = vld [vmem:[%s1984_s3 + $0x164] ss:$24 sps:$4 sm:$0xff]   ;;  %v1318_v34 = vld [vmem:[%s1984_s3 + $0x160] ss:$24 sps:$4 sm:$0xff]  }
  0xe5   :  { %v1636_v38 = vpack.c.bf16 %v158_v36, %v156_v35  ;;  %v126_v39 = vpop.f32.mrb[4].mxu0  ;;  %v1323_v35 = vld [vmem:[%s1984_s3 + $0x194] ss:$24 sps:$4 sm:$0xff]   ;;  %v1321_v36 = vld [vmem:[%s1984_s3 + $0x190] ss:$24 sps:$4 sm:$0xff]  }
  0xe6   :  { %v127_v41 = vadd.f32 %v126_v39, %v1624_v23  ;;  %v128_v42 = vpop.f32.mrb[5].mxu0  ;;  %v1324_v39 = vld [vmem:[%s1984_s3 + $0x1c0] ss:$24 sps:$4 sm:$0xff]  }
  0xe7   :  { %v129_v44 = vadd.f32 %v128_v42, %v1628_v24  ;;  %v130_v45 = vpop.f32.mrb[6].mxu0  ;;  %819 = vmatprep.mubr.bf16.mxu1 %v1636_v38  ;;  %892 = vmatprep.mubr.bf16.mxu0 %v1636_v38  ;;  %v1332_v42 = vld [vmem:[%s1984_s3 + $0x224] ss:$24 sps:$4 sm:$0xff]  }
  0xe8   :  { %v159_v46 = vmax.f32 %v127_v41, 0.0  ;;  %v131_v47 = vadd.f32 %v130_v45, %v1624_v23  ;;  %v132_v48 = vpop.f32.mrb[7].mxu0  ;;  %820 = vmatmul.mubr.bf16.vlgmr.msra.gmra.mrb[0].mxu1 %v1634_v37  ;;  %893 = vmatmul.mubr.bf16.vlgmr.msra.gmra.mrb[16].mxu0 %v1634_v37  ;;  %v1327_v41 = vld [vmem:[%s1984_s3 + $0x1f0] ss:$24 sps:$4 sm:$0xff]  }
  0xe9   :  { %v160_v49 = vmax.f32 %v129_v44, 0.0  ;;  %v133_v50 = vadd.f32 %v132_v48, %v1628_v24  ;;  %934 = vmatpush1.bf16.msra.mxu0 %v1297_v40  ;;  %1178 = vmatpush1.bf16.msra.mxu1 %v1297_v40  ;;  %v1329_v40 = vld [vmem:[%s1984_s3 + $0x1f4] ss:$24 sps:$4 sm:$0xff]   ;;  %v1333_v45 = vld [vmem:[%s1984_s3 + $0x250] ss:$24 sps:$4 sm:$0xff]  }
  0xea   :  { %v161_v52 = vmax.f32 %v131_v47, 0.0  ;;  %935 = vmatprep.subr.bf16.mxu0 %v1302_v43  ;;  %1163 = vmatprep.subr.bf16.mxu1 %v1302_v43  ;;  %v1330_v43 = vld [vmem:[%s1984_s3 + $0x220] ss:$24 sps:$4 sm:$0xff]   ;;  %v1335_v44 = vld [vmem:[%s1984_s3 + $0x254] ss:$24 sps:$4 sm:$0xff]  }
  0xeb   :  { %v162_v54 = vmax.f32 %v133_v50, 0.0  ;;  %v1336_v47 = vld [vmem:[%s1984_s3 + $0x280] ss:$24 sps:$4 sm:$0xff]   ;;  %v1341_v48 = vld [vmem:[%s1984_s3 + $0x2b4] ss:$24 sps:$4 sm:$0xff]  }
  0xec   :  { %v1658_v55 = vpack.c.bf16 %v161_v52, %v159_v46  ;;  %v1338_v46 = vld [vmem:[%s1984_s3 + $0x284] ss:$24 sps:$4 sm:$0xff]   ;;  %v287_v52 = vsub.s32 2, %v1615_v19 }
  0xed   :  { %v1660_v56 = vpack.c.bf16 %v162_v54, %v160_v49  ;;  %936 = vmatpush1.bf16.msra.mxu0 %v1300_v51  ;;  %1179 = vmatpush1.bf16.msra.mxu1 %v1300_v51  ;;  %v136_v57 = vpop.f32.mrb[8].mxu0  ;;  %v1339_v49 = vld [vmem:[%s1984_s3 + $0x2b0] ss:$24 sps:$4 sm:$0xff]   ;;  %v1344_v50 = vld [vmem:[%s1984_s3 + $0x2e4] ss:$24 sps:$4 sm:$0xff]   ;;  %v291_v54 = vsub.s32 3, %v1615_v19 }
  0xee   :  { %v137_v59 = vadd.f32 %v136_v57, %v1624_v23  ;;  %v138_v60 = vpop.f32.mrb[9].mxu0  ;;  %937 = vmatprep.subr.bf16.mxu0 %v1305_v53  ;;  %1164 = vmatprep.subr.bf16.mxu1 %v1305_v53  ;;  %v1342_v51 = vld [vmem:[%s1984_s3 + $0x2e0] ss:$24 sps:$4 sm:$0xff]  }
  0xef   :  { %v139_v62 = vadd.f32 %v138_v60, %v1628_v24  ;;  %v140_v63 = vpop.f32.mrb[10].mxu0  ;;  %902 = vmatprep.mubr.bf16.mxu0 %v1660_v56  ;;  %829 = vmatprep.mubr.bf16.mxu1 %v1660_v56  ;;  %v1783_v53 = vld [vmem:[%s1986_s4] sm:$0x3f] }
  0xf0   :  { %v163_v0 = vmax.f32 %v137_v59, 0.0  ;;  %v141_v1 = vadd.f32 %v140_v63, %v1624_v23  ;;  %v142_v2 = vpop.f32.mrb[11].mxu0  ;;  %903 = vmatmul.mubr.bf16.gmra.mrb[20].mxu0 %v1658_v55  ;;  %830 = vmatmul.mubr.bf16.gmra.mrb[4].mxu1 %v1658_v55  ;;  %v1800_v57 = vrot.slane %v1783_v53, %v291_v54 }
  0xf1   :  { %v164_v3 = vmax.f32 %v139_v62, 0.0  ;;  %v143_v4 = vadd.f32 %v142_v2, %v1628_v24  ;;  %938 = vmatpush1.bf16.msra.mxu0 %v1303_v58  ;;  %1180 = vmatpush1.bf16.msra.mxu1 %v1303_v58 }
  0xf2   :  { %v165_v6 = vmax.f32 %v141_v1, 0.0  ;;  %939 = vmatprep.subr.bf16.mxu0 %v1308_v61  ;;  %1165 = vmatprep.subr.bf16.mxu1 %v1308_v61 }
  0xf3   :  { %v166_v8 = vmax.f32 %v143_v4, 0.0 }
  0xf4   :  { %v1682_v9 = vpack.c.bf16 %v165_v6, %v163_v0 }
  0xf5   :  { %v1684_v10 = vpack.c.bf16 %v166_v8, %v164_v3  ;;  %940 = vmatpush1.bf16.msra.mxu0 %v1306_v5  ;;  %1181 = vmatpush1.bf16.msra.mxu1 %v1306_v5  ;;  %v146_v11 = vpop.f32.mrb[12].mxu0 }
  0xf6   :  { %v147_v13 = vadd.f32 %v146_v11, %v1624_v23  ;;  %v148_v14 = vpop.f32.mrb[13].mxu0  ;;  %941 = vmatprep.subr.bf16.mxu0 %v1311_v7  ;;  %1166 = vmatprep.subr.bf16.mxu1 %v1311_v7 }
  0xf7   :  { %v149_v16 = vadd.f32 %v148_v14, %v1628_v24  ;;  %v150_v17 = vpop.f32.mrb[14].mxu0  ;;  %912 = vmatprep.mubr.bf16.mxu0 %v1684_v10  ;;  %839 = vmatprep.mubr.bf16.mxu1 %v1684_v10 }
  0xf8   :  { %v167_v18 = vmax.f32 %v147_v13, 0.0  ;;  %v151_v21 = vadd.f32 %v150_v17, %v1624_v23  ;;  %v152_v25 = vpop.f32.mrb[15].mxu0  ;;  %913 = vmatmul.mubr.bf16.gmra.mrb[24].mxu0 %v1682_v9  ;;  %840 = vmatmul.mubr.bf16.gmra.mrb[8].mxu1 %v1682_v9  ;;  %v1317_v23 = vld [vmem:[%s1984_s3 + $0x134] ss:$24 sps:$4 sm:$0xff]  }
  0xf9   :  { %v168_v26 = vmax.f32 %v149_v16, 0.0  ;;  %v153_v27 = vadd.f32 %v152_v25, %v1628_v24  ;;  %942 = vmatpush1.bf16.msra.mxu0 %v1309_v12  ;;  %1182 = vmatpush1.bf16.msra.mxu1 %v1309_v12  ;;  %v1315_v24 = vld [vmem:[%s1984_s3 + $0x130] ss:$24 sps:$4 sm:$0xff]  }
  0xfa   :  { %v169_v29 = vmax.f32 %v151_v21, 0.0  ;;  %943 = vmatprep.subr.bf16.mxu0 %v1314_v15  ;;  %1167 = vmatprep.subr.bf16.mxu1 %v1314_v15 }
  0xfb   :  { %v170_v30 = vmax.f32 %v153_v27, 0.0 }
  0xfc   :  { %v1706_v31 = vpack.c.bf16 %v169_v29, %v167_v18 }
  0xfd   :  { %v1708_v32 = vpack.c.bf16 %v170_v30, %v168_v26  ;;  %944 = vmatpush1.bf16.msra.mxu0 %v1312_v28  ;;  %1183 = vmatpush1.bf16.msra.mxu1 %v1312_v28 }
  0xfe   :  { %945 = vmatprep.subr.bf16.mxu0 %v1317_v23  ;;  %1168 = vmatprep.subr.bf16.mxu1 %v1317_v23 }
  0xff   :  { %922 = vmatprep.mubr.bf16.mxu0 %v1708_v32  ;;  %849 = vmatprep.mubr.bf16.mxu1 %v1708_v32 }
 0x100   :  { %923 = vmatmul.mubr.bf16.gmra.mrb[28].mxu0 %v1706_v31  ;;  %850 = vmatmul.mubr.bf16.gmra.mrb[12].mxu1 %v1706_v31 }
 0x101   :  { %946 = vmatpush1.bf16.msra.mxu0 %v1315_v24  ;;  %1184 = vmatpush1.bf16.msra.mxu1 %v1315_v24 }
 0x102   :  { %965 = vmatprep.mubr.bf16.mxu0 %v1636_v38  ;;  %947 = vmatprep.subr.bf16.mxu0 %v1320_v33  ;;  %v1326_v38 = vld [vmem:[%s1984_s3 + $0x1c4] ss:$24 sps:$4 sm:$0xff]  }
 0x103   :  { %1169 = vmatprep.subr.bf16.mxu1 %v1320_v33  ;;  %975 = vmatprep.mubr.bf16.mxu1 %v1660_v56  ;;  %v1797_v56 = vrot.slane %v1783_v53, %v45_v22 }
 0x105   :  { %948 = vmatpush1.bf16.msra.mxu0 %v1318_v34  ;;  %1185 = vmatpush1.bf16.msra.mxu1 %v1318_v34 }
 0x106   :  { %949 = vmatprep.subr.bf16.mxu0 %v1323_v35  ;;  %1170 = vmatprep.subr.bf16.mxu1 %v1323_v35 }
 0x109   :  { %950 = vmatpush1.bf16.msra.mxu0 %v1321_v36  ;;  %1186 = vmatpush1.bf16.msra.mxu1 %v1321_v36 }
 0x10a   :  { %951 = vmatprep.subr.bf16.mxu0 %v1326_v38  ;;  %1171 = vmatprep.subr.bf16.mxu1 %v1326_v38 }
 0x10d   :  { %952 = vmatpush1.bf16.msra.mxu0 %v1324_v39  ;;  %1187 = vmatpush1.bf16.msra.mxu1 %v1324_v39 }
 0x10e   :  { %953 = vmatprep.subr.bf16.mxu0 %v1329_v40  ;;  %1172 = vmatprep.subr.bf16.mxu1 %v1329_v40 }
 0x111   :  { %954 = vmatpush1.bf16.msra.mxu0 %v1327_v41  ;;  %1188 = vmatpush1.bf16.msra.mxu1 %v1327_v41 }
 0x112   :  { %955 = vmatprep.subr.bf16.mxu0 %v1332_v42  ;;  %1173 = vmatprep.subr.bf16.mxu1 %v1332_v42 }
 0x115   :  { %956 = vmatpush1.bf16.msra.mxu0 %v1330_v43  ;;  %1189 = vmatpush1.bf16.msra.mxu1 %v1330_v43 }
 0x116   :  { %957 = vmatprep.subr.bf16.mxu0 %v1335_v44  ;;  %1174 = vmatprep.subr.bf16.mxu1 %v1335_v44 }
 0x119   :  { %958 = vmatpush1.bf16.msra.mxu0 %v1333_v45  ;;  %1190 = vmatpush1.bf16.msra.mxu1 %v1333_v45 }
 0x11a   :  { %959 = vmatprep.subr.bf16.mxu0 %v1338_v46  ;;  %1175 = vmatprep.subr.bf16.mxu1 %v1338_v46 }
 0x11d   :  { %960 = vmatpush1.bf16.msra.mxu0 %v1336_v47  ;;  %1191 = vmatpush1.bf16.msra.mxu1 %v1336_v47 }
 0x11e   :  { %961 = vmatprep.subr.bf16.mxu0 %v1341_v48  ;;  %1176 = vmatprep.subr.bf16.mxu1 %v1341_v48 }
 0x121   :  { %962 = vmatpush1.bf16.msra.mxu0 %v1339_v49  ;;  %1192 = vmatpush1.bf16.msra.mxu1 %v1339_v49 }
 0x122   :  { %963 = vmatprep.subr.bf16.mxu0 %v1344_v50  ;;  %1177 = vmatprep.subr.bf16.mxu1 %v1344_v50 }
 0x125   :  { %964 = vmatpush1.bf16.msra.mxu0 %v1342_v51  ;;  %1193 = vmatpush1.bf16.msra.mxu1 %v1342_v51 }
 0x128   :  { %966 = vmatmul.mubr.bf16.vlgmr.msra.gmra.mrb[32].mxu0 %v1634_v37  ;;  %976 = vmatmul.mubr.bf16.vlgmr.msra.gmra.mrb[16].mxu1 %v1658_v55  ;;  %v1789_v37 = vrot.slane %v1783_v53, %v41_v20  ;;  %v1792_v55 = vrot.slane %v1783_v53, %v287_v52 }
 0x129   :  { %985 = vmatprep.mubr.bf16.mxu1 %v1684_v10 }
 0x130   :  { %986 = vmatmul.mubr.bf16.gmra.mrb[20].mxu1 %v1682_v9 }
 0x131   :  { %995 = vmatprep.mubr.bf16.mxu1 %v1708_v32 }
 0x138   :  { %996 = vmatmul.mubr.bf16.gmra.mrb[24].mxu1 %v1706_v31 }
 0x1bb   :  { %v821_v58 = vpop.f32.mrb[0].mxu1  ;;  %v894_v59 = vpop.f32.mrb[16].mxu0 }
 0x1bc   :  { %v822_v60 = vadd.f32 %v821_v58, %v1789_v37  ;;  %v895_v61 = vadd.f32 %v894_v59, %v1792_v55  ;;  %v823_v62 = vpop.f32.mrb[1].mxu1  ;;  %v896_v20 = vpop.f32.mrb[17].mxu0 }
 0x1bd   :  { %v824_v63 = vadd.f32 %v823_v62, %v1797_v56  ;;  %v897_v0 = vadd.f32 %v896_v20, %v1800_v57  ;;  %v825_v1 = vpop.f32.mrb[2].mxu1  ;;  %v898_v2 = vpop.f32.mrb[18].mxu0 }
 0x1be   :  { %1006 = vst [vmem:[%s1987_s5] sm:$0xff] %v822_v60  ;;  %1008 = vst [vmem:[%s1987_s5 + $0x10] sm:$0xff] %v895_v61  ;;  %v826_v22 = vadd.f32 %v825_v1, %v1789_v37  ;;  %v899_v3 = vadd.f32 %v898_v2, %v1792_v55  ;;  %v827_v4 = vpop.f32.mrb[3].mxu1  ;;  %v900_v5 = vpop.f32.mrb[19].mxu0 }
 0x1bf   :  { %1007 = vst [vmem:[%s1987_s5 + $0x8] sm:$0xff] %v824_v63  ;;  %1009 = vst [vmem:[%s1987_s5 + $0x18] sm:$0xff] %v897_v0  ;;  %v828_v6 = vadd.f32 %v827_v4, %v1797_v56  ;;  %v901_v7 = vadd.f32 %v900_v5, %v1800_v57 }
 0x1c0   :  { %1012 = vst [vmem:[%s1987_s5 + $0x30] sm:$0xff] %v826_v22  ;;  %1014 = vst [vmem:[%s1987_s5 + $0x40] sm:$0xff] %v899_v3 }
 0x1c1   :  { %1013 = vst [vmem:[%s1987_s5 + $0x38] sm:$0xff] %v828_v6  ;;  %1015 = vst [vmem:[%s1987_s5 + $0x48] sm:$0xff] %v901_v7 }
 0x1c3   :  { %v831_v8 = vpop.f32.mrb[4].mxu1  ;;  %v904_v9 = vpop.f32.mrb[20].mxu0 }
 0x1c4   :  { %v832_v10 = vadd.f32 %v831_v8, %v1789_v37  ;;  %v905_v11 = vadd.f32 %v904_v9, %v1792_v55  ;;  %v833_v12 = vpop.f32.mrb[5].mxu1  ;;  %v906_v13 = vpop.f32.mrb[21].mxu0 }
 0x1c5   :  { %v834_v14 = vadd.f32 %v833_v12, %v1797_v56  ;;  %v907_v15 = vadd.f32 %v906_v13, %v1800_v57  ;;  %v835_v16 = vpop.f32.mrb[6].mxu1  ;;  %v908_v17 = vpop.f32.mrb[22].mxu0 }
 0x1c6   :  { %1018 = vst [vmem:[%s1987_s5 + $0x60] sm:$0xff] %v832_v10  ;;  %1020 = vst [vmem:[%s1987_s5 + $0x70] sm:$0xff] %v905_v11  ;;  %v836_v18 = vadd.f32 %v835_v16, %v1789_v37  ;;  %v909_v21 = vadd.f32 %v908_v17, %v1792_v55  ;;  %v837_v25 = vpop.f32.mrb[7].mxu1  ;;  %v910_v26 = vpop.f32.mrb[23].mxu0 }
 0x1c7   :  { %1019 = vst [vmem:[%s1987_s5 + $0x68] sm:$0xff] %v834_v14  ;;  %1021 = vst [vmem:[%s1987_s5 + $0x78] sm:$0xff] %v907_v15  ;;  %v838_v27 = vadd.f32 %v837_v25, %v1797_v56  ;;  %v911_v28 = vadd.f32 %v910_v26, %v1800_v57 }
 0x1c8   :  { %1024 = vst [vmem:[%s1987_s5 + $0x90] sm:$0xff] %v836_v18  ;;  %1026 = vst [vmem:[%s1987_s5 + $0xa0] sm:$0xff] %v909_v21 }
 0x1c9   :  { %1025 = vst [vmem:[%s1987_s5 + $0x98] sm:$0xff] %v838_v27  ;;  %1027 = vst [vmem:[%s1987_s5 + $0xa8] sm:$0xff] %v911_v28 }
 0x1cb   :  { %v841_v29 = vpop.f32.mrb[8].mxu1  ;;  %v914_v23 = vpop.f32.mrb[24].mxu0 }
 0x1cc   :  { %v842_v30 = vadd.f32 %v841_v29, %v1789_v37  ;;  %v915_v31 = vadd.f32 %v914_v23, %v1792_v55  ;;  %v843_v32 = vpop.f32.mrb[9].mxu1  ;;  %v916_v24 = vpop.f32.mrb[25].mxu0 }
 0x1cd   :  { %v844_v33 = vadd.f32 %v843_v32, %v1797_v56  ;;  %v917_v34 = vadd.f32 %v916_v24, %v1800_v57  ;;  %v845_v35 = vpop.f32.mrb[10].mxu1  ;;  %v918_v36 = vpop.f32.mrb[26].mxu0 }
 0x1ce   :  { %1030 = vst [vmem:[%s1987_s5 + $0xc0] sm:$0xff] %v842_v30  ;;  %1032 = vst [vmem:[%s1987_s5 + $0xd0] sm:$0xff] %v915_v31  ;;  %v846_v38 = vadd.f32 %v845_v35, %v1789_v37  ;;  %v919_v39 = vadd.f32 %v918_v36, %v1792_v55  ;;  %v847_v40 = vpop.f32.mrb[11].mxu1  ;;  %v920_v41 = vpop.f32.mrb[27].mxu0 }
 0x1cf   :  { %1031 = vst [vmem:[%s1987_s5 + $0xc8] sm:$0xff] %v844_v33  ;;  %1033 = vst [vmem:[%s1987_s5 + $0xd8] sm:$0xff] %v917_v34  ;;  %v848_v42 = vadd.f32 %v847_v40, %v1797_v56  ;;  %v921_v43 = vadd.f32 %v920_v41, %v1800_v57 }
 0x1d0   :  { %1036 = vst [vmem:[%s1987_s5 + $0xf0] sm:$0xff] %v846_v38  ;;  %1038 = vst [vmem:[%s1987_s5 + $0x100] sm:$0xff] %v919_v39 }
 0x1d1   :  { %1037 = vst [vmem:[%s1987_s5 + $0xf8] sm:$0xff] %v848_v42  ;;  %1039 = vst [vmem:[%s1987_s5 + $0x108] sm:$0xff] %v921_v43 }
 0x1d3   :  { %v851_v44 = vpop.f32.mrb[12].mxu1  ;;  %v924_v45 = vpop.f32.mrb[28].mxu0 }
 0x1d4   :  { %v852_v46 = vadd.f32 %v851_v44, %v1789_v37  ;;  %v925_v47 = vadd.f32 %v924_v45, %v1792_v55  ;;  %v853_v48 = vpop.f32.mrb[13].mxu1  ;;  %v926_v49 = vpop.f32.mrb[29].mxu0 }
 0x1d5   :  { %v854_v50 = vadd.f32 %v853_v48, %v1797_v56  ;;  %v927_v51 = vadd.f32 %v926_v49, %v1800_v57  ;;  %v855_v52 = vpop.f32.mrb[14].mxu1  ;;  %v928_v54 = vpop.f32.mrb[30].mxu0 }
 0x1d6   :  { %1042 = vst [vmem:[%s1987_s5 + $0x120] sm:$0xff] %v852_v46  ;;  %1044 = vst [vmem:[%s1987_s5 + $0x130] sm:$0xff] %v925_v47  ;;  %v856_v58 = vadd.f32 %v855_v52, %v1789_v37  ;;  %v929_v59 = vadd.f32 %v928_v54, %v1792_v55  ;;  %v857_v60 = vpop.f32.mrb[15].mxu1  ;;  %v930_v61 = vpop.f32.mrb[31].mxu0  ;;  %v295_v37 = vsub.s32 4, %v1615_v19  ;;  %v299_v55 = vsub.s32 5, %v1615_v19 }
 0x1d7   :  { %1043 = vst [vmem:[%s1987_s5 + $0x128] sm:$0xff] %v854_v50  ;;  %1045 = vst [vmem:[%s1987_s5 + $0x138] sm:$0xff] %v927_v51  ;;  %v858_v62 = vadd.f32 %v857_v60, %v1797_v56  ;;  %v931_v20 = vadd.f32 %v930_v61, %v1800_v57 }
 0x1d8   :  { %1048 = vst [vmem:[%s1987_s5 + $0x150] sm:$0xff] %v856_v58  ;;  %1050 = vst [vmem:[%s1987_s5 + $0x160] sm:$0xff] %v929_v59  ;;  %v296_v56 = vrot.slane %v1783_v53, %v295_v37  ;;  %v300_v57 = vrot.slane %v1783_v53, %v299_v55 }
 0x1d9   :  { %1049 = vst [vmem:[%s1987_s5 + $0x158] sm:$0xff] %v858_v62  ;;  %1051 = vst [vmem:[%s1987_s5 + $0x168] sm:$0xff] %v931_v20 }
 0x1fb   :  { %v967_v63 = vpop.f32.mrb[32].mxu0  ;;  %v977_v0 = vpop.f32.mrb[16].mxu1 }
 0x1fc   :  { %v968_v1 = vadd.f32 %v967_v63, %v296_v56  ;;  %v978_v2 = vadd.f32 %v977_v0, %v296_v56  ;;  %v969_v22 = vpop.f32.mrb[33].mxu0  ;;  %v979_v3 = vpop.f32.mrb[17].mxu1 }
 0x1fd   :  { %v970_v4 = vadd.f32 %v969_v22, %v300_v57  ;;  %v980_v5 = vadd.f32 %v979_v3, %v300_v57  ;;  %v971_v6 = vpop.f32.mrb[34].mxu0  ;;  %v981_v7 = vpop.f32.mrb[18].mxu1 }
 0x1fe   :  { %1010 = vst [vmem:[%s1987_s5 + $0x20] sm:$0xff] %v968_v1  ;;  %1022 = vst [vmem:[%s1987_s5 + $0x80] sm:$0xff] %v978_v2  ;;  %v972_v19 = vadd.f32 %v971_v6, %v296_v56  ;;  %v982_v53 = vadd.f32 %v981_v7, %v296_v56  ;;  %v973_v8 = vpop.f32.mrb[35].mxu0  ;;  %v983_v9 = vpop.f32.mrb[19].mxu1 }
 0x1ff   :  { %1011 = vst [vmem:[%s1987_s5 + $0x28] sm:$0xff] %v970_v4  ;;  %1023 = vst [vmem:[%s1987_s5 + $0x88] sm:$0xff] %v980_v5  ;;  %v974_v10 = vadd.f32 %v973_v8, %v300_v57  ;;  %v984_v11 = vadd.f32 %v983_v9, %v300_v57 }
 0x200   :  { %1016 = vst [vmem:[%s1987_s5 + $0x50] sm:$0xff] %v972_v19  ;;  %1028 = vst [vmem:[%s1987_s5 + $0xb0] sm:$0xff] %v982_v53 }
 0x201   :  { %1017 = vst [vmem:[%s1987_s5 + $0x58] sm:$0xff] %v974_v10  ;;  %1029 = vst [vmem:[%s1987_s5 + $0xb8] sm:$0xff] %v984_v11 }
 0x203   :  { %v987_v12 = vpop.f32.mrb[20].mxu1 }
 0x204   :  { %v988_v13 = vadd.f32 %v987_v12, %v296_v56  ;;  %v989_v14 = vpop.f32.mrb[21].mxu1 }
 0x205   :  { %v990_v15 = vadd.f32 %v989_v14, %v300_v57  ;;  %v991_v16 = vpop.f32.mrb[22].mxu1 }
 0x206   :  { %1034 = vst [vmem:[%s1987_s5 + $0xe0] sm:$0xff] %v988_v13  ;;  %v992_v17 = vadd.f32 %v991_v16, %v296_v56  ;;  %v993_v18 = vpop.f32.mrb[23].mxu1 }
 0x207   :  { %1035 = vst [vmem:[%s1987_s5 + $0xe8] sm:$0xff] %v990_v15  ;;  %v994_v21 = vadd.f32 %v993_v18, %v300_v57 }
 0x208   :  { %1040 = vst [vmem:[%s1987_s5 + $0x110] sm:$0xff] %v992_v17 }
 0x209   :  { %1041 = vst [vmem:[%s1987_s5 + $0x118] sm:$0xff] %v994_v21 }
 0x20b   :  { %v997_v25 = vpop.f32.mrb[24].mxu1 }
 0x20c   :  { %v998_v26 = vadd.f32 %v997_v25, %v296_v56  ;;  %v999_v27 = vpop.f32.mrb[25].mxu1 }
 0x20d   :  { %v1000_v28 = vadd.f32 %v999_v27, %v300_v57  ;;  %v1001_v29 = vpop.f32.mrb[26].mxu1 }
 0x20e   :  { %1046 = vst [vmem:[%s1987_s5 + $0x140] sm:$0xff] %v998_v26  ;;  %v1002_v23 = vadd.f32 %v1001_v29, %v296_v56  ;;  %v1003_v30 = vpop.f32.mrb[27].mxu1 }
 0x20f   :  { %1047 = vst [vmem:[%s1987_s5 + $0x148] sm:$0xff] %v1000_v28  ;;  %v1004_v31 = vadd.f32 %v1003_v30, %v300_v57 }
 0x210   :  { %1052 = vst [vmem:[%s1987_s5 + $0x170] sm:$0xff] %v1002_v23 }
 0x211   :  { %1053 = vst [vmem:[%s1987_s5 + $0x178] sm:$0xff] %v1004_v31 }

// kernel: wdr_forward.5
= control target key start
LH: loop header
LB: loop body
LE: loop exit
PB: predicated region body
PF: predicated region fallthrough
CT: control target
= control target key end

     0   :  { %vm299_vm0 = vcmask 1041408   ;;  %v2036_v1 = vmov 0   ;;  %vm59_vm1 = vcmask 160768   ;;  %vm259_vm2 = vcmask 1041409   ;;  %s2743_s4 = inlined_call_operand.vmem [shape: bf16[20,256], index: 4, kind: input, shape index: {}]   ;;  %s2744_s6 = inlined_call_operand.vmem [shape: bf16[46,256], index: 6, kind: input, shape index: {}]   ;;  %s2745_s0 = inlined_call_operand.vmem [shape: f32[8,6,20], index: 0, kind: input, shape index: {}]   ;;  %s2746_s10 = inlined_call_operand.vmem [shape: bf16[768,256], index: 10, kind: input, shape index: {}]   ;;  %s2747_s3 = inlined_call_operand.vmem [shape: f32[1,20], index: 3, kind: input, shape index: {}]   ;;  %s2748_s1 = inlined_call_operand.vmem [shape: f32[8,46], index: 1, kind: input, shape index: {}]   ;;  %s2749_s5 = inlined_call_operand.vmem [shape: f32[1,256], index: 5, kind: input, shape index: {}]   ;;  %s2750_s8 = inlined_call_operand.vmem [shape: f32[1,256], index: 8, kind: input, shape index: {}]   ;;  %s2751_s9 = inlined_call_operand.vmem [shape: f32[1,256], index: 9, kind: input, shape index: {}]   ;;  %s2752_s7 = inlined_call_operand.vmem [shape: f32[1,256], index: 7, kind: input, shape index: {}]   ;;  %s2753_s2 = inlined_call_operand.vmem [shape: f32[8,256], index: 2, kind: input, shape index: {}]   ;;  %s2754_s11 = inlined_call_operand.vmem [shape: bf16[256,256], index: 11, kind: input, shape index: {}]   ;;  %s2755_s13 = inlined_call_operand.vmem [shape: bf16[256,128], index: 13, kind: input, shape index: {}]   ;;  %s2756_s12 = inlined_call_operand.vmem [shape: f32[1,256], index: 12, kind: input, shape index: {}]   ;;  %s2757_s14 = inlined_call_operand.vmem [shape: f32[1,128], index: 14, kind: input, shape index: {}]   ;;  %s2758_s15 = inlined_call_operand.vmem [shape: f32[8,128], index: 15, kind: output, shape index: {}]  }
   0x1   :  { %v229_v0 = vld [vmem:[%s2743_s4 + $0x10] sm:$0x33]  ;;  %338 = vmatprep.mubr.bf16.mxu0 %v2036_v1  ;;  %v1814_v2 = vld [vmem:[%s2743_s4 + $0x4] ss:$8 sps:$4 sm:$0xff]   ;;  %v1817_v4 = vld [vmem:[%s2743_s4] ss:$8 sps:$4 sm:$0xff]  }
   0x2   :  { %v1629_v3 = vcombine.high %v229_v0, %v229_v0  ;;  %v1628_v5 = vcombine.low %v229_v0, %v229_v0  ;;  %306 = vmatprep.subr.bf16.mxu0 %v1814_v2  ;;  %v1821_v7 = vld [vmem:[%s2744_s6 + $0x4] ss:$8 sps:$4 sm:$0xff]   ;;  %v53_v10 = vld [vmem:[%s2745_s0 + $0x10] sm:$0x3f]  ;;  %v54_v11 = vld [vmem:[%s2745_s0 + $0x18] sm:$0x3f] }
   0x3   :  { %v51_v8 = vld [vmem:[%s2745_s0] sm:$0x3f]  ;;  %v52_v9 = vld [vmem:[%s2745_s0 + $0x8] sm:$0x3f]  ;;  %307 = vmatpush1.bf16.msra.mxu0 %v1817_v4  ;;  %v2157_v15 = vld [vmem:[%s2745_s0 + $0x30] sm:$0x3f]  ;;  %v2166_v18 = vmul.f32 %v53_v10, %v53_v10  ;;  %v2168_v19 = vmul.f32 %v54_v11, %v54_v11 }
   0x4   :  { %v301_v6 = vsel %vm299_vm0, %v1628_v5, 0  ;;  %v55_v12 = vld [vmem:[%s2745_s0 + $0x20] sm:$0x3f]  ;;  %v2146_v13 = vmul.f32 %v51_v8, %v51_v8  ;;  %1630 = vmatprep.subr.msk.bf16.mxu0 %vm299_vm0, %v1629_v3  ;;  %v2152_v14 = vld [vmem:[%s2745_s0 + $0x28] sm:$0x3f]  ;;  %v2164_v17 = vmul.f32 %v52_v9, %v52_v9  ;;  %v60_v21 = vsel %vm59_vm1, %v51_v8, 0.0 }
   0x5   :  { %v2162_v16 = vld [vmem:[%s2745_s0 + $0x38] sm:$0x3f]  ;;  %v2170_v20 = vmul.f32 %v55_v12, %v55_v12  ;;  %v67_v22 = vsel %vm59_vm1, %v52_v9, 0.0  ;;  %v74_v23 = vsel %vm59_vm1, %v53_v10, 0.0  ;;  %v81_v24 = vsel %vm59_vm1, %v54_v11, 0.0 }
   0x6   :  { %v61_v25 = vrot.slane %v60_v21, 4  ;;  %v68_v26 = vrot.slane %v67_v22, 4  ;;  %v75_v27 = vrot.slane %v74_v23, 4  ;;  %v82_v28 = vrot.slane %v81_v24, 4  ;;  %v1828_v53 = vld [vmem:[%s2746_s10 + $0x4] ss:$8 sps:$4 sm:$0xff]  }
   0x7   :  { %309 = vmatpush1.bf16.msra.mxu0 %v301_v6  ;;  %v88_v29 = vsel %vm59_vm1, %v55_v12, 0.0  ;;  %v95_v30 = vsel %vm59_vm1, %v2152_v14, 0.0  ;;  %v102_v31 = vsel %vm59_vm1, %v2157_v15, 0.0  ;;  %v109_v32 = vsel %vm59_vm1, %v2162_v16, 0.0  ;;  %v1830_v54 = vld [vmem:[%s2746_s10] ss:$8 sps:$4 sm:$0xff]   ;;  %1067 = vmatprep.subr.bf16.mxu1 %v1828_v53 }
   0x8   :  { %436 = vmatprep.subr.bf16.mxu0 %v1821_v7  ;;  %v62_v33 = vadd.f32 %v61_v25, %v60_v21  ;;  %v69_v34 = vadd.f32 %v68_v26, %v67_v22  ;;  %v76_v35 = vadd.f32 %v75_v27, %v74_v23  ;;  %v83_v36 = vadd.f32 %v82_v28, %v81_v24  ;;  %v1831_v59 = vld [vmem:[%s2746_s10 + $0x14] ss:$8 sps:$4 sm:$0xff]   ;;  %v1833_v5 = vld [vmem:[%s2746_s10 + $0x10] ss:$8 sps:$4 sm:$0xff]   ;;  %v1834_v10 = vld [vmem:[%s2746_s10 + $0x24] ss:$8 sps:$4 sm:$0xff]  }
   0x9   :  { %v89_v37 = vrot.slane %v88_v29, 4  ;;  %v96_v38 = vrot.slane %v95_v30, 4  ;;  %v103_v39 = vrot.slane %v102_v31, 4  ;;  %v110_v40 = vrot.slane %v109_v32, 4  ;;  %1068 = vmatpush1.bf16.msra.mxu1 %v1830_v54 }
   0xa   :  { %v63_v41 = vrot.slane %v62_v33, 2  ;;  %v70_v42 = vrot.slane %v69_v34, 2  ;;  %v77_v43 = vrot.slane %v76_v35, 2  ;;  %v84_v44 = vrot.slane %v83_v36, 2  ;;  %1069 = vmatprep.subr.bf16.mxu1 %v1831_v59  ;;  %v1848_v59 = vld [vmem:[%s2746_s10 + $0x40] ss:$8 sps:$4 sm:$0xff]  }
   0xb   :  { %v90_v45 = vadd.f32 %v89_v37, %v88_v29  ;;  %v97_v46 = vadd.f32 %v96_v38, %v95_v30  ;;  %v104_v47 = vadd.f32 %v103_v39, %v102_v31  ;;  %v111_v48 = vadd.f32 %v110_v40, %v109_v32  ;;  %v1836_v31 = vld [vmem:[%s2746_s10 + $0x20] ss:$8 sps:$4 sm:$0xff]  }
   0xc   :  { %v64_v49 = vadd.f32 %v63_v41, %v62_v33  ;;  %v71_v50 = vadd.f32 %v70_v42, %v69_v34  ;;  %v78_v51 = vadd.f32 %v77_v43, %v76_v35  ;;  %v85_v52 = vadd.f32 %v84_v44, %v83_v36  ;;  %v1840_v36 = vld [vmem:[%s2746_s10 + $0x34] ss:$8 sps:$4 sm:$0xff]   ;;  %v1842_v41 = vld [vmem:[%s2746_s10 + $0x30] ss:$8 sps:$4 sm:$0xff]  }
   0xd   :  { %v91_v55 = vrot.slane %v90_v45, 2  ;;  %v98_v56 = vrot.slane %v97_v46, 2  ;;  %v105_v57 = vrot.slane %v104_v47, 2  ;;  %v112_v58 = vrot.slane %v111_v48, 2  ;;  %1070 = vmatpush1.bf16.msra.mxu1 %v1833_v5 }
   0xe   :  { %v65_v60 = vrot.slane %v64_v49, 1  ;;  %v72_v61 = vrot.slane %v71_v50, 1  ;;  %v79_v62 = vrot.slane %v78_v51, 1  ;;  %v86_v63 = vrot.slane %v85_v52, 1  ;;  %1071 = vmatprep.subr.bf16.mxu1 %v1834_v10 }
   0xf   :  { %v92_v0 = vadd.f32 %v91_v55, %v90_v45  ;;  %v99_v2 = vadd.f32 %v98_v56, %v97_v46  ;;  %v106_v3 = vadd.f32 %v105_v57, %v104_v47  ;;  %v113_v4 = vadd.f32 %v112_v58, %v111_v48 }
  0x10   :  { %v66_v6 = vadd.f32 %v65_v60, %v64_v49  ;;  %v73_v7 = vadd.f32 %v72_v61, %v71_v50  ;;  %v80_v8 = vadd.f32 %v79_v62, %v78_v51  ;;  %v87_v9 = vadd.f32 %v86_v63, %v85_v52 }
  0x11   :  { %v93_v11 = vrot.slane %v92_v0, 1  ;;  %v100_v12 = vrot.slane %v99_v2, 1  ;;  %v107_v21 = vrot.slane %v106_v3, 1  ;;  %v114_v22 = vrot.slane %v113_v4, 1  ;;  %1072 = vmatpush1.bf16.msra.mxu1 %v1836_v31  ;;  %v1858_v31 = vld [vmem:[%s2746_s10 + $0x64] ss:$8 sps:$4 sm:$0xff]  }
  0x12   :  { %v2198_v23 = vmul.f32 %v66_v6, %v66_v6  ;;  %v2200_v24 = vmul.f32 %v73_v7, %v73_v7  ;;  %v2202_v25 = vmul.f32 %v80_v8, %v80_v8  ;;  %v2204_v26 = vmul.f32 %v87_v9, %v87_v9  ;;  %1073 = vmatprep.subr.bf16.mxu1 %v1840_v36 }
  0x13   :  { %v94_v27 = vadd.f32 %v93_v11, %v92_v0  ;;  %v101_v28 = vadd.f32 %v100_v12, %v99_v2  ;;  %v108_v29 = vadd.f32 %v107_v21, %v106_v3  ;;  %v115_v30 = vadd.f32 %v114_v22, %v113_v4  ;;  %v1852_v0 = vld [vmem:[%s2746_s10 + $0x54] ss:$8 sps:$4 sm:$0xff]   ;;  %v1854_v22 = vld [vmem:[%s2746_s10 + $0x50] ss:$8 sps:$4 sm:$0xff]  }
  0x14   :  { %v129_v32 = vmul.f32 %v2152_v14, %v2152_v14  ;;  %v130_v33 = vmul.f32 %v2157_v15, %v2157_v15  ;;  %v131_v34 = vmul.f32 %v2162_v16, %v2162_v16  ;;  %v132_v35 = vsel %vm59_vm1, %v2146_v13, 0.0 }
  0x15   :  { %v2220_v37 = vmul.f32 %v94_v27, %v94_v27  ;;  %v2222_v38 = vmul.f32 %v101_v28, %v101_v28  ;;  %v2224_v39 = vmul.f32 %v108_v29, %v108_v29  ;;  %v2226_v14 = vmul.f32 %v115_v30, %v115_v30  ;;  %1074 = vmatpush1.bf16.msra.mxu1 %v1842_v41 }
  0x16   :  { %v133_v15 = vrot.slane %v132_v35, 4  ;;  %v139_v16 = vsel %vm59_vm1, %v2164_v17, 0.0  ;;  %v146_v13 = vsel %vm59_vm1, %v2166_v18, 0.0  ;;  %v153_v40 = vsel %vm59_vm1, %v2168_v19, 0.0  ;;  %v1846_v19 = vld [vmem:[%s2746_s10 + $0x44] ss:$8 sps:$4 sm:$0xff]  }
  0x17   :  { %v140_v42 = vrot.slane %v139_v16, 4  ;;  %v147_v43 = vrot.slane %v146_v13, 4  ;;  %v154_v44 = vrot.slane %v153_v40, 4  ;;  %v160_v45 = vsel %vm59_vm1, %v2170_v20, 0.0  ;;  %1075 = vmatprep.subr.bf16.mxu1 %v1846_v19 }
  0x18   :  { %v134_v46 = vadd.f32 %v133_v15, %v132_v35  ;;  %v161_v47 = vrot.slane %v160_v45, 4  ;;  %v167_v17 = vsel %vm59_vm1, %v129_v32, 0.0  ;;  %v174_v18 = vsel %vm59_vm1, %v130_v33, 0.0 }
  0x19   :  { %v141_v48 = vadd.f32 %v140_v42, %v139_v16  ;;  %v148_v49 = vadd.f32 %v147_v43, %v146_v13  ;;  %v155_v50 = vadd.f32 %v154_v44, %v153_v40  ;;  %v168_v51 = vrot.slane %v167_v17, 4  ;;  %1076 = vmatpush1.bf16.msra.mxu1 %v1848_v59  ;;  %v1625_v44 = vld [vmem:[%s2747_s3] ss:$0 sm:$0xff] }
  0x1a   :  { %v135_v52 = vrot.slane %v134_v46, 2  ;;  %v162_v53 = vadd.f32 %v161_v47, %v160_v45  ;;  %v175_v54 = vrot.slane %v174_v18, 4  ;;  %v181_v20 = vsel %vm59_vm1, %v131_v34, 0.0  ;;  %1077 = vmatprep.subr.bf16.mxu1 %v1852_v0  ;;  %v1860_v45 = vld [vmem:[%s2746_s10 + $0x60] ss:$8 sps:$4 sm:$0xff]  }
  0x1b   :  { %v142_v55 = vrot.slane %v141_v48, 2  ;;  %v149_v56 = vrot.slane %v148_v49, 2  ;;  %v156_v57 = vrot.slane %v155_v50, 2  ;;  %v169_v58 = vadd.f32 %v168_v51, %v167_v17 }
  0x1c   :  { %v136_v60 = vadd.f32 %v135_v52, %v134_v46  ;;  %v163_v61 = vrot.slane %v162_v53, 2  ;;  %v176_v62 = vadd.f32 %v175_v54, %v174_v18  ;;  %v182_v63 = vrot.slane %v181_v20, 4 }
  0x1d   :  { %v143_v2 = vadd.f32 %v142_v55, %v141_v48  ;;  %v150_v3 = vadd.f32 %v149_v56, %v148_v49  ;;  %v157_v4 = vadd.f32 %v156_v57, %v155_v50  ;;  %v170_v5 = vrot.slane %v169_v58, 2  ;;  %1078 = vmatpush1.bf16.msra.mxu1 %v1854_v22 }
  0x1e   :  { %v137_v6 = vrot.slane %v136_v60, 1  ;;  %v164_v7 = vadd.f32 %v163_v61, %v162_v53  ;;  %v177_v8 = vrot.slane %v176_v62, 2  ;;  %v183_v9 = vadd.f32 %v182_v63, %v181_v20  ;;  %1079 = vmatprep.subr.bf16.mxu1 %v1858_v31  ;;  %v1866_v20 = vld [vmem:[%s2746_s10 + $0x70] ss:$8 sps:$4 sm:$0xff]  }
  0x1f   :  { %v144_v10 = vrot.slane %v143_v2, 1  ;;  %v151_v11 = vrot.slane %v150_v3, 1  ;;  %v158_v12 = vrot.slane %v157_v4, 1  ;;  %v171_v21 = vadd.f32 %v170_v5, %v169_v58 }
  0x20   :  { %v138_v27 = vadd.f32 %v137_v6, %v136_v60  ;;  %v165_v28 = vrot.slane %v164_v7, 1  ;;  %v178_v29 = vadd.f32 %v177_v8, %v176_v62  ;;  %v184_v30 = vrot.slane %v183_v9, 2  ;;  %v1872_v6 = vld [vmem:[%s2746_s10 + $0x80] ss:$8 sps:$4 sm:$0xff]  }
  0x21   :  { %v145_v32 = vadd.f32 %v144_v10, %v143_v2  ;;  %v152_v33 = vadd.f32 %v151_v11, %v150_v3  ;;  %v159_v34 = vadd.f32 %v158_v12, %v157_v4  ;;  %v172_v35 = vrot.slane %v171_v21, 1  ;;  %1080 = vmatpush1.bf16.msra.mxu1 %v1860_v45  ;;  %v1876_v10 = vld [vmem:[%s2746_s10 + $0x94] ss:$8 sps:$4 sm:$0xff]  }
  0x22   :  { %v166_v36 = vadd.f32 %v165_v28, %v164_v7  ;;  %v179_v15 = vrot.slane %v178_v29, 1  ;;  %v185_v16 = vadd.f32 %v184_v30, %v183_v9  ;;  %v188_v13 = vsub.f32 %v2198_v23, %v138_v27  ;;  %v1824_v45 = vld [vmem:[%s2744_s6 + $0x14] ss:$8 sps:$4 sm:$0xff]  }
  0x23   :  { %v173_v40 = vadd.f32 %v172_v35, %v171_v21  ;;  %v189_v41 = vsub.f32 %v2200_v24, %v145_v32  ;;  %v190_v42 = vsub.f32 %v2202_v25, %v152_v33  ;;  %v191_v43 = vsub.f32 %v2204_v26, %v159_v34  ;;  %v1864_v24 = vld [vmem:[%s2746_s10 + $0x74] ss:$8 sps:$4 sm:$0xff]   ;;  %v1878_v32 = vld [vmem:[%s2746_s10 + $0x90] ss:$8 sps:$4 sm:$0xff]  }
  0x24   :  { %v180_v46 = vadd.f32 %v179_v15, %v178_v29  ;;  %v186_v47 = vrot.slane %v185_v16, 1  ;;  %v192_v23 = vsub.f32 %v2220_v37, %v166_v36  ;;  %v196_v17 = vmul.f32 0.5, %v188_v13  ;;  %1081 = vmatprep.subr.bf16.mxu1 %v1864_v24  ;;  %v1882_v36 = vld [vmem:[%s2746_s10 + $0xa4] ss:$8 sps:$4 sm:$0xff]   ;;  %v1822_v24 = vld [vmem:[%s2744_s6 + $0x10] ss:$8 sps:$4 sm:$0xff]  }
  0x25   :  { %v193_v25 = vsub.f32 %v2222_v38, %v173_v40  ;;  %v197_v26 = vmul.f32 0.5, %v189_v41  ;;  %v198_v18 = vmul.f32 0.5, %v190_v42  ;;  %v199_v19 = vmul.f32 0.5, %v191_v43  ;;  %1082 = vmatpush1.bf16.msra.mxu1 %v1866_v20  ;;  %v1888_v41 = vld [vmem:[%s2746_s10 + $0xb4] ss:$8 sps:$4 sm:$0xff]  }
  0x26   :  { %v187_v48 = vadd.f32 %v186_v47, %v185_v16  ;;  %v194_v49 = vsub.f32 %v2224_v39, %v180_v46  ;;  %v200_v50 = vmul.f32 0.5, %v192_v23  ;;  %v211_v51 = vmul.f32 %v1625_v44, %v196_v17  ;;  %v1870_v39 = vld [vmem:[%s2746_s10 + $0x84] ss:$8 sps:$4 sm:$0xff]   ;;  %v1884_v16 = vld [vmem:[%s2746_s10 + $0xa0] ss:$8 sps:$4 sm:$0xff]  }
  0x27   :  { %v201_v52 = vmul.f32 0.5, %v193_v25  ;;  %v212_v53 = vmul.f32 %v1625_v44, %v197_v26  ;;  %v213_v37 = vmul.f32 %v1625_v44, %v198_v18  ;;  %v214_v54 = vmul.f32 %v1625_v44, %v199_v19  ;;  %1083 = vmatprep.subr.bf16.mxu1 %v1870_v39  ;;  %v1819_v42 = vld [vmem:[%s2744_s6] ss:$8 sps:$4 sm:$0xff]   ;;  %v1890_v47 = vld [vmem:[%s2746_s10 + $0xb0] ss:$8 sps:$4 sm:$0xff]  }
  0x28   :  { %v195_v55 = vsub.f32 %v2226_v14, %v187_v48  ;;  %v202_v38 = vmul.f32 0.5, %v194_v49  ;;  %v215_v56 = vmul.f32 %v1625_v44, %v200_v50  ;;  %v219_v57 = vpack.c.bf16 %v211_v51, %v211_v51  ;;  %v1894_v17 = vld [vmem:[%s2746_s10 + $0xc4] ss:$8 sps:$4 sm:$0xff]   ;;  %v1827_v26 = vld [vmem:[%s2744_s6 + $0x20] ss:$8 sps:$4 sm:$0x7f]  }
  0x29   :  { %v216_v58 = vmul.f32 %v1625_v44, %v201_v52  ;;  %v220_v59 = vpack.c.bf16 %v212_v53, %v212_v53  ;;  %v221_v60 = vpack.c.bf16 %v213_v37, %v213_v37  ;;  %v222_v61 = vpack.c.bf16 %v214_v54, %v214_v54  ;;  %1084 = vmatpush1.bf16.msra.mxu1 %v1872_v6  ;;  %v1825_v25 = vld [vmem:[%s2744_s6 + $0x24] ss:$8 sps:$4 sm:$0x7f]   ;;  %v1896_v18 = vld [vmem:[%s2746_s10 + $0xc0] ss:$8 sps:$4 sm:$0xff]  }
  0x2a   :  { %v203_v62 = vmul.f32 0.5, %v195_v55  ;;  %v217_v63 = vmul.f32 %v1625_v44, %v202_v38  ;;  %v223_v0 = vpack.c.bf16 %v215_v56, %v215_v56  ;;  %v250_v2 = vunpack.c.l.b16 %v219_v57  ;;  %1085 = vmatprep.subr.bf16.mxu1 %v1876_v10  ;;  %v377_v19 = vld [vmem:[%s2748_s1] sm:$0xff]  ;;  %v1845_v51 = vld [vmem:[%s2746_s10 + $0x114] ss:$8 sps:$4 sm:$0xff]   ;;  %v1843_v52 = vld [vmem:[%s2746_s10 + $0x110] ss:$8 sps:$4 sm:$0xff]  }
  0x2b   :  { %v224_v3 = vpack.c.bf16 %v216_v58, %v216_v58  ;;  %v251_v4 = vunpack.c.l.b16 %v220_v59  ;;  %v252_v5 = vunpack.c.l.b16 %v221_v60  ;;  %v253_v14 = vunpack.c.l.b16 %v222_v61  ;;  %v1839_v48 = vld [vmem:[%s2746_s10 + $0x104] ss:$8 sps:$4 sm:$0xff]   ;;  %v1837_v50 = vld [vmem:[%s2746_s10 + $0x100] ss:$8 sps:$4 sm:$0xff]   ;;  %v1857_v54 = vld [vmem:[%s2746_s10 + $0x134] ss:$8 sps:$4 sm:$0xff]  }
  0x2c   :  { %v218_v7 = vmul.f32 %v1625_v44, %v203_v62  ;;  %v225_v8 = vpack.c.bf16 %v217_v63, %v217_v63  ;;  %v254_v9 = vunpack.c.l.b16 %v223_v0  ;;  %vm262_vm3 = vcmask 1042434   ;;  %v1851_v53 = vld [vmem:[%s2746_s10 + $0x124] ss:$8 sps:$4 sm:$0xff]   ;;  %v1849_v37 = vld [vmem:[%s2746_s10 + $0x120] ss:$8 sps:$4 sm:$0xff]  }
  0x2d   :  { %v255_v11 = vunpack.c.l.b16 %v224_v3  ;;  %v258_v12 = vrot.slane %v251_v4, 7  ;;  %v261_v21 = vrot.slane %v252_v5, 6  ;;  %v264_v22 = vrot.slane %v253_v14, 5  ;;  %1086 = vmatpush1.bf16.msra.mxu1 %v1878_v32  ;;  %v1855_v20 = vld [vmem:[%s2746_s10 + $0x130] ss:$8 sps:$4 sm:$0xff]  }
  0x2e   :  { %v226_v27 = vpack.c.bf16 %v218_v7, %v218_v7  ;;  %v256_v28 = vunpack.c.l.b16 %v225_v8  ;;  %vm265_vm4 = vcmask 1043459   ;;  %v267_v29 = vrot.slane %v254_v9, 4  ;;  %1087 = vmatprep.subr.bf16.mxu1 %v1882_v36  ;;  %v1863_v55 = vld [vmem:[%s2746_s10 + $0x144] ss:$8 sps:$4 sm:$0xff]   ;;  %v1861_v38 = vld [vmem:[%s2746_s10 + $0x140] ss:$8 sps:$4 sm:$0xff]  }
  0x2f   :  { %v260_v30 = vsel %vm259_vm2, %v258_v12, %v250_v2  ;;  %vm268_vm5 = vcmask 1044484   ;;  %v270_v31 = vrot.slane %v255_v11, 3  ;;  %vm271_vm6 = vcmask 1045509   ;;  %v1869_v56 = vld [vmem:[%s2746_s10 + $0x154] ss:$8 sps:$4 sm:$0xff]  }
  0x30   :  { %v257_v33 = vunpack.c.l.b16 %v226_v27  ;;  %v263_v34 = vsel %vm262_vm3, %v261_v21, %v260_v30  ;;  %v273_v35 = vrot.slane %v256_v28, 2  ;;  %vm274_vm7 = vcmask 1046534   ;;  %v1867_v57 = vld [vmem:[%s2746_s10 + $0x150] ss:$8 sps:$4 sm:$0xff]   ;;  %v1875_v39 = vld [vmem:[%s2746_s10 + $0x164] ss:$8 sps:$4 sm:$0xff]  }
  0x31   :  { %v266_v15 = vsel %vm265_vm4, %v264_v22, %v263_v34  ;;  %vm277_vm8 = vcmask 1047559   ;;  %vm295_vm9 = vcmask 162816   ;;  %1088 = vmatpush1.bf16.msra.mxu1 %v1884_v16  ;;  %vm429_vm10 = vcmask 1046528   ;;  %v1873_v58 = vld [vmem:[%s2746_s10 + $0x160] ss:$8 sps:$4 sm:$0xff]  }
  0x32   :  { %v269_v13 = vsel %vm268_vm5, %v267_v29, %v266_v15  ;;  %v276_v40 = vrot.slane %v257_v33, 1  ;;  %1089 = vmatprep.subr.bf16.mxu1 %v1888_v41  ;;  %v431_v49 = vsel %vm429_vm10, %v1827_v26, 0  ;;  %vm425_vm11 = vcmask 375808   ;;  %v1881_v59 = vld [vmem:[%s2746_s10 + $0x174] ss:$8 sps:$4 sm:$0xff]  }
  0x33   :  { %v272_v43 = vsel %vm271_vm6, %v270_v31, %v269_v13  ;;  %v1879_v60 = vld [vmem:[%s2746_s10 + $0x170] ss:$8 sps:$4 sm:$0xff]   ;;  %v1887_v61 = vld [vmem:[%s2746_s10 + $0x184] ss:$8 sps:$4 sm:$0xff]   ;;  %v1885_v62 = vld [vmem:[%s2746_s10 + $0x180] ss:$8 sps:$4 sm:$0xff]   ;;  %v232_v32 = vlaneseq }
  0x34   :  { %v275_v44 = vsel %vm274_vm7, %v273_v35, %v272_v43  ;;  %v1893_v63 = vld [vmem:[%s2746_s10 + $0x194] ss:$8 sps:$4 sm:$0xff]   ;;  %v1891_v0 = vld [vmem:[%s2746_s10 + $0x190] ss:$8 sps:$4 sm:$0xff]   ;;  %v1899_v2 = vld [vmem:[%s2746_s10 + $0x1a4] ss:$8 sps:$4 sm:$0xff]  }
  0x35   :  { %v278_v46 = vsel %vm277_vm8, %v276_v40, %v275_v44  ;;  %1090 = vmatpush1.bf16.msra.mxu1 %v1890_v47  ;;  %v1897_v3 = vld [vmem:[%s2746_s10 + $0x1a0] ss:$8 sps:$4 sm:$0xff]   ;;  %v1900_v4 = vld [vmem:[%s2746_s10 + $0xd4] ss:$8 sps:$4 sm:$0xff]   ;;  %v1902_v5 = vld [vmem:[%s2746_s10 + $0xd0] ss:$8 sps:$4 sm:$0xff]  }
  0x36   :  { %v279_v23 = vpack.c.b16 %v278_v46, %v278_v46  ;;  %1091 = vmatprep.subr.bf16.mxu1 %v1894_v17  ;;  %v1905_v14 = vld [vmem:[%s2746_s10 + $0x1b4] ss:$8 sps:$4 sm:$0xff]   ;;  %v1903_v6 = vld [vmem:[%s2746_s10 + $0x1b0] ss:$8 sps:$4 sm:$0xff]   ;;  %v1906_v7 = vld [vmem:[%s2746_s10 + $0xe4] ss:$8 sps:$4 sm:$0xff]  }
  0x37   :  { %v1908_v8 = vld [vmem:[%s2746_s10 + $0xe0] ss:$8 sps:$4 sm:$0xff]   ;;  %v1911_v10 = vld [vmem:[%s2746_s10 + $0x1c4] ss:$8 sps:$4 sm:$0xff]   ;;  %v1912_v11 = vld [vmem:[%s2746_s10 + $0xf4] ss:$8 sps:$4 sm:$0xff]  }
  0x38   :  { %1631 = vmatmul.mubr.msk.bf16.vlgmr.msra.gmra.mrb[0].mxu0 %vm295_vm9, %v279_v23  ;;  %v1909_v9 = vld [vmem:[%s2746_s10 + $0x1c0] ss:$8 sps:$4 sm:$0xff]   ;;  %v1914_v12 = vld [vmem:[%s2746_s10 + $0xf0] ss:$8 sps:$4 sm:$0xff]   ;;  %v1917_v21 = vld [vmem:[%s2746_s10 + $0x1d4] ss:$8 sps:$4 sm:$0xff]  }
  0x39   :  { %437 = vmatpush1.bf16.msra.mxu0 %v1819_v42  ;;  %468 = vmatprep.mubr.bf16.mxu0 %v2036_v1  ;;  %v378_v1 = vpack.c.bf16 %v377_v19, %v377_v19  ;;  %v1915_v22 = vld [vmem:[%s2746_s10 + $0x1d0] ss:$8 sps:$4 sm:$0xff]   ;;  %v1920_v27 = vld [vmem:[%s2746_s10 + $0x1e4] ss:$8 sps:$4 sm:$0xff]   ;;  %v1918_v28 = vld [vmem:[%s2746_s10 + $0x1e0] ss:$8 sps:$4 sm:$0xff]  }
  0x3a   :  { %438 = vmatprep.subr.bf16.mxu0 %v1824_v45  ;;  %1092 = vmatpush1.bf16.msra.mxu1 %v1896_v18  ;;  %v1923_v29 = vld [vmem:[%s2746_s10 + $0x1f4] ss:$8 sps:$4 sm:$0xff]   ;;  %v1921_v30 = vld [vmem:[%s2746_s10 + $0x1f0] ss:$8 sps:$4 sm:$0xff]   ;;  %v1926_v31 = vld [vmem:[%s2746_s10 + $0x204] ss:$8 sps:$4 sm:$0xff]  }
  0x3b   :  { %1093 = vmatprep.subr.bf16.mxu1 %v1900_v4  ;;  %v233_v33 = vshrl.u32 %v232_v32, 7  ;;  %v230_v35 = vld [vmem:[%s2749_s5] sm:$0x3]  ;;  %v1929_v4 = vld [vmem:[%s2746_s10 + $0x214] ss:$8 sps:$4 sm:$0xff]  }
  0x3c   :  { %v347_v15 = vld [vmem:[%s2750_s8] sm:$0x3]  ;;  %v1951_v32 = vld [vmem:[%s2746_s10 + $0x290] ss:$8 sps:$4 sm:$0xff]  }
  0x3d   :  { %439 = vmatpush1.bf16.msra.mxu0 %v1822_v24  ;;  %v2445_v34 = vsub.s32 0, %v233_v33  ;;  %v2450_v36 = vsub.s32 1, %v233_v33  ;;  %v361_v13 = vld [vmem:[%s2751_s9] sm:$0x3]  ;;  %v1956_v33 = vld [vmem:[%s2746_s10 + $0x2a4] ss:$8 sps:$4 sm:$0xff]  }
  0x3e   :  { %1638 = vmatprep.subr.msk.bf16.mxu0 %vm429_vm10, %v1825_v25  ;;  %1094 = vmatpush1.bf16.msra.mxu1 %v1902_v5  ;;  %v385_v19 = vld [vmem:[%s2752_s7] sm:$0x3]  ;;  %v1927_v5 = vld [vmem:[%s2746_s10 + $0x210] ss:$8 sps:$4 sm:$0xff]  }
  0x3f   :  { %1095 = vmatprep.subr.bf16.mxu1 %v1906_v7  ;;  %v235_v16 = vrot.slane %v230_v35, %v2445_v34  ;;  %v239_v40 = vrot.slane %v230_v35, %v2450_v36  ;;  %v2461_v41 = vrot.slane %v347_v15, %v2445_v34  ;;  %v2464_v43 = vrot.slane %v347_v15, %v2450_v36  ;;  %v1935_v7 = vld [vmem:[%s2746_s10 + $0x234] ss:$8 sps:$4 sm:$0xff]   ;;  %v1954_v35 = vld [vmem:[%s2746_s10 + $0x2a0] ss:$8 sps:$4 sm:$0xff]  }
  0x40   :  { %v2467_v45 = vrot.slane %v361_v13, %v2445_v34  ;;  %v2470_v17 = vrot.slane %v361_v13, %v2450_v36  ;;  %v1959_v15 = vld [vmem:[%s2746_s10 + $0x2b4] ss:$8 sps:$4 sm:$0xff]   ;;  %v1962_v13 = vld [vmem:[%s2746_s10 + $0x2c4] ss:$8 sps:$4 sm:$0xff]  }
  0x41   :  { %441 = vmatpush1.bf16.msra.mxu0 %v431_v49 }
  0x42   :  { %1108 = vmatprep.subr.bf16.mxu0 %v1839_v48  ;;  %1096 = vmatpush1.bf16.msra.mxu1 %v1908_v8  ;;  %v1933_v8 = vld [vmem:[%s2746_s10 + $0x230] ss:$8 sps:$4 sm:$0xff]  }
  0x43   :  { %1097 = vmatprep.subr.bf16.mxu1 %v1912_v11  ;;  %v1941_v11 = vld [vmem:[%s2746_s10 + $0x254] ss:$8 sps:$4 sm:$0xff]  }
  0x44   :  { %1639 = vmatmul.mubr.msk.bf16.vlgmr.msra.gmra.mrb[4].mxu0 %vm425_vm11, %v378_v1 }
  0x45   :  { %1109 = vmatpush1.bf16.msra.mxu0 %v1837_v50  ;;  %v390_v50 = vrot.slane %v385_v19, %v2445_v34 }
  0x46   :  { %1110 = vmatprep.subr.bf16.mxu0 %v1845_v51  ;;  %1098 = vmatpush1.bf16.msra.mxu1 %v1914_v12  ;;  %v394_v51 = vrot.slane %v385_v19, %v2450_v36  ;;  %v1939_v12 = vld [vmem:[%s2746_s10 + $0x250] ss:$8 sps:$4 sm:$0xff]   ;;  %v1974_v19 = vld [vmem:[%s2754_s11 + $0x4] ss:$8 sps:$4 sm:$0xff]  }
  0x47   :  { %1396 = vmatprep.subr.bf16.mxu1 %v1974_v19  ;;  %v2035_v19 = vld [vmem:[%s2755_s13 + $0x38] sm:$0xff]  }
  0x49   :  { %1111 = vmatpush1.bf16.msra.mxu0 %v1843_v52 }
  0x4a   :  { %1112 = vmatprep.subr.bf16.mxu0 %v1851_v53 }
  0x4d   :  { %1113 = vmatpush1.bf16.msra.mxu0 %v1849_v37 }
  0x4e   :  { %1114 = vmatprep.subr.bf16.mxu0 %v1857_v54 }
  0x51   :  { %1115 = vmatpush1.bf16.msra.mxu0 %v1855_v20 }
  0x52   :  { %1116 = vmatprep.subr.bf16.mxu0 %v1863_v55 }
  0x55   :  { %1117 = vmatpush1.bf16.msra.mxu0 %v1861_v38 }
  0x56   :  { %1118 = vmatprep.subr.bf16.mxu0 %v1869_v56 }
  0x59   :  { %1119 = vmatpush1.bf16.msra.mxu0 %v1867_v57 }
  0x5a   :  { %1120 = vmatprep.subr.bf16.mxu0 %v1875_v39 }
  0x5d   :  { %1121 = vmatpush1.bf16.msra.mxu0 %v1873_v58 }
  0x5e   :  { %1122 = vmatprep.subr.bf16.mxu0 %v1881_v59 }
  0x61   :  { %1123 = vmatpush1.bf16.msra.mxu0 %v1879_v60 }
  0x62   :  { %1124 = vmatprep.subr.bf16.mxu0 %v1887_v61  ;;  %v484_v61 = vld [vmem:[%s2753_s2 + $0x8] sm:$0xff] }
  0x65   :  { %1125 = vmatpush1.bf16.msra.mxu0 %v1885_v62 }
  0x66   :  { %1126 = vmatprep.subr.bf16.mxu0 %v1893_v63 }
  0x69   :  { %1127 = vmatpush1.bf16.msra.mxu0 %v1891_v0  ;;  %v1924_v0 = vld [vmem:[%s2746_s10 + $0x200] ss:$8 sps:$4 sm:$0xff]  }
  0x6a   :  { %1128 = vmatprep.subr.bf16.mxu0 %v1899_v2  ;;  %v490_v2 = vpack.c.bf16 %v484_v61, %v484_v61  ;;  %v2004_v61 = vld [vmem:[%s2754_s11 + $0xa4] ss:$8 sps:$4 sm:$0xff]  }
  0x6d   :  { %1129 = vmatpush1.bf16.msra.mxu0 %v1897_v3 }
  0x6e   :  { %1130 = vmatprep.subr.bf16.mxu0 %v1905_v14  ;;  %v1932_v14 = vld [vmem:[%s2746_s10 + $0x224] ss:$8 sps:$4 sm:$0xff]  }
  0x71   :  { %1131 = vmatpush1.bf16.msra.mxu0 %v1903_v6  ;;  %v1930_v6 = vld [vmem:[%s2746_s10 + $0x220] ss:$8 sps:$4 sm:$0xff]  }
  0x72   :  { %1132 = vmatprep.subr.bf16.mxu0 %v1911_v10  ;;  %v1936_v10 = vld [vmem:[%s2746_s10 + $0x240] ss:$8 sps:$4 sm:$0xff]  }
  0x75   :  { %1133 = vmatpush1.bf16.msra.mxu0 %v1909_v9  ;;  %v1938_v9 = vld [vmem:[%s2746_s10 + $0x244] ss:$8 sps:$4 sm:$0xff]  }
  0x76   :  { %1134 = vmatprep.subr.bf16.mxu0 %v1917_v21  ;;  %v1944_v21 = vld [vmem:[%s2746_s10 + $0x264] ss:$8 sps:$4 sm:$0xff]  }
  0x79   :  { %1135 = vmatpush1.bf16.msra.mxu0 %v1915_v22  ;;  %v1942_v22 = vld [vmem:[%s2746_s10 + $0x260] ss:$8 sps:$4 sm:$0xff]  }
  0x7a   :  { %1136 = vmatprep.subr.bf16.mxu0 %v1920_v27  ;;  %v1947_v27 = vld [vmem:[%s2746_s10 + $0x274] ss:$8 sps:$4 sm:$0xff]  }
  0x7d   :  { %1137 = vmatpush1.bf16.msra.mxu0 %v1918_v28  ;;  %v1945_v28 = vld [vmem:[%s2746_s10 + $0x270] ss:$8 sps:$4 sm:$0xff]  }
  0x7e   :  { %1138 = vmatprep.subr.bf16.mxu0 %v1923_v29  ;;  %v1950_v29 = vld [vmem:[%s2746_s10 + $0x284] ss:$8 sps:$4 sm:$0xff]  }
  0x81   :  { %1139 = vmatpush1.bf16.msra.mxu0 %v1921_v30  ;;  %v1948_v30 = vld [vmem:[%s2746_s10 + $0x280] ss:$8 sps:$4 sm:$0xff]  }
  0x82   :  { %1149 = vmatprep.subr.bf16.mxu0 %v1926_v31  ;;  %v1953_v31 = vld [vmem:[%s2746_s10 + $0x294] ss:$8 sps:$4 sm:$0xff]  }
 0x10b   :  { %v340_v42 = vpop.f32.mrb[0].mxu0 }
 0x10c   :  { %v341_v44 = vadd.f32 %v340_v42, %v235_v16  ;;  %v342_v46 = vpop.f32.mrb[1].mxu0  ;;  %v1957_v16 = vld [vmem:[%s2746_s10 + $0x2b0] ss:$8 sps:$4 sm:$0xff]   ;;  %v1965_v42 = vld [vmem:[%s2746_s10 + $0x2d4] ss:$8 sps:$4 sm:$0xff]  }
 0x10d   :  { %v343_v47 = vadd.f32 %v342_v46, %v239_v40  ;;  %v344_v23 = vpop.f32.mrb[2].mxu0  ;;  %v1960_v40 = vld [vmem:[%s2746_s10 + $0x2c0] ss:$8 sps:$4 sm:$0xff]   ;;  %v1968_v46 = vld [vmem:[%s2746_s10 + $0x2e4] ss:$8 sps:$4 sm:$0xff]  }
 0x10e   :  { %v359_v24 = vmul.f32 %v2461_v41, %v341_v44  ;;  %v345_v25 = vpop.f32.mrb[3].mxu0  ;;  %v1963_v44 = vld [vmem:[%s2746_s10 + $0x2d0] ss:$8 sps:$4 sm:$0xff]   ;;  %v1971_v23 = vld [vmem:[%s2746_s10 + $0x2f4] ss:$8 sps:$4 sm:$0xff]  }
 0x10f   :  { %v360_v26 = vmul.f32 %v2464_v43, %v343_v47  ;;  %v1966_v47 = vld [vmem:[%s2746_s10 + $0x2e0] ss:$8 sps:$4 sm:$0xff]  }
 0x110   :  { %v373_v18 = vadd.f32 %v2467_v45, %v359_v24  ;;  %v1969_v24 = vld [vmem:[%s2746_s10 + $0x2f0] ss:$8 sps:$4 sm:$0xff]   ;;  %v483_v25 = vld [vmem:[%s2753_s2] sm:$0xff] }
 0x111   :  { %v374_v48 = vadd.f32 %v2470_v17, %v360_v26  ;;  %v489_v26 = vpack.c.bf16 %v483_v25, %v483_v25  ;;  %v2032_v25 = vld [vmem:[%s2755_s13 + $0x70] sm:$0xff]  }
 0x112   :  { %v375_v49 = vmax.f32 %v373_v18, 0.0  ;;  %v1972_v18 = vld [vmem:[%s2754_s11] ss:$8 sps:$4 sm:$0xff]  }
 0x113   :  { %v376_v1 = vmax.f32 %v374_v48, 0.0  ;;  %v1977_v48 = vld [vmem:[%s2754_s11 + $0x14] ss:$8 sps:$4 sm:$0xff]  }
 0x114   :  { %v485_v53 = vpack.c.bf16 %v375_v49, %v375_v49  ;;  %v1975_v49 = vld [vmem:[%s2754_s11 + $0x10] ss:$8 sps:$4 sm:$0xff]  }
 0x115   :  { %v486_v52 = vpack.c.bf16 %v376_v1, %v376_v1  ;;  %v1980_v1 = vld [vmem:[%s2754_s11 + $0x24] ss:$8 sps:$4 sm:$0xff]  }
 0x117   :  { %v470_v37 = vpop.f32.mrb[4].mxu0  ;;  %1099 = vmatprep.mubr.bf16.mxu1 %v486_v52  ;;  %v1981_v52 = vld [vmem:[%s2754_s11 + $0x30] ss:$8 sps:$4 sm:$0xff]  }
 0x118   :  { %v471_v54 = vadd.f32 %v470_v37, %v390_v50  ;;  %v472_v20 = vpop.f32.mrb[5].mxu0  ;;  %1100 = vmatmul.mubr.bf16.vlgmr.msra.gmra.mrb[0].mxu1 %v485_v53  ;;  %v1978_v50 = vld [vmem:[%s2754_s11 + $0x20] ss:$8 sps:$4 sm:$0xff]   ;;  %v1986_v53 = vld [vmem:[%s2754_s11 + $0x44] ss:$8 sps:$4 sm:$0xff]  }
 0x119   :  { %v473_v55 = vadd.f32 %v472_v20, %v394_v51  ;;  %v474_v38 = vpop.f32.mrb[6].mxu0  ;;  %1397 = vmatpush1.bf16.msra.mxu1 %v1972_v18  ;;  %v1983_v51 = vld [vmem:[%s2754_s11 + $0x34] ss:$8 sps:$4 sm:$0xff]   ;;  %v1984_v37 = vld [vmem:[%s2754_s11 + $0x40] ss:$8 sps:$4 sm:$0xff]  }
 0x11a   :  { %v477_v56 = vmul.f32 %v471_v54, %v2461_v41  ;;  %v475_v57 = vpop.f32.mrb[7].mxu0  ;;  %1398 = vmatprep.subr.bf16.mxu1 %v1977_v48  ;;  %v1989_v54 = vld [vmem:[%s2754_s11 + $0x54] ss:$8 sps:$4 sm:$0xff]   ;;  %v1987_v20 = vld [vmem:[%s2754_s11 + $0x50] ss:$8 sps:$4 sm:$0xff]  }
 0x11b   :  { %v478_v39 = vmul.f32 %v473_v55, %v2464_v43  ;;  %v1992_v55 = vld [vmem:[%s2754_s11 + $0x64] ss:$8 sps:$4 sm:$0xff]   ;;  %v1990_v38 = vld [vmem:[%s2754_s11 + $0x60] ss:$8 sps:$4 sm:$0xff]   ;;  %v1993_v57 = vld [vmem:[%s2754_s11 + $0x70] ss:$8 sps:$4 sm:$0xff]  }
 0x11c   :  { %v479_v58 = vadd.f32 %v477_v56, %v2467_v45  ;;  %v1995_v56 = vld [vmem:[%s2754_s11 + $0x74] ss:$8 sps:$4 sm:$0xff]   ;;  %v1224_v48 = vld [vmem:[%s2756_s12] sm:$0x3] }
 0x11d   :  { %v480_v59 = vadd.f32 %v478_v39, %v2470_v17  ;;  %1399 = vmatpush1.bf16.msra.mxu1 %v1975_v49  ;;  %v1998_v39 = vld [vmem:[%s2754_s11 + $0x84] ss:$8 sps:$4 sm:$0xff]   ;;  %v2034_v18 = vld [vmem:[%s2755_s13 + $0x78] sm:$0xff]   ;;  %v1229_v49 = vrot.slane %v1224_v48, %v2445_v34 }
 0x11e   :  { %v481_v60 = vmax.f32 %v479_v58, 0.0  ;;  %1400 = vmatprep.subr.bf16.mxu1 %v1980_v1  ;;  %v1996_v58 = vld [vmem:[%s2754_s11 + $0x80] ss:$8 sps:$4 sm:$0xff]   ;;  %v1233_v1 = vrot.slane %v1224_v48, %v2450_v36 }
 0x11f   :  { %v482_v62 = vmax.f32 %v480_v59, 0.0  ;;  %v2001_v59 = vld [vmem:[%s2754_s11 + $0x94] ss:$8 sps:$4 sm:$0xff]  }
 0x120   :  { %v487_v3 = vpack.c.bf16 %v481_v60, %v481_v60  ;;  %v1999_v60 = vld [vmem:[%s2754_s11 + $0x90] ss:$8 sps:$4 sm:$0xff]  }
 0x121   :  { %v488_v63 = vpack.c.bf16 %v482_v62, %v482_v62  ;;  %1401 = vmatpush1.bf16.msra.mxu1 %v1978_v50  ;;  %v2002_v62 = vld [vmem:[%s2754_s11 + $0xa0] ss:$8 sps:$4 sm:$0xff]  }
 0x122   :  { %1402 = vmatprep.subr.bf16.mxu1 %v1983_v51 }
 0x123   :  { %1140 = vmatprep.mubr.bf16.mxu0 %v488_v63  ;;  %v2007_v63 = vld [vmem:[%s2754_s11 + $0xb4] ss:$8 sps:$4 sm:$0xff]  }
 0x124   :  { %1141 = vmatmul.mubr.bf16.vlgmr.msra.gmra.mrb[8].mxu0 %v487_v3  ;;  %v2008_v3 = vld [vmem:[%s2754_s11 + $0xc0] ss:$8 sps:$4 sm:$0xff]  }
 0x125   :  { %1150 = vmatpush1.bf16.msra.mxu0 %v1924_v0  ;;  %1181 = vmatprep.mubr.bf16.mxu0 %v490_v2  ;;  %v2005_v0 = vld [vmem:[%s2754_s11 + $0xb0] ss:$8 sps:$4 sm:$0xff]   ;;  %v2010_v2 = vld [vmem:[%s2754_s11 + $0xc4] ss:$8 sps:$4 sm:$0xff]  }
 0x126   :  { %1151 = vmatprep.subr.bf16.mxu0 %v1929_v4  ;;  %1403 = vmatpush1.bf16.msra.mxu1 %v1981_v52  ;;  %v2013_v4 = vld [vmem:[%s2754_s11 + $0xd4] ss:$8 sps:$4 sm:$0xff]  }
 0x127   :  { %1404 = vmatprep.subr.bf16.mxu1 %v1986_v53 }
 0x129   :  { %1152 = vmatpush1.bf16.msra.mxu0 %v1927_v5  ;;  %v2011_v5 = vld [vmem:[%s2754_s11 + $0xd0] ss:$8 sps:$4 sm:$0xff]  }
 0x12a   :  { %1153 = vmatprep.subr.bf16.mxu0 %v1932_v14  ;;  %1405 = vmatpush1.bf16.msra.mxu1 %v1984_v37  ;;  %v2016_v14 = vld [vmem:[%s2754_s11 + $0xe4] ss:$8 sps:$4 sm:$0xff]  }
 0x12b   :  { %1406 = vmatprep.subr.bf16.mxu1 %v1989_v54 }
 0x12d   :  { %1154 = vmatpush1.bf16.msra.mxu0 %v1930_v6  ;;  %v2014_v6 = vld [vmem:[%s2754_s11 + $0xe0] ss:$8 sps:$4 sm:$0xff]  }
 0x12e   :  { %1155 = vmatprep.subr.bf16.mxu0 %v1935_v7  ;;  %1407 = vmatpush1.bf16.msra.mxu1 %v1987_v20  ;;  %v2019_v7 = vld [vmem:[%s2754_s11 + $0xf4] ss:$8 sps:$4 sm:$0xff]  }
 0x12f   :  { %1408 = vmatprep.subr.bf16.mxu1 %v1992_v55 }
 0x131   :  { %1156 = vmatpush1.bf16.msra.mxu0 %v1933_v8  ;;  %v2017_v8 = vld [vmem:[%s2754_s11 + $0xf0] ss:$8 sps:$4 sm:$0xff]  }
 0x132   :  { %1157 = vmatprep.subr.bf16.mxu0 %v1938_v9  ;;  %1409 = vmatpush1.bf16.msra.mxu1 %v1990_v38  ;;  %v2020_v9 = vld [vmem:[%s2755_s13 + $0x40] sm:$0xff]  }
 0x133   :  { %1410 = vmatprep.subr.bf16.mxu1 %v1995_v56 }
 0x135   :  { %1158 = vmatpush1.bf16.msra.mxu0 %v1936_v10 }
 0x136   :  { %1159 = vmatprep.subr.bf16.mxu0 %v1941_v11  ;;  %1411 = vmatpush1.bf16.msra.mxu1 %v1993_v57 }
 0x137   :  { %1412 = vmatprep.subr.bf16.mxu1 %v1998_v39 }
 0x139   :  { %1160 = vmatpush1.bf16.msra.mxu0 %v1939_v12 }
 0x13a   :  { %1161 = vmatprep.subr.bf16.mxu0 %v1944_v21  ;;  %1413 = vmatpush1.bf16.msra.mxu1 %v1996_v58 }
 0x13b   :  { %1414 = vmatprep.subr.bf16.mxu1 %v2001_v59  ;;  %v1768_v59 = vld [vmem:[%s2757_s14] ss:$0 sm:$0xff] }
 0x13d   :  { %1162 = vmatpush1.bf16.msra.mxu0 %v1942_v22 }
 0x13e   :  { %1163 = vmatprep.subr.bf16.mxu0 %v1947_v27  ;;  %1415 = vmatpush1.bf16.msra.mxu1 %v1999_v60 }
 0x13f   :  { %1416 = vmatprep.subr.bf16.mxu1 %v2004_v61 }
 0x141   :  { %1164 = vmatpush1.bf16.msra.mxu0 %v1945_v28 }
 0x142   :  { %1165 = vmatprep.subr.bf16.mxu0 %v1950_v29  ;;  %1417 = vmatpush1.bf16.msra.mxu1 %v2002_v62 }
 0x143   :  { %1418 = vmatprep.subr.bf16.mxu1 %v2007_v63 }
 0x145   :  { %1166 = vmatpush1.bf16.msra.mxu0 %v1948_v30 }
 0x146   :  { %1167 = vmatprep.subr.bf16.mxu0 %v1953_v31  ;;  %1419 = vmatpush1.bf16.msra.mxu1 %v2005_v0 }
 0x147   :  { %1420 = vmatprep.subr.bf16.mxu1 %v2010_v2 }
 0x149   :  { %1168 = vmatpush1.bf16.msra.mxu0 %v1951_v32 }
 0x14a   :  { %1169 = vmatprep.subr.bf16.mxu0 %v1956_v33  ;;  %1421 = vmatpush1.bf16.msra.mxu1 %v2008_v3  ;;  %v2021_v33 = vld [vmem:[%s2755_s13] sm:$0xff]  }
 0x14b   :  { %1422 = vmatprep.subr.bf16.mxu1 %v2013_v4 }
 0x14d   :  { %1170 = vmatpush1.bf16.msra.mxu0 %v1954_v35 }
 0x14e   :  { %1171 = vmatprep.subr.bf16.mxu0 %v1959_v15  ;;  %1423 = vmatpush1.bf16.msra.mxu1 %v2011_v5  ;;  %v2022_v15 = vld [vmem:[%s2755_s13 + $0x48] sm:$0xff]  }
 0x14f   :  { %1424 = vmatprep.subr.bf16.mxu1 %v2016_v14 }
 0x151   :  { %1172 = vmatpush1.bf16.msra.mxu0 %v1957_v16  ;;  %v2023_v16 = vld [vmem:[%s2755_s13 + $0x8] sm:$0xff]  }
 0x152   :  { %1173 = vmatprep.subr.bf16.mxu0 %v1962_v13  ;;  %1425 = vmatpush1.bf16.msra.mxu1 %v2014_v6  ;;  %v2024_v13 = vld [vmem:[%s2755_s13 + $0x50] sm:$0xff]  }
 0x153   :  { %1426 = vmatprep.subr.bf16.mxu1 %v2019_v7 }
 0x155   :  { %1174 = vmatpush1.bf16.msra.mxu0 %v1960_v40  ;;  %v2025_v40 = vld [vmem:[%s2755_s13 + $0x10] sm:$0xff]  }
 0x156   :  { %1175 = vmatprep.subr.bf16.mxu0 %v1965_v42  ;;  %1427 = vmatpush1.bf16.msra.mxu1 %v2017_v8  ;;  %v2026_v42 = vld [vmem:[%s2755_s13 + $0x58] sm:$0xff]  }
 0x157   :  { %1785 = vmatprep.subr.bf16.mxu1 %v2020_v9 }
 0x159   :  { %1176 = vmatpush1.bf16.msra.mxu0 %v1963_v44  ;;  %v2027_v44 = vld [vmem:[%s2755_s13 + $0x18] sm:$0xff]  }
 0x15a   :  { %1177 = vmatprep.subr.bf16.mxu0 %v1968_v46  ;;  %v2028_v46 = vld [vmem:[%s2755_s13 + $0x60] sm:$0xff]  }
 0x15d   :  { %1178 = vmatpush1.bf16.msra.mxu0 %v1966_v47  ;;  %v2029_v47 = vld [vmem:[%s2755_s13 + $0x20] sm:$0xff]  }
 0x15e   :  { %1179 = vmatprep.subr.bf16.mxu0 %v1971_v23  ;;  %v2030_v23 = vld [vmem:[%s2755_s13 + $0x68] sm:$0xff]  }
 0x161   :  { %1180 = vmatpush1.bf16.msra.mxu0 %v1969_v24  ;;  %v2031_v24 = vld [vmem:[%s2755_s13 + $0x28] sm:$0xff]  }
 0x164   :  { %1182 = vmatmul.mubr.bf16.vlgmr.msra.gmra.mrb[8].mxu0 %v489_v26  ;;  %v2033_v26 = vld [vmem:[%s2755_s13 + $0x30] sm:$0xff]  }
 0x1eb   :  { %v1101_v10 = vpop.f32.mrb[0].mxu1 }
 0x1ec   :  { %v1103_v11 = vpop.f32.mrb[1].mxu1 }
 0x1ed   :  { %v1105_v12 = vpop.f32.mrb[2].mxu1 }
 0x1ee   :  { %v1106_v21 = vpop.f32.mrb[3].mxu1 }
 0x237   :  { %v1183_v22 = vpop.f32.mrb[8].mxu0 }
 0x238   :  { %v1807_v27 = vadd.f32 %v1183_v22, %v1101_v10  ;;  %v1185_v28 = vpop.f32.mrb[9].mxu0 }
 0x239   :  { %v1808_v29 = vadd.f32 %v1185_v28, %v1103_v11  ;;  %v1187_v30 = vpop.f32.mrb[10].mxu0 }
 0x23a   :  { %v1188_v31 = vpop.f32.mrb[11].mxu0  ;;  %v1190_v35 = vpack.c.bf16 %v1807_v27, %v1807_v27 }
 0x23b   :  { %v1191_v32 = vpack.c.bf16 %v1808_v29, %v1808_v29 }
 0x23d   :  { %1428 = vmatprep.mubr.bf16.mxu1 %v1191_v32 }
 0x23e   :  { %1429 = vmatmul.mubr.bf16.vlgmr.msra.gmra.mrb[4].mxu1 %v1190_v35 }
 0x23f   :  { %1786 = vmatpush3.bf16.msra.mxu1 %v2021_v33 }
 0x240   :  { %1787 = vmatprep.subr.bf16.mxu1 %v2022_v15 }
 0x243   :  { %1788 = vmatpush3.bf16.msra.mxu1 %v2023_v16 }
 0x244   :  { %1789 = vmatprep.subr.bf16.mxu1 %v2024_v13 }
 0x247   :  { %1790 = vmatpush3.bf16.msra.mxu1 %v2025_v40 }
 0x248   :  { %1791 = vmatprep.subr.bf16.mxu1 %v2026_v42 }
 0x24b   :  { %1792 = vmatpush3.bf16.msra.mxu1 %v2027_v44 }
 0x24c   :  { %1793 = vmatprep.subr.bf16.mxu1 %v2028_v46 }
 0x24f   :  { %1794 = vmatpush3.bf16.msra.mxu1 %v2029_v47 }
 0x250   :  { %1795 = vmatprep.subr.bf16.mxu1 %v2030_v23 }
 0x253   :  { %1796 = vmatpush3.bf16.msra.mxu1 %v2031_v24 }
 0x254   :  { %1797 = vmatprep.subr.bf16.mxu1 %v2032_v25 }
 0x257   :  { %1798 = vmatpush3.bf16.msra.mxu1 %v2033_v26 }
 0x258   :  { %1799 = vmatprep.subr.bf16.mxu1 %v2034_v18 }
 0x25b   :  { %1800 = vmatpush3.bf16.msra.mxu1 %v2035_v19 }
 0x311   :  { %v1430_v50 = vpop.f32.mrb[4].mxu1 }
 0x312   :  { %v1431_v51 = vadd.f32 %v1430_v50, %v1229_v49  ;;  %v1432_v52 = vpop.f32.mrb[5].mxu1 }
 0x313   :  { %v1433_v53 = vadd.f32 %v1432_v52, %v1233_v1  ;;  %v1434_v37 = vpop.f32.mrb[6].mxu1 }
 0x314   :  { %v1437_v54 = vmul.f32 %v1431_v51, %v2461_v41  ;;  %v1435_v20 = vpop.f32.mrb[7].mxu1 }
 0x315   :  { %v1438_v55 = vmul.f32 %v1433_v53, %v2464_v43 }
 0x316   :  { %v1439_v38 = vadd.f32 %v1437_v54, %v2467_v45 }
 0x317   :  { %v1440_v56 = vadd.f32 %v1438_v55, %v2470_v17 }
 0x318   :  { %v1441_v57 = vmax.f32 %v1439_v38, 0.0 }
 0x319   :  { %v1442_v39 = vmax.f32 %v1440_v56, 0.0 }
 0x31a   :  { %v1443_v34 = vpack.c.bf16 %v1441_v57, %v1441_v57 }
 0x31b   :  { %v1444_v58 = vpack.c.bf16 %v1442_v39, %v1442_v39 }
 0x31d   :  { %1612 = vmatprep.mubr.bf16.mxu1 %v1444_v58 }
 0x31e   :  { %1613 = vmatmul.mubr.bf16.vlgmr.msra.gmra.mrb[8].mxu1 %v1443_v34 }
 0x3f1   :  { %v1801_v36 = vpop.f32.mrb[8].mxu1 }
 0x3f2   :  { %v1802_v60 = vpop.f32.mrb[9].mxu1 }
 0x3f3   :  { %v1803_v41 = vadd.f32 %v1802_v60, %v1801_v36  ;;  %v1804_v61 = vpop.f32.mrb[10].mxu1 }
 0x3f4   :  { %v1805_v62 = vpop.f32.mrb[11].mxu1 }
 0x3f5   :  { %v1615_v43 = vadd.f32 %v1803_v41, %v1768_v59 }
 0x3f7   :  { %1620 = vst [vmem:[%s2758_s15] sm:$0xff] %v1615_v43 }

// kernel: wdr_forward.4
= control target key start
LH: loop header
LB: loop body
LE: loop exit
PB: predicated region body
PF: predicated region fallthrough
CT: control target
= control target key end

     0   :  { %13 = vsyncpa [#allocation6], 0  ;;  %s3432_s24 = smov [#allocation5]   ;;  %s3941_s0 = inlined_call_operand.vmem [shape: f32[8,8,768], index: 0, kind: input, shape index: {}]   ;;  %s3942_s1 = inlined_call_operand.vmem [shape: s32[8,1], index: 1, kind: input, shape index: {}]   ;;  %s3943_s2 = inlined_call_operand.<no memory space> [shape: s32[1], index: 2, kind: input, shape index: {}]   ;;  %s3944_s3 = inlined_call_operand.vmem [shape: bf16[256,768], index: 3, kind: input, shape index: {}]   ;;  %s3945_s4 = inlined_call_operand.vmem [shape: f32[1,768], index: 4, kind: input, shape index: {}]   ;;  %s3946_s5 = inlined_call_operand.hbm [shape: bf16[512,1024], index: 5, kind: input, shape index: {}]   ;;  %s3947_s6 = inlined_call_operand.vmem [shape: f32[1,1024], index: 6, kind: input, shape index: {}]   ;;  %s3948_s7 = inlined_call_operand.vmem [shape: f32[8,256], index: 7, kind: output, shape index: {}]  }
   0x1   :  { %s29_s25 = sshll.u32 %s3432_s24, 4  ;;  %s3400_s28 = scalar_lea.hbm %s3946_s5, 32768  ;;  %s30_s25 = int_to_ptr.vmem [resolvable:$true] %s29_s25 }
   0x2   :  { %p3401_p0 = scmp.ne.s32.totalorder %s3946_s5, %s3400_s28  ;;  %p3404_p1 = scmp.lt.u32.totalorder %s3400_s28, %s3946_s5 }
   0x4   :  { %p3406_p2 = pnand %p3404_p1, %p3401_p0 }
   0x6   :  { %3409 = shalt.err (!%p3406_p2)
}
   0x7   :  { %s3410_s10 = scalar_lea.vmem %s30_s25, 32768  ;;  %p3415_p4 = scmp.lt.s32.totalorder %s30_s25, %s30_s25 }
   0x8   :  { %p3411_p3 = scmp.ne.s32.totalorder %s30_s25, %s3410_s10  ;;  %p3416_p5 = scmp.lt.s32.totalorder %s3410_s10, %s3410_s10 }
   0xa   :  { %p3417_p6 = por %p3416_p5, %p3415_p4 }
   0xc   :  { %p3418_p7 = pnand %p3417_p6, %p3411_p3 }
   0xe   :  { %3421 = shalt.err (!%p3418_p7)
}
   0xf   :  { %s3433_s11 = smov 512   ;;  %s3434_s12 = smov 32  }
  0x10   :  { %35 = dma.hbm_to_vmem [thread:$0]  %s3946_s5, 32768, %s30_s25, [#allocation6], %s3433_s11, %s3433_s11, %s3434_s12  }
  0x11   :  { %3426 = dma.done.wait [#allocation6], 32768  }
  0x12   :  { %3427 = vsyncadd [#allocation6], 4294934528  ;;  %v3435_v0 = vmov 0.0   ;;  %v3492_v1 = vld [vmem:[%s3942_s1] sm:$0xff]  ;;  %p2820_p8 = scmp.le.s32.totalorder %s3943_s2, 0 }
  0x13   :  { %41 = vst [vmem:[#allocation2] sm:$0xff] %v3435_v0  ;;  %42 = vst [vmem:[#allocation2 + $0x8] sm:$0xff] %v3435_v0  ;;  %s3497_s19 = smov (!%p2820_p8), 0  }
  0x14   :  { %43 = vst [vmem:[#allocation3] sm:$0xff] %v3435_v0  ;;  %44 = vst [vmem:[#allocation3 + $0x8] sm:$0xff] %v3435_v0  ;;  %2817 = sbr.rel (%p2820_p8) target bundleno = 886 (0x376), region = 54 }
  0x1b LB: > { %v3215_v2 = vld [vmem:[%s3944_s3 + $0x4] ss:$24 sps:$4 sm:$0xff]   ;;  %v3217_v3 = vld [vmem:[%s3944_s3] ss:$24 sps:$4 sm:$0xff]   ;;  %v3218_v4 = vld [vmem:[%s3944_s3 + $0x34] ss:$24 sps:$4 sm:$0xff]   ;;  %v57_v8 = vstv %s3430_s19  ;;  %s3430_s19 = sphi %s3497_s19, %s50_s19  }
  0x1c   : > { %678 = vmatprep.subr.bf16.mxu0 %v3215_v2  ;;  %v3220_v5 = vld [vmem:[%s3944_s3 + $0x30] ss:$24 sps:$4 sm:$0xff]   ;;  %v3436_v6 = vmov 0   ;;  %v3221_v7 = vld [vmem:[%s3944_s3 + $0x64] ss:$24 sps:$4 sm:$0xff]   ;;  %vm58_vm0 = vcmp.gt.s32.totalorder %v3492_v1, %v57_v8  ;;  %s3182_s5 = smul.u32 48, %s3430_s19 }
  0x1d   : > { %679 = vmatpush1.bf16.msra.mxu0 %v3217_v3  ;;  %3214 = vset.pattern.permute.xlu0 %v3436_v6  ;;  %v843_v9 = vsel %vm58_vm0, 1, %v3436_v6  ;;  %v3223_v10 = vld [vmem:[%s3944_s3 + $0x60] ss:$24 sps:$4 sm:$0xff]   ;;  %v3224_v11 = vld [vmem:[%s3944_s3 + $0x94] ss:$24 sps:$4 sm:$0xff]   ;;  %s50_s19 = sadd.s32 1, %s3430_s19  }
  0x1e   : > { %680 = vmatprep.subr.bf16.mxu0 %v3218_v4  ;;  %845 = vperm.xlu0 %3214, %v843_v9   ;;  %v3226_v12 = vld [vmem:[%s3944_s3 + $0x90] ss:$24 sps:$4 sm:$0xff]   ;;  %v3227_v13 = vld [vmem:[%s3944_s3 + $0xc4] ss:$24 sps:$4 sm:$0xff]   ;;  %v3229_v14 = vld [vmem:[%s3944_s3 + $0xc0] ss:$24 sps:$4 sm:$0xff]   ;;  %s3837_s23 = scalar_lea.vmem %s3941_s0, %s3182_s5  ;;  %p49_p9 = scmp.ge.s32.totalorder %s50_s19, %s3943_s2 }
  0x1f   : > { %v3230_v15 = vld [vmem:[%s3944_s3 + $0xf4] ss:$24 sps:$4 sm:$0xff]   ;;  %v3253_v17 = vld [vmem:[%s3944_s3 + $0x8] ss:$24 sps:$4 sm:$0xff]   ;;  %v3259_v20 = vld [vmem:[%s3944_s3 + $0x38] ss:$24 sps:$4 sm:$0xff]  }
  0x20   : > { %v3251_v16 = vld [vmem:[%s3944_s3 + $0xc] ss:$24 sps:$4 sm:$0xff]   ;;  %v3232_v18 = vld [vmem:[%s3944_s3 + $0xf0] ss:$24 sps:$4 sm:$0xff]   ;;  %v3257_v19 = vld [vmem:[%s3944_s3 + $0x3c] ss:$24 sps:$4 sm:$0xff]  }
  0x21   : > { %681 = vmatpush1.bf16.msra.mxu0 %v3220_v5  ;;  %719 = vmatprep.subr.bf16.mxu1 %v3251_v16  ;;  %v3233_v21 = vld [vmem:[%s3944_s3 + $0x124] ss:$24 sps:$4 sm:$0xff]   ;;  %v3235_v22 = vld [vmem:[%s3944_s3 + $0x120] ss:$24 sps:$4 sm:$0xff]   ;;  %v3236_v24 = vld [vmem:[%s3944_s3 + $0x154] ss:$24 sps:$4 sm:$0xff]  }
  0x22   : > { %682 = vmatprep.subr.bf16.mxu0 %v3221_v7  ;;  %720 = vmatpush1.bf16.msra.mxu1 %v3253_v17  ;;  %v3263_v23 = vld [vmem:[%s3944_s3 + $0x6c] ss:$24 sps:$4 sm:$0xff]   ;;  %v3265_v25 = vld [vmem:[%s3944_s3 + $0x68] ss:$24 sps:$4 sm:$0xff]   ;;  %v3269_v26 = vld [vmem:[%s3944_s3 + $0x9c] ss:$24 sps:$4 sm:$0xff]  }
  0x23   : > { %721 = vmatprep.subr.bf16.mxu1 %v3257_v19  ;;  %v3238_v27 = vld [vmem:[%s3944_s3 + $0x150] ss:$24 sps:$4 sm:$0xff]   ;;  %v3239_v30 = vld [vmem:[%s3944_s3 + $0x184] ss:$24 sps:$4 sm:$0xff]   ;;  %v3241_v33 = vld [vmem:[%s3944_s3 + $0x180] ss:$24 sps:$4 sm:$0xff]  }
  0x24   : > { %v3271_v28 = vld [vmem:[%s3944_s3 + $0x98] ss:$24 sps:$4 sm:$0xff]   ;;  %v3576_v29 = vld [vmem:[#allocation2 + $0x8] sm:$0xff]  ;;  %v3281_v36 = vld [vmem:[%s3944_s3 + $0xfc] ss:$24 sps:$4 sm:$0xff]  }
  0x25   : > { %683 = vmatpush1.bf16.msra.mxu0 %v3223_v10  ;;  %v3275_v31 = vld [vmem:[%s3944_s3 + $0xcc] ss:$24 sps:$4 sm:$0xff]   ;;  %v3586_v32 = vpack.c.bf16 %v3576_v29, %v3576_v29  ;;  %v3277_v34 = vld [vmem:[%s3944_s3 + $0xc8] ss:$24 sps:$4 sm:$0xff]   ;;  %v3283_v38 = vld [vmem:[%s3944_s3 + $0xf8] ss:$24 sps:$4 sm:$0xff]  }
  0x26   : > { %684 = vmatprep.subr.bf16.mxu0 %v3224_v11  ;;  %722 = vmatpush1.bf16.msra.mxu1 %v3259_v20  ;;  %v3242_v35 = vld [vmem:[%s3944_s3 + $0x1b4] ss:$24 sps:$4 sm:$0xff]   ;;  %v3244_v37 = vld [vmem:[%s3944_s3 + $0x1b0] ss:$24 sps:$4 sm:$0xff]   ;;  %v3245_v39 = vld [vmem:[%s3944_s3 + $0x1e4] ss:$24 sps:$4 sm:$0xff]  }
  0x27   : > { %723 = vmatprep.subr.bf16.mxu1 %v3263_v23  ;;  %710 = vmatprep.mubr.bf16.mxu0 %v3586_v32  ;;  %v3287_v40 = vld [vmem:[%s3944_s3 + $0x12c] ss:$24 sps:$4 sm:$0xff]   ;;  %v3247_v41 = vld [vmem:[%s3944_s3 + $0x1e0] ss:$24 sps:$4 sm:$0xff]   ;;  %v3293_v44 = vld [vmem:[%s3944_s3 + $0x15c] ss:$24 sps:$4 sm:$0xff]  }
  0x28   : > { %751 = vmatprep.mubr.bf16.mxu1 %v3586_v32  ;;  %v3289_v42 = vld [vmem:[%s3944_s3 + $0x128] ss:$24 sps:$4 sm:$0xff]   ;;  %v3248_v43 = vld [vmem:[%s3944_s3 + $0x214] ss:$24 sps:$4 sm:$0xff]   ;;  %v3295_v46 = vld [vmem:[%s3944_s3 + $0x158] ss:$24 sps:$4 sm:$0xff]  }
  0x29   : > { %685 = vmatpush1.bf16.msra.mxu0 %v3226_v12  ;;  %v3250_v45 = vld [vmem:[%s3944_s3 + $0x210] ss:$24 sps:$4 sm:$0xff]   ;;  %v3254_v47 = vld [vmem:[%s3944_s3 + $0x244] ss:$24 sps:$4 sm:$0xff]   ;;  %v3256_v49 = vld [vmem:[%s3944_s3 + $0x240] ss:$24 sps:$4 sm:$0xff]  }
  0x2a   : > { %686 = vmatprep.subr.bf16.mxu0 %v3227_v13  ;;  %724 = vmatpush1.bf16.msra.mxu1 %v3265_v25  ;;  %v3299_v48 = vld [vmem:[%s3944_s3 + $0x18c] ss:$24 sps:$4 sm:$0xff]   ;;  %v3301_v50 = vld [vmem:[%s3944_s3 + $0x188] ss:$24 sps:$4 sm:$0xff]   ;;  %v3305_v52 = vld [vmem:[%s3944_s3 + $0x1bc] ss:$24 sps:$4 sm:$0xff]  }
  0x2b   : > { %725 = vmatprep.subr.bf16.mxu1 %v3269_v26  ;;  %v3260_v51 = vld [vmem:[%s3944_s3 + $0x274] ss:$24 sps:$4 sm:$0xff]   ;;  %v3262_v53 = vld [vmem:[%s3944_s3 + $0x270] ss:$24 sps:$4 sm:$0xff]   ;;  %v3266_v55 = vld [vmem:[%s3944_s3 + $0x2a4] ss:$24 sps:$4 sm:$0xff]  }
  0x2c   : > { %v3307_v54 = vld [vmem:[%s3944_s3 + $0x1b8] ss:$24 sps:$4 sm:$0xff]   ;;  %v3311_v56 = vld [vmem:[%s3944_s3 + $0x1ec] ss:$24 sps:$4 sm:$0xff]   ;;  %v3313_v58 = vld [vmem:[%s3944_s3 + $0x1e8] ss:$24 sps:$4 sm:$0xff]  }
  0x2d   : > { %687 = vmatpush1.bf16.msra.mxu0 %v3229_v14  ;;  %v3268_v57 = vld [vmem:[%s3944_s3 + $0x2a0] ss:$24 sps:$4 sm:$0xff]   ;;  %v3272_v59 = vld [vmem:[%s3944_s3 + $0x2d4] ss:$24 sps:$4 sm:$0xff]   ;;  %v3274_v61 = vld [vmem:[%s3944_s3 + $0x2d0] ss:$24 sps:$4 sm:$0xff]  }
  0x2e   : > { %688 = vmatprep.subr.bf16.mxu0 %v3230_v15  ;;  %726 = vmatpush1.bf16.msra.mxu1 %v3271_v28  ;;  %v3317_v60 = vld [vmem:[%s3944_s3 + $0x21c] ss:$24 sps:$4 sm:$0xff]   ;;  %v3677_v62 = vld [vmem:[#allocation2] sm:$0xff]  ;;  %v3319_v63 = vld [vmem:[%s3944_s3 + $0x218] ss:$24 sps:$4 sm:$0xff]  }
  0x2f   : > { %727 = vmatprep.subr.bf16.mxu1 %v3275_v31  ;;  %v3280_v0 = vld [vmem:[%s3944_s3 + $0x14] ss:$24 sps:$4 sm:$0xff]   ;;  %v3690_v3 = vpack.c.bf16 %v3677_v62, %v3677_v62  ;;  %v3278_v4 = vld [vmem:[%s3944_s3 + $0x10] ss:$24 sps:$4 sm:$0xff]   ;;  %v3286_v6 = vld [vmem:[%s3944_s3 + $0x44] ss:$24 sps:$4 sm:$0xff]  }
  0x30   : > { %v3323_v2 = vld [vmem:[%s3944_s3 + $0x24c] ss:$24 sps:$4 sm:$0xff]   ;;  %v3325_v5 = vld [vmem:[%s3944_s3 + $0x248] ss:$24 sps:$4 sm:$0xff]   ;;  %v3329_v7 = vld [vmem:[%s3944_s3 + $0x27c] ss:$24 sps:$4 sm:$0xff]  }
  0x31   : > { %689 = vmatpush1.bf16.msra.mxu0 %v3232_v18  ;;  %v3284_v8 = vld [vmem:[%s3944_s3 + $0x40] ss:$24 sps:$4 sm:$0xff]   ;;  %v3292_v10 = vld [vmem:[%s3944_s3 + $0x74] ss:$24 sps:$4 sm:$0xff]   ;;  %v3290_v12 = vld [vmem:[%s3944_s3 + $0x70] ss:$24 sps:$4 sm:$0xff]  }
  0x32   : > { %690 = vmatprep.subr.bf16.mxu0 %v3233_v21  ;;  %728 = vmatpush1.bf16.msra.mxu1 %v3277_v34  ;;  %v3331_v9 = vld [vmem:[%s3944_s3 + $0x278] ss:$24 sps:$4 sm:$0xff]   ;;  %v3335_v11 = vld [vmem:[%s3944_s3 + $0x2ac] ss:$24 sps:$4 sm:$0xff]   ;;  %v3337_v13 = vld [vmem:[%s3944_s3 + $0x2a8] ss:$24 sps:$4 sm:$0xff]  }
  0x33   : > { %729 = vmatprep.subr.bf16.mxu1 %v3281_v36  ;;  %v3298_v14 = vld [vmem:[%s3944_s3 + $0xa4] ss:$24 sps:$4 sm:$0xff]   ;;  %v3296_v16 = vld [vmem:[%s3944_s3 + $0xa0] ss:$24 sps:$4 sm:$0xff]   ;;  %v3304_v18 = vld [vmem:[%s3944_s3 + $0xd4] ss:$24 sps:$4 sm:$0xff]  }
  0x34   : > { %v3341_v15 = vld [vmem:[%s3944_s3 + $0x2dc] ss:$24 sps:$4 sm:$0xff]   ;;  %v3343_v17 = vld [vmem:[%s3944_s3 + $0x2d8] ss:$24 sps:$4 sm:$0xff]  }
  0x35   : > { %691 = vmatpush1.bf16.msra.mxu0 %v3235_v22  ;;  %v3302_v19 = vld [vmem:[%s3944_s3 + $0xd0] ss:$24 sps:$4 sm:$0xff]   ;;  %v3310_v20 = vld [vmem:[%s3944_s3 + $0x104] ss:$24 sps:$4 sm:$0xff]   ;;  %v3308_v21 = vld [vmem:[%s3944_s3 + $0x100] ss:$24 sps:$4 sm:$0xff]  }
  0x36   : > { %692 = vmatprep.subr.bf16.mxu0 %v3236_v24  ;;  %730 = vmatpush1.bf16.msra.mxu1 %v3283_v38  ;;  %v3316_v22 = vld [vmem:[%s3944_s3 + $0x134] ss:$24 sps:$4 sm:$0xff]   ;;  %v3314_v23 = vld [vmem:[%s3944_s3 + $0x130] ss:$24 sps:$4 sm:$0xff]   ;;  %v3322_v24 = vld [vmem:[%s3944_s3 + $0x164] ss:$24 sps:$4 sm:$0xff]  }
  0x37   : > { %731 = vmatprep.subr.bf16.mxu1 %v3287_v40  ;;  %v3320_v25 = vld [vmem:[%s3944_s3 + $0x160] ss:$24 sps:$4 sm:$0xff]   ;;  %v3328_v26 = vld [vmem:[%s3944_s3 + $0x194] ss:$24 sps:$4 sm:$0xff]   ;;  %v3334_v28 = vld [vmem:[%s3944_s3 + $0x1c4] ss:$24 sps:$4 sm:$0xff]  }
  0x38   : > { %v3340_v31 = vld [vmem:[%s3944_s3 + $0x1f4] ss:$24 sps:$4 sm:$0xff]   ;;  %v3344_v34 = vld [vmem:[%s3944_s3 + $0x220] ss:$24 sps:$4 sm:$0xff]   ;;  %v3347_v36 = vld [vmem:[%s3944_s3 + $0x250] ss:$24 sps:$4 sm:$0xff]  }
  0x39   : > { %693 = vmatpush1.bf16.msra.mxu0 %v3238_v27  ;;  %v3326_v27 = vld [vmem:[%s3944_s3 + $0x190] ss:$24 sps:$4 sm:$0xff]   ;;  %v3350_v38 = vld [vmem:[%s3944_s3 + $0x280] ss:$24 sps:$4 sm:$0xff]  }
  0x3a   : > { %694 = vmatprep.subr.bf16.mxu0 %v3239_v30  ;;  %732 = vmatpush1.bf16.msra.mxu1 %v3289_v42  ;;  %v3332_v30 = vld [vmem:[%s3944_s3 + $0x1c0] ss:$24 sps:$4 sm:$0xff]   ;;  %v3353_v40 = vld [vmem:[%s3944_s3 + $0x2b0] ss:$24 sps:$4 sm:$0xff]  }
  0x3b   : > { %733 = vmatprep.subr.bf16.mxu1 %v3293_v44  ;;  %v3356_v42 = vld [vmem:[%s3944_s3 + $0x2e0] ss:$24 sps:$4 sm:$0xff]  }
  0x3c   : > { %v858_v44 = vld [vmem:[#allocation5 + $0x20] sm:$0xff] }
  0x3d   : > { %695 = vmatpush1.bf16.msra.mxu0 %v3241_v33  ;;  %v3346_v33 = vld [vmem:[%s3944_s3 + $0x224] ss:$24 sps:$4 sm:$0xff]  }
  0x3e   : > { %696 = vmatprep.subr.bf16.mxu0 %v3242_v35  ;;  %734 = vmatpush1.bf16.msra.mxu1 %v3295_v46  ;;  %v3349_v35 = vld [vmem:[%s3944_s3 + $0x254] ss:$24 sps:$4 sm:$0xff]  }
  0x3f   : > { %735 = vmatprep.subr.bf16.mxu1 %v3299_v48  ;;  %v859_v48 = vld [vmem:[#allocation5 + $0x28] sm:$0xff] }
  0x41   : > { %697 = vmatpush1.bf16.msra.mxu0 %v3244_v37  ;;  %v3352_v37 = vld [vmem:[%s3944_s3 + $0x284] ss:$24 sps:$4 sm:$0xff]  }
  0x42   : > { %698 = vmatprep.subr.bf16.mxu0 %v3245_v39  ;;  %736 = vmatpush1.bf16.msra.mxu1 %v3301_v50  ;;  %v3355_v39 = vld [vmem:[%s3944_s3 + $0x2b4] ss:$24 sps:$4 sm:$0xff]   ;;  %v866_v50 = vld [vmem:[#allocation5 + $0x60] sm:$0xff] }
  0x43   : > { %737 = vmatprep.subr.bf16.mxu1 %v3305_v52 }
  0x45   : > { %699 = vmatpush1.bf16.msra.mxu0 %v3247_v41  ;;  %v3358_v41 = vld [vmem:[%s3944_s3 + $0x2e4] ss:$24 sps:$4 sm:$0xff]  }
  0x46   : > { %700 = vmatprep.subr.bf16.mxu0 %v3248_v43  ;;  %738 = vmatpush1.bf16.msra.mxu1 %v3307_v54  ;;  %v854_v43 = vld [vmem:[#allocation5] sm:$0xff]  ;;  %v863_v54 = vld [vmem:[#allocation5 + $0x48] sm:$0xff] }
  0x47   : > { %739 = vmatprep.subr.bf16.mxu1 %v3311_v56  ;;  %v2922_v46 = vcombine.low %v854_v43, %v858_v44  ;;  %v870_v56 = vld [vmem:[#allocation5 + $0x80] sm:$0xff] }
  0x49   : > { %701 = vmatpush1.bf16.msra.mxu0 %v3250_v45  ;;  %v855_v45 = vld [vmem:[#allocation5 + $0x8] sm:$0xff] }
  0x4a   : > { %702 = vmatprep.subr.bf16.mxu0 %v3254_v47  ;;  %740 = vmatpush1.bf16.msra.mxu1 %v3313_v58  ;;  %v2923_v47 = vcombine.high %v854_v43, %v858_v44  ;;  %v2925_v52 = vcombine.high %v855_v45, %v859_v48  ;;  %v874_v58 = vld [vmem:[#allocation5 + $0xa0] sm:$0xff] }
  0x4b   : > { %741 = vmatprep.subr.bf16.mxu1 %v3317_v60  ;;  %v875_v60 = vld [vmem:[#allocation5 + $0xa8] sm:$0xff]  ;;  %v918_v44 = vld [vmem:[#allocation5 + $0x200] sm:$0xff] }
  0x4d   : > { %703 = vmatpush1.bf16.msra.mxu0 %v3256_v49  ;;  %v862_v49 = vld [vmem:[#allocation5 + $0x40] sm:$0xff] }
  0x4e   : > { %704 = vmatprep.subr.bf16.mxu0 %v3260_v51  ;;  %742 = vmatpush1.bf16.msra.mxu1 %v3319_v63  ;;  %v2924_v51 = vcombine.low %v855_v45, %v859_v48  ;;  %v922_v45 = vld [vmem:[#allocation5 + $0x220] sm:$0xff] }
  0x4f   : > { %743 = vmatprep.subr.bf16.mxu1 %v3323_v2 }
  0x51   : > { %705 = vmatpush1.bf16.msra.mxu0 %v3262_v53  ;;  %v2931_v53 = vcombine.high %v862_v49, %v866_v50 }
  0x52   : > { %706 = vmatprep.subr.bf16.mxu0 %v3266_v55  ;;  %744 = vmatpush1.bf16.msra.mxu1 %v3325_v5  ;;  %v867_v55 = vld [vmem:[#allocation5 + $0x68] sm:$0xff] }
  0x53   : > { %745 = vmatprep.subr.bf16.mxu1 %v3329_v7  ;;  %v2932_v63 = vcombine.low %v863_v54, %v867_v55  ;;  %v879_v5 = vld [vmem:[#allocation5 + $0xc8] sm:$0xff]  ;;  %v2938_v7 = vcombine.low %v870_v56, %v874_v58 }
  0x55   : > { %707 = vmatpush1.bf16.msra.mxu0 %v3268_v57  ;;  %v2933_v57 = vcombine.high %v863_v54, %v867_v55  ;;  %v927_v54 = vld [vmem:[#allocation5 + $0x248] sm:$0xff] }
  0x56   : > { %708 = vmatprep.subr.bf16.mxu0 %v3272_v59  ;;  %746 = vmatpush1.bf16.msra.mxu1 %v3331_v9  ;;  %v871_v59 = vld [vmem:[#allocation5 + $0x88] sm:$0xff] }
  0x57   : > { %747 = vmatprep.subr.bf16.mxu1 %v3335_v11  ;;  %v2941_v2 = vcombine.high %v871_v59, %v875_v60  ;;  %v886_v11 = vld [vmem:[#allocation5 + $0x100] sm:$0xff]  ;;  %v931_v55 = vld [vmem:[#allocation5 + $0x268] sm:$0xff] }
  0x59   : > { %709 = vmatpush1.bf16.msra.mxu0 %v3274_v61  ;;  %v2930_v61 = vcombine.low %v862_v49, %v866_v50  ;;  %v2987_v50 = vcombine.high %v918_v44, %v922_v45 }
  0x5a   : > { %760 = vmatprep.subr.bf16.mxu0 %v3280_v0  ;;  %748 = vmatpush1.bf16.msra.mxu1 %v3337_v13  ;;  %v2939_v0 = vcombine.high %v870_v56, %v874_v58  ;;  %v887_v13 = vld [vmem:[#allocation5 + $0x108] sm:$0xff]  ;;  %v2986_v56 = vcombine.low %v918_v44, %v922_v45 }
  0x5b   : > { %749 = vmatprep.subr.bf16.mxu1 %v3341_v15  ;;  %v979_v45 = vld [vmem:[#allocation5 + $0x3e8] sm:$0xff] }
  0x5c   : > { %711 = vmatmul.mubr.bf16.vlgmr.msra.gmra.mrb[0].mxu0 %v3690_v3 }
  0x5d   : > { %761 = vmatpush1.bf16.msra.mxu0 %v3278_v4  ;;  %792 = vmatprep.mubr.bf16.mxu0 %v3586_v32  ;;  %v3338_v32 = vld [vmem:[%s3944_s3 + $0x1f0] ss:$24 sps:$4 sm:$0xff]   ;;  %v882_v4 = vld [vmem:[#allocation5 + $0xe0] sm:$0xff] }
  0x5e   : > { %762 = vmatprep.subr.bf16.mxu0 %v3286_v6  ;;  %750 = vmatpush1.bf16.msra.mxu1 %v3343_v17  ;;  %v883_v6 = vld [vmem:[#allocation5 + $0xe8] sm:$0xff] }
  0x5f   : > { %2432 = vmatprep.subr.bf16.mxu1 %v2923_v47  ;;  %v923_v47 = vld [vmem:[#allocation5 + $0x228] sm:$0xff] }
  0x61   : > { %763 = vmatpush1.bf16.msra.mxu0 %v3284_v8  ;;  %752 = vmatmul.mubr.bf16.vlgmr.msra.gmra.mrb[0].mxu1 %v3690_v3  ;;  %v2940_v8 = vcombine.low %v871_v59, %v875_v60  ;;  %v2997_v59 = vcombine.high %v927_v54, %v931_v55 }
  0x62   : > { %764 = vmatprep.subr.bf16.mxu0 %v3292_v10  ;;  %2433 = vmatpush1.bf16.msra.mxu1 %v2922_v46  ;;  %v2949_v10 = vcombine.high %v879_v5, %v883_v6  ;;  %v919_v46 = vld [vmem:[#allocation5 + $0x208] sm:$0xff] }
  0x63   : > { %2434 = vmatprep.subr.bf16.mxu1 %v2931_v53  ;;  %v930_v53 = vld [vmem:[#allocation5 + $0x260] sm:$0xff] }
  0x65   : > { %765 = vmatpush1.bf16.msra.mxu0 %v3290_v12  ;;  %v890_v12 = vld [vmem:[#allocation5 + $0x120] sm:$0xff] }
  0x66   : > { %766 = vmatprep.subr.bf16.mxu0 %v3298_v14  ;;  %2435 = vmatpush1.bf16.msra.mxu1 %v2930_v61  ;;  %v891_v14 = vld [vmem:[#allocation5 + $0x128] sm:$0xff]  ;;  %v2955_v17 = vcombine.high %v886_v11, %v890_v12  ;;  %v2996_v61 = vcombine.low %v927_v54, %v931_v55 }
  0x67   : > { %2436 = vmatprep.subr.bf16.mxu1 %v2939_v0  ;;  %v938_v0 = vld [vmem:[#allocation5 + $0x2a0] sm:$0xff] }
  0x69   : > { %767 = vmatpush1.bf16.msra.mxu0 %v3296_v16  ;;  %v2948_v16 = vcombine.low %v879_v5, %v883_v6 }
  0x6a   : > { %768 = vmatprep.subr.bf16.mxu0 %v3304_v18  ;;  %2437 = vmatpush1.bf16.msra.mxu1 %v2938_v7  ;;  %v2957_v18 = vcombine.high %v887_v13, %v891_v14 }
  0x6d   : > { %769 = vmatpush1.bf16.msra.mxu0 %v3302_v19  ;;  %v894_v19 = vld [vmem:[#allocation5 + $0x140] sm:$0xff] }
  0x6e   : > { %770 = vmatprep.subr.bf16.mxu0 %v3310_v20  ;;  %v898_v20 = vld [vmem:[#allocation5 + $0x160] sm:$0xff] }
  0x71   : > { %771 = vmatpush1.bf16.msra.mxu0 %v3308_v21  ;;  %v895_v21 = vld [vmem:[#allocation5 + $0x148] sm:$0xff] }
  0x72   : > { %772 = vmatprep.subr.bf16.mxu0 %v3316_v22  ;;  %v2954_v22 = vcombine.low %v886_v11, %v890_v12  ;;  %v947_v12 = vld [vmem:[#allocation5 + $0x2e8] sm:$0xff] }
  0x75   : > { %773 = vmatpush1.bf16.msra.mxu0 %v3314_v23  ;;  %v899_v23 = vld [vmem:[#allocation5 + $0x168] sm:$0xff] }
  0x76   : > { %774 = vmatprep.subr.bf16.mxu0 %v3322_v24  ;;  %v2956_v24 = vcombine.low %v887_v13, %v891_v14 }
  0x79   : > { %775 = vmatpush1.bf16.msra.mxu0 %v3320_v25  ;;  %v2963_v25 = vcombine.high %v894_v19, %v898_v20 }
  0x7a   : > { %776 = vmatprep.subr.bf16.mxu0 %v3328_v26  ;;  %v2965_v26 = vcombine.high %v895_v21, %v899_v23 }
  0x7d   : > { %777 = vmatpush1.bf16.msra.mxu0 %v3326_v27  ;;  %v902_v27 = vld [vmem:[#allocation5 + $0x180] sm:$0xff] }
  0x7e   : > { %778 = vmatprep.subr.bf16.mxu0 %v3334_v28  ;;  %v906_v28 = vld [vmem:[#allocation5 + $0x1a0] sm:$0xff] }
  0x81   : > { %779 = vmatpush1.bf16.msra.mxu0 %v3332_v30  ;;  %v903_v30 = vld [vmem:[#allocation5 + $0x188] sm:$0xff] }
  0x82   : > { %780 = vmatprep.subr.bf16.mxu0 %v3340_v31  ;;  %v907_v31 = vld [vmem:[#allocation5 + $0x1a8] sm:$0xff] }
  0x85   : > { %781 = vmatpush1.bf16.msra.mxu0 %v3338_v32  ;;  %v2962_v32 = vcombine.low %v894_v19, %v898_v20 }
  0x86   : > { %782 = vmatprep.subr.bf16.mxu0 %v3346_v33  ;;  %v2964_v33 = vcombine.low %v895_v21, %v899_v23  ;;  %v955_v21 = vld [vmem:[#allocation5 + $0x328] sm:$0xff]  ;;  %v962_v23 = vld [vmem:[#allocation5 + $0x360] sm:$0xff] }
  0x89   : > { %783 = vmatpush1.bf16.msra.mxu0 %v3344_v34  ;;  %v2971_v34 = vcombine.high %v902_v27, %v906_v28 }
  0x8a   : > { %784 = vmatprep.subr.bf16.mxu0 %v3349_v35  ;;  %v2973_v35 = vcombine.high %v903_v30, %v907_v31 }
  0x8d   : > { %785 = vmatpush1.bf16.msra.mxu0 %v3347_v36  ;;  %v910_v36 = vld [vmem:[#allocation5 + $0x1c0] sm:$0xff] }
  0x8e   : > { %786 = vmatprep.subr.bf16.mxu0 %v3352_v37  ;;  %v914_v37 = vld [vmem:[#allocation5 + $0x1e0] sm:$0xff] }
  0x8f   : > { %v2978_v48 = vcombine.low %v910_v36, %v914_v37 }
  0x91   : > { %787 = vmatpush1.bf16.msra.mxu0 %v3350_v38  ;;  %v911_v38 = vld [vmem:[#allocation5 + $0x1c8] sm:$0xff] }
  0x92   : > { %788 = vmatprep.subr.bf16.mxu0 %v3355_v39  ;;  %v915_v39 = vld [vmem:[#allocation5 + $0x1e8] sm:$0xff] }
  0x93   : > { %v2981_v43 = vcombine.high %v911_v38, %v915_v39  ;;  %v2980_v49 = vcombine.low %v911_v38, %v915_v39 }
  0x95   : > { %789 = vmatpush1.bf16.msra.mxu0 %v3353_v40  ;;  %v2970_v40 = vcombine.low %v902_v27, %v906_v28  ;;  %v959_v27 = vld [vmem:[#allocation5 + $0x348] sm:$0xff] }
  0x96   : > { %790 = vmatprep.subr.bf16.mxu0 %v3358_v41  ;;  %v2972_v41 = vcombine.low %v903_v30, %v907_v31  ;;  %v963_v28 = vld [vmem:[#allocation5 + $0x368] sm:$0xff]  ;;  %v966_v30 = vld [vmem:[#allocation5 + $0x380] sm:$0xff] }
  0x97   : > { %v3029_v31 = vcombine.high %v959_v27, %v963_v28 }
  0x99   : > { %791 = vmatpush1.bf16.msra.mxu0 %v3356_v42  ;;  %v2979_v42 = vcombine.high %v910_v36, %v914_v37  ;;  %v3028_v36 = vcombine.low %v959_v27, %v963_v28 }
  0x9a   : > { %2514 = vmatprep.subr.bf16.mxu0 %v2925_v52  ;;  %v926_v52 = vld [vmem:[#allocation5 + $0x240] sm:$0xff] }
  0x9b   : > { %v2995_v58 = vcombine.high %v926_v52, %v930_v53  ;;  %v2994_v60 = vcombine.low %v926_v52, %v930_v53  ;;  %v3818_v53 = vld [vmem:[#allocation5 + $0x428] sm:$0xff] }
  0x9c   : > { %793 = vmatmul.mubr.bf16.vlgmr.msra.gmra.mrb[4].mxu0 %v3690_v3  ;;  %v878_v3 = vld [vmem:[#allocation5 + $0xc0] sm:$0xff] }
  0x9d   : > { %2515 = vmatpush1.bf16.msra.mxu0 %v2924_v51  ;;  %v2947_v9 = vcombine.high %v878_v3, %v882_v4  ;;  %v2946_v15 = vcombine.low %v878_v3, %v882_v4  ;;  %v2989_v51 = vcombine.high %v919_v46, %v923_v47  ;;  %v939_v4 = vld [vmem:[#allocation5 + $0x2a8] sm:$0xff] }
  0x9e   : > { %2516 = vmatprep.subr.bf16.mxu0 %v2933_v57  ;;  %v2988_v57 = vcombine.low %v919_v46, %v923_v47 }
  0x9f   : > { %2438 = vmatprep.subr.bf16.mxu1 %v2947_v9  ;;  %v946_v9 = vld [vmem:[#allocation5 + $0x2e0] sm:$0xff] }
  0xa0   : > { %2439 = vmatpush1.bf16.msra.mxu1 %v2946_v15 }
  0xa1   : > { %2517 = vmatpush1.bf16.msra.mxu0 %v2932_v63  ;;  %2440 = vmatprep.subr.bf16.mxu1 %v2955_v17  ;;  %v934_v63 = vld [vmem:[#allocation5 + $0x280] sm:$0xff] }
  0xa2   : > { %2518 = vmatprep.subr.bf16.mxu0 %v2941_v2  ;;  %v935_v2 = vld [vmem:[#allocation5 + $0x288] sm:$0xff]  ;;  %v3003_v3 = vcombine.high %v934_v63, %v938_v0  ;;  %v3002_v5 = vcombine.low %v934_v63, %v938_v0  ;;  %v954_v17 = vld [vmem:[#allocation5 + $0x320] sm:$0xff] }
  0xa3   : > { %v3004_v6 = vcombine.low %v935_v2, %v939_v4  ;;  %v3005_v7 = vcombine.high %v935_v2, %v939_v4  ;;  %v62_v2 = vld [vmem:[%s3837_s23] sm:$0xff] }
  0xa4   : > { %2441 = vmatpush1.bf16.msra.mxu1 %v2954_v22  ;;  %v958_v22 = vld [vmem:[#allocation5 + $0x340] sm:$0xff] }
  0xa5   : > { %2519 = vmatpush1.bf16.msra.mxu0 %v2940_v8  ;;  %2442 = vmatprep.subr.bf16.mxu1 %v2963_v25  ;;  %v942_v8 = vld [vmem:[#allocation5 + $0x2c0] sm:$0xff] }
  0xa6   : > { %2520 = vmatprep.subr.bf16.mxu0 %v2949_v10  ;;  %v943_v10 = vld [vmem:[#allocation5 + $0x2c8] sm:$0xff]  ;;  %v3011_v11 = vcombine.high %v942_v8, %v946_v9  ;;  %v3010_v13 = vcombine.low %v942_v8, %v946_v9 }
  0xa7   : > { %v3012_v14 = vcombine.low %v943_v10, %v947_v12  ;;  %v3013_v15 = vcombine.high %v943_v10, %v947_v12 }
  0xa8   : > { %2443 = vmatpush1.bf16.msra.mxu1 %v2962_v32  ;;  %v970_v32 = vld [vmem:[#allocation5 + $0x3a0] sm:$0xff] }
  0xa9   : > { %2521 = vmatpush1.bf16.msra.mxu0 %v2948_v16  ;;  %2444 = vmatprep.subr.bf16.mxu1 %v2971_v34  ;;  %v950_v16 = vld [vmem:[#allocation5 + $0x300] sm:$0xff]  ;;  %v971_v34 = vld [vmem:[#allocation5 + $0x3a8] sm:$0xff]  ;;  %v3035_v37 = vcombine.high %v966_v30, %v970_v32  ;;  %v3034_v39 = vcombine.low %v966_v30, %v970_v32 }
  0xaa   : > { %2522 = vmatprep.subr.bf16.mxu0 %v2957_v18  ;;  %v951_v18 = vld [vmem:[#allocation5 + $0x308] sm:$0xff]  ;;  %v3018_v19 = vcombine.low %v950_v16, %v954_v17  ;;  %v3019_v20 = vcombine.high %v950_v16, %v954_v17  ;;  %v64_v16 = vld [vmem:[%s3837_s23 + $0x10] sm:$0xff] }
  0xab   : > { %v3021_v25 = vcombine.high %v951_v18, %v955_v21 }
  0xac   : > { %2445 = vmatpush1.bf16.msra.mxu1 %v2970_v40 }
  0xad   : > { %2523 = vmatpush1.bf16.msra.mxu0 %v2956_v24  ;;  %2446 = vmatprep.subr.bf16.mxu1 %v2979_v42  ;;  %v3020_v24 = vcombine.low %v951_v18, %v955_v21  ;;  %v978_v42 = vld [vmem:[#allocation5 + $0x3e0] sm:$0xff] }
  0xae   : > { %2524 = vmatprep.subr.bf16.mxu0 %v2965_v26  ;;  %v3027_v26 = vcombine.high %v958_v22, %v962_v23 }
  0xb0   : > { %2447 = vmatpush1.bf16.msra.mxu1 %v2978_v48 }
  0xb1   : > { %2525 = vmatpush1.bf16.msra.mxu0 %v2964_v33  ;;  %2448 = vmatprep.subr.bf16.mxu1 %v2987_v50  ;;  %v967_v33 = vld [vmem:[#allocation5 + $0x388] sm:$0xff]  ;;  %v3812_v50 = vld [vmem:[#allocation5 + $0x420] sm:$0xff] }
  0xb2   : > { %2526 = vmatprep.subr.bf16.mxu0 %v2973_v35  ;;  %v3026_v35 = vcombine.low %v958_v22, %v962_v23  ;;  %v3037_v38 = vcombine.high %v967_v33, %v971_v34  ;;  %v3036_v40 = vcombine.low %v967_v33, %v971_v34 }
  0xb4   : > { %2449 = vmatpush1.bf16.msra.mxu1 %v2986_v56 }
  0xb5   : > { %2527 = vmatpush1.bf16.msra.mxu0 %v2972_v41  ;;  %2450 = vmatprep.subr.bf16.mxu1 %v2995_v58  ;;  %v974_v41 = vld [vmem:[#allocation5 + $0x3c0] sm:$0xff] }
  0xb6   : > { %2528 = vmatprep.subr.bf16.mxu0 %v2981_v43  ;;  %v975_v43 = vld [vmem:[#allocation5 + $0x3c8] sm:$0xff]  ;;  %v3043_v44 = vcombine.high %v974_v41, %v978_v42  ;;  %v3042_v46 = vcombine.low %v974_v41, %v978_v42 }
  0xb7   : > { %v3044_v47 = vcombine.low %v975_v43, %v979_v45  ;;  %v3045_v48 = vcombine.high %v975_v43, %v979_v45 }
  0xb8   : > { %2451 = vmatpush1.bf16.msra.mxu1 %v2994_v60  ;;  %v166_v60 = vld [vmem:[%s3945_s4] sm:$0x3f] }
  0xb9   : > { %2529 = vmatpush1.bf16.msra.mxu0 %v2980_v49  ;;  %2452 = vmatprep.subr.bf16.mxu1 %v3003_v3  ;;  %v3810_v49 = vld [vmem:[#allocation5 + $0x400] sm:$0xff] }
  0xba   : > { %2530 = vmatprep.subr.bf16.mxu0 %v2989_v51  ;;  %v3814_v51 = vld [vmem:[#allocation5 + $0x408] sm:$0xff]  ;;  %v3051_v52 = vcombine.high %v3810_v49, %v3812_v50  ;;  %v3050_v54 = vcombine.low %v3810_v49, %v3812_v50 }
  0xbb   : > { %v3052_v55 = vcombine.low %v3814_v51, %v3818_v53  ;;  %v3053_v56 = vcombine.high %v3814_v51, %v3818_v53 }
  0xbc   : > { %2453 = vmatpush1.bf16.msra.mxu1 %v3002_v5  ;;  %v63_v5 = vld [vmem:[%s3837_s23 + $0x8] sm:$0xff] }
  0xbd   : > { %2531 = vmatpush1.bf16.msra.mxu0 %v2988_v57  ;;  %2454 = vmatprep.subr.bf16.mxu1 %v3011_v11  ;;  %v168_v57 = vlaneseq }
  0xbe   : > { %2532 = vmatprep.subr.bf16.mxu0 %v2997_v59 }
  0xbf   : > { %v3826_v58 = vshrl.u32 %v168_v57, 7 }
  0xc0   : > { %2455 = vmatpush1.bf16.msra.mxu1 %v3010_v13 }
  0xc1   : > { %2533 = vmatpush1.bf16.msra.mxu0 %v2996_v61  ;;  %2456 = vmatprep.subr.bf16.mxu1 %v3019_v20  ;;  %v170_v59 = vsub.s32 0, %v3826_v58  ;;  %v174_v61 = vsub.s32 1, %v3826_v58  ;;  %v178_v12 = vsub.s32 2, %v3826_v58  ;;  %v182_v13 = vsub.s32 3, %v3826_v58 }
  0xc2   : > { %2534 = vmatprep.subr.bf16.mxu0 %v3005_v7 }
  0xc3   : > { %v171_v63 = vrot.slane %v166_v60, %v170_v59  ;;  %v175_v0 = vrot.slane %v166_v60, %v174_v61 }
  0xc4   : > { %2457 = vmatpush1.bf16.msra.mxu1 %v3018_v19  ;;  %v65_v19 = vld [vmem:[%s3837_s23 + $0x18] sm:$0xff] }
  0xc5   : > { %2535 = vmatpush1.bf16.msra.mxu0 %v3004_v6  ;;  %2458 = vmatprep.subr.bf16.mxu1 %v3027_v26 }
  0xc6   : > { %2536 = vmatprep.subr.bf16.mxu0 %v3013_v15  ;;  %v183_v15 = vrot.slane %v166_v60, %v182_v13 }
  0xc8   : > { %2459 = vmatpush1.bf16.msra.mxu1 %v3026_v35  ;;  %v186_v35 = vsub.s32 4, %v3826_v58 }
  0xc9   : > { %2537 = vmatpush1.bf16.msra.mxu0 %v3012_v14  ;;  %2460 = vmatprep.subr.bf16.mxu1 %v3035_v37  ;;  %v179_v14 = vrot.slane %v166_v60, %v178_v12  ;;  %v190_v37 = vsub.s32 5, %v3826_v58 }
  0xca   : > { %2538 = vmatprep.subr.bf16.mxu0 %v3021_v25 }
  0xcb   : > { %v191_v42 = vrot.slane %v166_v60, %v190_v37 }
  0xcc   : > { %2461 = vmatpush1.bf16.msra.mxu1 %v3034_v39 }
  0xcd   : > { %2539 = vmatpush1.bf16.msra.mxu0 %v3020_v24  ;;  %2462 = vmatprep.subr.bf16.mxu1 %v3043_v44 }
  0xce   : > { %2540 = vmatprep.subr.bf16.mxu0 %v3029_v31 }
  0xd0   : > { %2463 = vmatpush1.bf16.msra.mxu1 %v3042_v46 }
  0xd1   : > { %2541 = vmatpush1.bf16.msra.mxu0 %v3028_v36  ;;  %2473 = vmatprep.subr.bf16.mxu1 %v3051_v52 }
  0xd2   : > { %2542 = vmatprep.subr.bf16.mxu0 %v3037_v38 }
  0xd5   : > { %2543 = vmatpush1.bf16.msra.mxu0 %v3036_v40  ;;  %v187_v40 = vrot.slane %v166_v60, %v186_v35 }
  0xd6   : > { %2544 = vmatprep.subr.bf16.mxu0 %v3045_v48 }
  0xd9   : > { %2545 = vmatpush1.bf16.msra.mxu0 %v3044_v47  ;;  %v66_v47 = vld [vmem:[%s3837_s23 + $0x20] sm:$0xff] }
  0xda   : > { %2555 = vmatprep.subr.bf16.mxu0 %v3053_v56 }
 0x12f   : > { %v712_v3 = vpop.f32.mrb[0].mxu0 }
 0x130   : > { %v713_v4 = vadd.f32 %v712_v3, %v171_v63  ;;  %v714_v6 = vpop.f32.mrb[1].mxu0  ;;  %v67_v63 = vld [vmem:[%s3837_s23 + $0x28] sm:$0xff] }
 0x131   : > { %v715_v7 = vadd.f32 %v714_v6, %v175_v0  ;;  %v716_v8 = vpop.f32.mrb[2].mxu0 }
 0x132   : > { %v801_v9 = vadd.f32 %v713_v4, %v62_v2  ;;  %v717_v10 = vpop.f32.mrb[3].mxu0  ;;  %v3861_v8 = vpop.permute.xlu0 %845 }
 0x133   : > { %v802_v11 = vadd.f32 %v715_v7, %v63_v5  ;;  %vm847_vm1 = vcmp.eq.s32.totalorder %v3861_v8, 1 }
 0x134   : > { %v753_v17 = vpop.f32.mrb[0].mxu1  ;;  %v2918_v26 = vmul.f32 -1.442695, %v801_v9 }
 0x135   : > { %v754_v18 = vadd.f32 %v753_v17, %v179_v14  ;;  %v755_v20 = vpop.f32.mrb[1].mxu1  ;;  %v2919_v27 = vmul.f32 -1.442695, %v802_v11 }
 0x136   : > { %v756_v21 = vadd.f32 %v755_v20, %v183_v15  ;;  %v757_v22 = vpop.f32.mrb[2].mxu1  ;;  %3359 = vpow2.f32 %v2918_v26 }
 0x137   : > { %v815_v23 = vadd.f32 %v754_v18, %v64_v16  ;;  %v758_v24 = vpop.f32.mrb[3].mxu1  ;;  %3361 = vpow2.f32 %v2919_v27  ;;  %v991_v22 = vld [vmem:[#allocation5 + $0x448] sm:$0xff] }
 0x138   : > { %v816_v25 = vadd.f32 %v756_v21, %v65_v19  ;;  %v990_v19 = vld [vmem:[#allocation5 + $0x440] sm:$0xff] }
 0x139   : > { %v2920_v28 = vmul.f32 -1.442695, %v815_v23  ;;  %v994_v21 = vld [vmem:[#allocation5 + $0x460] sm:$0xff]  ;;  %v995_v23 = vld [vmem:[#allocation5 + $0x468] sm:$0xff] }
 0x13a   : > { %v2921_v30 = vmul.f32 -1.442695, %v816_v25  ;;  %v56_v25 = vld [vmem:[#allocation3 + $0x8] sm:$0xff] }
 0x13b   : > { %3363 = vpow2.f32 %v2920_v28  ;;  %v3059_v28 = vcombine.high %v990_v19, %v994_v21 }
 0x13c   : > { %3365 = vpow2.f32 %v2921_v30  ;;  %v3061_v30 = vcombine.high %v991_v22, %v995_v23 }
 0x140   : > { %v3360_v31 = vpop.eup %3359 }
 0x141   : > { %v3362_v32 = vpop.eup %3361  ;;  %v809_v33 = vadd.f32 1.0, %v3360_v31  ;;  %v998_v31 = vld [vmem:[#allocation5 + $0x480] sm:$0xff] }
 0x142   : > { %v810_v34 = vadd.f32 1.0, %v3362_v32  ;;  %v999_v32 = vld [vmem:[#allocation5 + $0x488] sm:$0xff] }
 0x143   : > { %3367 = vrcp.f32 %v809_v33  ;;  %v1003_v33 = vld [vmem:[#allocation5 + $0x4a8] sm:$0xff] }
 0x144   : > { %3369 = vrcp.f32 %v810_v34  ;;  %v3878_v34 = vpack.c.bf16 %v56_v25, %v56_v25  ;;  %v3068_v50 = vcombine.low %v999_v32, %v1003_v33  ;;  %v1050_v25 = vld [vmem:[#allocation5 + $0x620] sm:$0xff] }
 0x145   : > { %v3364_v36 = vpop.eup %3363 }
 0x146   : > { %v3366_v38 = vpop.eup %3365  ;;  %v823_v39 = vadd.f32 1.0, %v3364_v36  ;;  %v3060_v36 = vcombine.low %v991_v22, %v995_v23 }
 0x147   : > { %v824_v41 = vadd.f32 1.0, %v3366_v38 }
 0x148   : > { %3371 = vrcp.f32 %v823_v39  ;;  %v3069_v39 = vcombine.high %v999_v32, %v1003_v33 }
 0x149   : > { %3373 = vrcp.f32 %v824_v41  ;;  %v1010_v41 = vld [vmem:[#allocation5 + $0x4e0] sm:$0xff] }
 0x14d   : > { %v3368_v46 = vpop.eup %3367 }
 0x14e   : > { %v3370_v56 = vpop.eup %3369 }
 0x152   : > { %v3372_v5 = vpop.eup %3371 }
 0x153   : > { %v3374_v60 = vpop.eup %3373  ;;  %v835_v6 = vsub.f32 1.0, %v3372_v5  ;;  %v839_v14 = vmul.f32 %v3372_v5, %v3677_v62 }
 0x154   : > { %v836_v7 = vsub.f32 1.0, %v3374_v60  ;;  %v840_v16 = vmul.f32 %v3374_v60, %v3576_v29  ;;  %v1030_v60 = vld [vmem:[#allocation5 + $0x580] sm:$0xff] }
 0x16f   : > { %v794_v43 = vpop.f32.mrb[4].mxu0 }
 0x170   : > { %v795_v44 = vadd.f32 %v794_v43, %v187_v40  ;;  %v796_v45 = vpop.f32.mrb[5].mxu0  ;;  %v1006_v40 = vld [vmem:[#allocation5 + $0x4c0] sm:$0xff]  ;;  %v1011_v43 = vld [vmem:[#allocation5 + $0x4e8] sm:$0xff] }
 0x171   : > { %v797_v48 = vadd.f32 %v796_v45, %v191_v42  ;;  %v798_v52 = vpop.f32.mrb[6].mxu0  ;;  %v1007_v42 = vld [vmem:[#allocation5 + $0x4c8] sm:$0xff]  ;;  %v3075_v51 = vcombine.high %v1006_v40, %v1010_v41 }
 0x172   : > { %v829_v57 = vmul.f32 %v3368_v46, %v795_v44  ;;  %v799_v0 = vpop.f32.mrb[7].mxu0  ;;  %v3077_v53 = vcombine.high %v1007_v42, %v1011_v43  ;;  %v1015_v44 = vld [vmem:[#allocation5 + $0x508] sm:$0xff]  ;;  %v3074_v46 = vcombine.low %v1006_v40, %v1010_v41 }
 0x173   : > { %v830_v2 = vmul.f32 %v3370_v56, %v797_v48  ;;  %v1019_v45 = vld [vmem:[#allocation5 + $0x528] sm:$0xff]  ;;  %v1022_v56 = vld [vmem:[#allocation5 + $0x540] sm:$0xff] }
 0x174   : > { %v831_v3 = vadd.f32 %v829_v57, %v66_v47  ;;  %v3076_v47 = vcombine.low %v1007_v42, %v1011_v43  ;;  %v3085_v52 = vcombine.high %v1015_v44, %v1019_v45  ;;  %v1026_v57 = vld [vmem:[#allocation5 + $0x560] sm:$0xff]  ;;  %v1027_v0 = vld [vmem:[#allocation5 + $0x568] sm:$0xff] }
 0x175   : > { %v832_v4 = vadd.f32 %v830_v2, %v67_v63  ;;  %v1023_v63 = vld [vmem:[#allocation5 + $0x548] sm:$0xff] }
 0x176   : > { %3375 = vtanh.f32 %v831_v3  ;;  %v3084_v3 = vcombine.low %v1015_v44, %v1019_v45  ;;  %v3093_v5 = vcombine.high %v1023_v63, %v1027_v0 }
 0x177   : > { %3377 = vtanh.f32 %v832_v4  ;;  %v3091_v4 = vcombine.high %v1022_v56, %v1026_v57 }
 0x180   : > { %v3376_v9 = vpop.eup %3375 }
 0x181   : > { %v3378_v10 = vpop.eup %3377  ;;  %v837_v11 = vmul.f32 %v3376_v9, %v835_v6  ;;  %v1034_v6 = vld [vmem:[#allocation5 + $0x5a0] sm:$0xff]  ;;  %v1035_v9 = vld [vmem:[#allocation5 + $0x5a8] sm:$0xff] }
 0x182   : > { %v838_v15 = vmul.f32 %v3378_v10, %v836_v7  ;;  %v1031_v7 = vld [vmem:[#allocation5 + $0x588] sm:$0xff]  ;;  %v3090_v10 = vcombine.low %v1022_v56, %v1026_v57 }
 0x183   : > { %v841_v17 = vadd.f32 %v839_v14, %v837_v11  ;;  %v3092_v11 = vcombine.low %v1023_v63, %v1027_v0  ;;  %v3099_v14 = vcombine.high %v1030_v60, %v1034_v6 }
 0x184   : > { %v842_v18 = vadd.f32 %v840_v16, %v838_v15  ;;  %v3101_v15 = vcombine.high %v1031_v7, %v1035_v9  ;;  %v1038_v16 = vld [vmem:[#allocation5 + $0x5c0] sm:$0xff] }
 0x185   : > { %v848_v20 = vsel %vm847_vm1, %v841_v17, %v3677_v62  ;;  %v1002_v62 = vld [vmem:[#allocation5 + $0x4a0] sm:$0xff] }
 0x186   : > { %v849_v24 = vsel %vm847_vm1, %v842_v18, %v3576_v29  ;;  %2800 = vst [vmem:[#allocation2] sm:$0xff] %v848_v20  ;;  %v3874_v27 = vpack.c.bf16 %v848_v20, %v848_v20  ;;  %v3058_v29 = vcombine.low %v990_v19, %v994_v21  ;;  %v3067_v38 = vcombine.high %v998_v31, %v1002_v62  ;;  %v1042_v17 = vld [vmem:[#allocation5 + $0x5e0] sm:$0xff]  ;;  %v1039_v18 = vld [vmem:[#allocation5 + $0x5c8] sm:$0xff] }
 0x187   : > { %v3872_v26 = vpack.c.bf16 %v849_v24, %v849_v24  ;;  %2801 = vst [vmem:[#allocation2 + $0x8] sm:$0xff] %v849_v24  ;;  %v3066_v49 = vcombine.low %v998_v31, %v1002_v62  ;;  %v1043_v19 = vld [vmem:[#allocation5 + $0x5e8] sm:$0xff]  ;;  %v3098_v20 = vcombine.low %v1030_v60, %v1034_v6  ;;  %v3100_v21 = vcombine.low %v1031_v7, %v1035_v9  ;;  %v1046_v24 = vld [vmem:[#allocation5 + $0x600] sm:$0xff] }
 0x188   : > { %v3107_v22 = vcombine.high %v1038_v16, %v1042_v17  ;;  %v3109_v23 = vcombine.high %v1039_v18, %v1043_v19  ;;  %v3106_v31 = vcombine.low %v1038_v16, %v1042_v17  ;;  %v3108_v62 = vcombine.low %v1039_v18, %v1043_v19 }
 0x189   : > { %2464 = vmatprep.mubr.bf16.mxu1 %v3872_v26  ;;  %2546 = vmatprep.mubr.bf16.mxu0 %v3872_v26  ;;  %v3115_v32 = vcombine.high %v1046_v24, %v1050_v25  ;;  %v3114_v40 = vcombine.low %v1046_v24, %v1050_v25 }
 0x18a   : > { %2465 = vmatmul.mubr.bf16.vlgmr.msra.gmra.mrb[4].mxu1 %v3874_v27  ;;  %2547 = vmatmul.mubr.bf16.vlgmr.msra.gmra.mrb[8].mxu0 %v3874_v27 }
 0x18b   : > { %2474 = vmatpush1.bf16.msra.mxu1 %v3050_v54  ;;  %2556 = vmatpush1.bf16.msra.mxu0 %v3052_v55  ;;  %v1014_v54 = vld [vmem:[#allocation5 + $0x500] sm:$0xff] }
 0x18c   : > { %2475 = vmatprep.subr.bf16.mxu1 %v3059_v28  ;;  %2557 = vmatprep.subr.bf16.mxu0 %v3061_v30  ;;  %v1018_v55 = vld [vmem:[#allocation5 + $0x520] sm:$0xff]  ;;  %v1047_v28 = vld [vmem:[#allocation5 + $0x608] sm:$0xff] }
 0x18d   : > { %2505 = vmatprep.mubr.bf16.mxu1 %v3878_v34  ;;  %2587 = vmatprep.mubr.bf16.mxu0 %v3878_v34  ;;  %v3083_v48 = vcombine.high %v1014_v54, %v1018_v55  ;;  %v3082_v2 = vcombine.low %v1014_v54, %v1018_v55  ;;  %v1051_v30 = vld [vmem:[#allocation5 + $0x628] sm:$0xff] }
 0x18e   : > { %v3117_v33 = vcombine.high %v1047_v28, %v1051_v30  ;;  %v3116_v41 = vcombine.low %v1047_v28, %v1051_v30 }
 0x18f   : > { %2476 = vmatpush1.bf16.msra.mxu1 %v3058_v29  ;;  %2558 = vmatpush1.bf16.msra.mxu0 %v3060_v36  ;;  %v1054_v29 = vld [vmem:[#allocation5 + $0x640] sm:$0xff] }
 0x190   : > { %2477 = vmatprep.subr.bf16.mxu1 %v3067_v38  ;;  %2559 = vmatprep.subr.bf16.mxu0 %v3069_v39  ;;  %v1058_v36 = vld [vmem:[#allocation5 + $0x660] sm:$0xff]  ;;  %v1055_v38 = vld [vmem:[#allocation5 + $0x648] sm:$0xff] }
 0x191   : > { %v1059_v39 = vld [vmem:[#allocation5 + $0x668] sm:$0xff]  ;;  %v3123_v42 = vcombine.high %v1054_v29, %v1058_v36  ;;  %v3122_v54 = vcombine.low %v1054_v29, %v1058_v36 }
 0x192   : > { %v3125_v43 = vcombine.high %v1055_v38, %v1059_v39  ;;  %v3124_v55 = vcombine.low %v1055_v38, %v1059_v39 }
 0x193   : > { %2478 = vmatpush1.bf16.msra.mxu1 %v3066_v49  ;;  %2560 = vmatpush1.bf16.msra.mxu0 %v3068_v50  ;;  %v1062_v49 = vld [vmem:[#allocation5 + $0x680] sm:$0xff] }
 0x194   : > { %2479 = vmatprep.subr.bf16.mxu1 %v3075_v51  ;;  %2561 = vmatprep.subr.bf16.mxu0 %v3077_v53  ;;  %v1066_v50 = vld [vmem:[#allocation5 + $0x6a0] sm:$0xff]  ;;  %v1063_v51 = vld [vmem:[#allocation5 + $0x688] sm:$0xff] }
 0x195   : > { %v1067_v53 = vld [vmem:[#allocation5 + $0x6a8] sm:$0xff]  ;;  %v3131_v44 = vcombine.high %v1062_v49, %v1066_v50  ;;  %v3130_v56 = vcombine.low %v1062_v49, %v1066_v50 }
 0x196   : > { %v3133_v45 = vcombine.high %v1063_v51, %v1067_v53  ;;  %v3132_v57 = vcombine.low %v1063_v51, %v1067_v53  ;;  %v3890_v51 = vld [vmem:[#allocation3] sm:$0xff] }
 0x197   : > { %2480 = vmatpush1.bf16.msra.mxu1 %v3074_v46  ;;  %2562 = vmatpush1.bf16.msra.mxu0 %v3076_v47  ;;  %v1070_v46 = vld [vmem:[#allocation5 + $0x6c0] sm:$0xff] }
 0x198   : > { %2481 = vmatprep.subr.bf16.mxu1 %v3083_v48  ;;  %2563 = vmatprep.subr.bf16.mxu0 %v3085_v52  ;;  %v1074_v47 = vld [vmem:[#allocation5 + $0x6e0] sm:$0xff]  ;;  %v1071_v48 = vld [vmem:[#allocation5 + $0x6c8] sm:$0xff] }
 0x199   : > { %v1075_v52 = vld [vmem:[#allocation5 + $0x6e8] sm:$0xff]  ;;  %v3139_v63 = vcombine.high %v1070_v46, %v1074_v47  ;;  %v3138_v60 = vcombine.low %v1070_v46, %v1074_v47  ;;  %v992_v46 = vld [vmem:[#allocation5 + $0x450] sm:$0xff] }
 0x19a   : > { %v3141_v0 = vcombine.high %v1071_v48, %v1075_v52  ;;  %v3140_v6 = vcombine.low %v1071_v48, %v1075_v52  ;;  %v996_v47 = vld [vmem:[#allocation5 + $0x470] sm:$0xff] }
 0x19b   : > { %2482 = vmatpush1.bf16.msra.mxu1 %v3082_v2  ;;  %2564 = vmatpush1.bf16.msra.mxu0 %v3084_v3  ;;  %v1078_v2 = vld [vmem:[#allocation5 + $0x700] sm:$0xff] }
 0x19c   : > { %2483 = vmatprep.subr.bf16.mxu1 %v3091_v4  ;;  %2565 = vmatprep.subr.bf16.mxu0 %v3093_v5  ;;  %v1082_v3 = vld [vmem:[#allocation5 + $0x720] sm:$0xff]  ;;  %v1079_v4 = vld [vmem:[#allocation5 + $0x708] sm:$0xff] }
 0x19d   : > { %v1083_v5 = vld [vmem:[#allocation5 + $0x728] sm:$0xff]  ;;  %v3147_v7 = vcombine.high %v1078_v2, %v1082_v3  ;;  %v3146_v16 = vcombine.low %v1078_v2, %v1082_v3  ;;  %v1000_v2 = vld [vmem:[#allocation5 + $0x490] sm:$0xff] }
 0x19e   : > { %v3149_v9 = vcombine.high %v1079_v4, %v1083_v5  ;;  %v3148_v17 = vcombine.low %v1079_v4, %v1083_v5  ;;  %v1004_v3 = vld [vmem:[#allocation5 + $0x4b0] sm:$0xff]  ;;  %v3062_v5 = vcombine.low %v992_v46, %v996_v47 }
 0x19f   : > { %2484 = vmatpush1.bf16.msra.mxu1 %v3090_v10  ;;  %2566 = vmatpush1.bf16.msra.mxu0 %v3092_v11  ;;  %v1086_v10 = vld [vmem:[#allocation5 + $0x740] sm:$0xff] }
 0x1a0   : > { %2485 = vmatprep.subr.bf16.mxu1 %v3099_v14  ;;  %2567 = vmatprep.subr.bf16.mxu0 %v3101_v15  ;;  %v1090_v11 = vld [vmem:[#allocation5 + $0x760] sm:$0xff]  ;;  %v1087_v14 = vld [vmem:[#allocation5 + $0x748] sm:$0xff] }
 0x1a1   : > { %v1091_v15 = vld [vmem:[#allocation5 + $0x768] sm:$0xff]  ;;  %v3155_v18 = vcombine.high %v1086_v10, %v1090_v11  ;;  %v3154_v24 = vcombine.low %v1086_v10, %v1090_v11  ;;  %v1008_v10 = vld [vmem:[#allocation5 + $0x4d0] sm:$0xff] }
 0x1a2   : > { %v3157_v19 = vcombine.high %v1087_v14, %v1091_v15  ;;  %v3156_v25 = vcombine.low %v1087_v14, %v1091_v15  ;;  %v1012_v11 = vld [vmem:[#allocation5 + $0x4f0] sm:$0xff]  ;;  %v3070_v15 = vcombine.low %v1000_v2, %v1004_v3 }
 0x1a3   : > { %2486 = vmatpush1.bf16.msra.mxu1 %v3098_v20  ;;  %2568 = vmatpush1.bf16.msra.mxu0 %v3100_v21  ;;  %v1094_v20 = vld [vmem:[#allocation5 + $0x780] sm:$0xff] }
 0x1a4   : > { %2487 = vmatprep.subr.bf16.mxu1 %v3107_v22  ;;  %2569 = vmatprep.subr.bf16.mxu0 %v3109_v23  ;;  %v1098_v21 = vld [vmem:[#allocation5 + $0x7a0] sm:$0xff]  ;;  %v1095_v22 = vld [vmem:[#allocation5 + $0x788] sm:$0xff] }
 0x1a5   : > { %v1099_v23 = vld [vmem:[#allocation5 + $0x7a8] sm:$0xff]  ;;  %v3163_v28 = vcombine.high %v1094_v20, %v1098_v21  ;;  %v3162_v29 = vcombine.low %v1094_v20, %v1098_v21  ;;  %v1016_v20 = vld [vmem:[#allocation5 + $0x510] sm:$0xff] }
 0x1a6   : > { %v3165_v30 = vcombine.high %v1095_v22, %v1099_v23  ;;  %v3164_v36 = vcombine.low %v1095_v22, %v1099_v23  ;;  %v1020_v21 = vld [vmem:[#allocation5 + $0x530] sm:$0xff]  ;;  %v3078_v23 = vcombine.low %v1008_v10, %v1012_v11 }
 0x1a7   : > { %2488 = vmatpush1.bf16.msra.mxu1 %v3106_v31  ;;  %2570 = vmatpush1.bf16.msra.mxu0 %v3108_v62  ;;  %v1102_v31 = vld [vmem:[#allocation5 + $0x7c0] sm:$0xff] }
 0x1a8   : > { %2489 = vmatprep.subr.bf16.mxu1 %v3115_v32  ;;  %2571 = vmatprep.subr.bf16.mxu0 %v3117_v33  ;;  %v1106_v62 = vld [vmem:[#allocation5 + $0x7e0] sm:$0xff]  ;;  %v1103_v32 = vld [vmem:[#allocation5 + $0x7c8] sm:$0xff] }
 0x1a9   : > { %v1107_v33 = vld [vmem:[#allocation5 + $0x7e8] sm:$0xff]  ;;  %v3171_v38 = vcombine.high %v1102_v31, %v1106_v62  ;;  %v3170_v49 = vcombine.low %v1102_v31, %v1106_v62  ;;  %v1024_v31 = vld [vmem:[#allocation5 + $0x550] sm:$0xff] }
 0x1aa   : > { %v3173_v39 = vcombine.high %v1103_v32, %v1107_v33  ;;  %v3172_v50 = vcombine.low %v1103_v32, %v1107_v33  ;;  %v1028_v62 = vld [vmem:[#allocation5 + $0x570] sm:$0xff]  ;;  %v3086_v33 = vcombine.low %v1016_v20, %v1020_v21 }
 0x1ab   : > { %2490 = vmatpush1.bf16.msra.mxu1 %v3114_v40  ;;  %2572 = vmatpush1.bf16.msra.mxu0 %v3116_v41  ;;  %v856_v40 = vld [vmem:[#allocation5 + $0x10] sm:$0xff] }
 0x1ac   : > { %2491 = vmatprep.subr.bf16.mxu1 %v3123_v42  ;;  %2573 = vmatprep.subr.bf16.mxu0 %v3125_v43  ;;  %v860_v41 = vld [vmem:[#allocation5 + $0x30] sm:$0xff] }
 0x1ad   : > { %v984_v42 = vld [vmem:[#allocation5 + $0x410] sm:$0xff]  ;;  %v2927_v53 = vcombine.high %v856_v40, %v860_v41  ;;  %v2926_v48 = vcombine.low %v856_v40, %v860_v41 }
 0x1ae   : > { %v988_v43 = vld [vmem:[#allocation5 + $0x430] sm:$0xff] }
 0x1af   : > { %2492 = vmatpush1.bf16.msra.mxu1 %v3122_v54  ;;  %2574 = vmatpush1.bf16.msra.mxu0 %v3124_v55  ;;  %v3055_v54 = vcombine.high %v984_v42, %v988_v43  ;;  %v864_v55 = vld [vmem:[#allocation5 + $0x50] sm:$0xff]  ;;  %v3054_v52 = vcombine.low %v984_v42, %v988_v43  ;;  %v3094_v43 = vcombine.low %v1024_v31, %v1028_v62 }
 0x1b0   : > { %2493 = vmatprep.subr.bf16.mxu1 %v3131_v44  ;;  %2575 = vmatprep.subr.bf16.mxu0 %v3133_v45  ;;  %v868_v44 = vld [vmem:[#allocation5 + $0x70] sm:$0xff]  ;;  %v3894_v45 = vpack.c.bf16 %v3890_v51, %v3890_v51 }
 0x1b1   : > { %v2934_v4 = vcombine.low %v864_v55, %v868_v44  ;;  %v1032_v40 = vld [vmem:[#allocation5 + $0x590] sm:$0xff] }
 0x1b2   : > { %v1036_v41 = vld [vmem:[#allocation5 + $0x5b0] sm:$0xff] }
 0x1b3   : > { %2494 = vmatpush1.bf16.msra.mxu1 %v3130_v56  ;;  %2576 = vmatpush1.bf16.msra.mxu0 %v3132_v57  ;;  %v2935_v56 = vcombine.high %v864_v55, %v868_v44  ;;  %v3063_v57 = vcombine.high %v992_v46, %v996_v47  ;;  %v1040_v55 = vld [vmem:[#allocation5 + $0x5d0] sm:$0xff]  ;;  %v3102_v47 = vcombine.low %v1032_v40, %v1036_v41 }
 0x1b4   : > { %2495 = vmatprep.subr.bf16.mxu1 %v3139_v63  ;;  %2577 = vmatprep.subr.bf16.mxu0 %v3141_v0  ;;  %v872_v63 = vld [vmem:[#allocation5 + $0x90] sm:$0xff] }
 0x1b5   : > { %v876_v0 = vld [vmem:[#allocation5 + $0xb0] sm:$0xff] }
 0x1b6   : > { %v2942_v14 = vcombine.low %v872_v63, %v876_v0  ;;  %v1044_v44 = vld [vmem:[#allocation5 + $0x5f0] sm:$0xff] }
 0x1b7   : > { %2496 = vmatpush1.bf16.msra.mxu1 %v3138_v60  ;;  %2578 = vmatpush1.bf16.msra.mxu0 %v3140_v6  ;;  %v2943_v60 = vcombine.high %v872_v63, %v876_v0  ;;  %v3071_v6 = vcombine.high %v1000_v2, %v1004_v3  ;;  %v1048_v63 = vld [vmem:[#allocation5 + $0x610] sm:$0xff]  ;;  %v3110_v3 = vcombine.low %v1040_v55, %v1044_v44 }
 0x1b8   : > { %2497 = vmatprep.subr.bf16.mxu1 %v3147_v7  ;;  %2579 = vmatprep.subr.bf16.mxu0 %v3149_v9  ;;  %v880_v7 = vld [vmem:[#allocation5 + $0xd0] sm:$0xff] }
 0x1b9   : > { %v884_v9 = vld [vmem:[#allocation5 + $0xf0] sm:$0xff] }
 0x1ba   : > { %v2950_v22 = vcombine.low %v880_v7, %v884_v9  ;;  %v1052_v0 = vld [vmem:[#allocation5 + $0x630] sm:$0xff] }
 0x1bb   : > { %2498 = vmatpush1.bf16.msra.mxu1 %v3146_v16  ;;  %2580 = vmatpush1.bf16.msra.mxu0 %v3148_v17  ;;  %v2951_v16 = vcombine.high %v880_v7, %v884_v9  ;;  %v3079_v17 = vcombine.high %v1008_v10, %v1012_v11  ;;  %v1056_v7 = vld [vmem:[#allocation5 + $0x650] sm:$0xff]  ;;  %v3118_v11 = vcombine.low %v1048_v63, %v1052_v0 }
 0x1bc   : > { %2499 = vmatprep.subr.bf16.mxu1 %v3155_v18  ;;  %2581 = vmatprep.subr.bf16.mxu0 %v3157_v19  ;;  %v888_v18 = vld [vmem:[#allocation5 + $0x110] sm:$0xff] }
 0x1bd   : > { %v892_v19 = vld [vmem:[#allocation5 + $0x130] sm:$0xff] }
 0x1be   : > { %v2958_v32 = vcombine.low %v888_v18, %v892_v19  ;;  %v1060_v9 = vld [vmem:[#allocation5 + $0x670] sm:$0xff] }
 0x1bf   : > { %2500 = vmatpush1.bf16.msra.mxu1 %v3154_v24  ;;  %2582 = vmatpush1.bf16.msra.mxu0 %v3156_v25  ;;  %v2959_v24 = vcombine.high %v888_v18, %v892_v19  ;;  %v3087_v25 = vcombine.high %v1016_v20, %v1020_v21  ;;  %v1064_v18 = vld [vmem:[#allocation5 + $0x690] sm:$0xff]  ;;  %v3126_v21 = vcombine.low %v1056_v7, %v1060_v9 }
 0x1c0   : > { %2501 = vmatprep.subr.bf16.mxu1 %v3163_v28  ;;  %2583 = vmatprep.subr.bf16.mxu0 %v3165_v30  ;;  %v896_v28 = vld [vmem:[#allocation5 + $0x150] sm:$0xff] }
 0x1c1   : > { %v900_v30 = vld [vmem:[#allocation5 + $0x170] sm:$0xff] }
 0x1c2   : > { %v2966_v42 = vcombine.low %v896_v28, %v900_v30  ;;  %v1068_v19 = vld [vmem:[#allocation5 + $0x6b0] sm:$0xff] }
 0x1c3   : > { %2502 = vmatpush1.bf16.msra.mxu1 %v3162_v29  ;;  %2584 = vmatpush1.bf16.msra.mxu0 %v3164_v36  ;;  %v2967_v29 = vcombine.high %v896_v28, %v900_v30  ;;  %v3095_v36 = vcombine.high %v1024_v31, %v1028_v62  ;;  %v1072_v28 = vld [vmem:[#allocation5 + $0x6d0] sm:$0xff]  ;;  %v3134_v62 = vcombine.low %v1064_v18, %v1068_v19 }
 0x1c4   : > { %2503 = vmatprep.subr.bf16.mxu1 %v3171_v38  ;;  %2585 = vmatprep.subr.bf16.mxu0 %v3173_v39  ;;  %v904_v38 = vld [vmem:[#allocation5 + $0x190] sm:$0xff] }
 0x1c5   : > { %v908_v39 = vld [vmem:[#allocation5 + $0x1b0] sm:$0xff] }
 0x1c6   : > { %v2974_v46 = vcombine.low %v904_v38, %v908_v39  ;;  %v1076_v30 = vld [vmem:[#allocation5 + $0x6f0] sm:$0xff] }
 0x1c7   : > { %2504 = vmatpush1.bf16.msra.mxu1 %v3170_v49  ;;  %2586 = vmatpush1.bf16.msra.mxu0 %v3172_v50  ;;  %v2975_v49 = vcombine.high %v904_v38, %v908_v39  ;;  %v3103_v50 = vcombine.high %v1032_v40, %v1036_v41  ;;  %v1080_v38 = vld [vmem:[#allocation5 + $0x710] sm:$0xff]  ;;  %v3142_v41 = vcombine.low %v1072_v28, %v1076_v30 }
 0x1c8   : > { %2596 = vmatprep.subr.bf16.mxu1 %v2927_v53  ;;  %2637 = vmatprep.subr.bf16.mxu0 %v3055_v54  ;;  %v912_v53 = vld [vmem:[#allocation5 + $0x1d0] sm:$0xff] }
 0x1c9   : > { %v916_v54 = vld [vmem:[#allocation5 + $0x1f0] sm:$0xff] }
 0x1ca   : > { %2506 = vmatmul.mubr.bf16.vlgmr.msra.gmra.mrb[4].mxu1 %v3894_v45  ;;  %2588 = vmatmul.mubr.bf16.vlgmr.msra.gmra.mrb[8].mxu0 %v3894_v45  ;;  %v2982_v2 = vcombine.low %v912_v53, %v916_v54  ;;  %v1084_v39 = vld [vmem:[#allocation5 + $0x730] sm:$0xff] }
 0x1cb   : > { %2597 = vmatpush1.bf16.msra.mxu1 %v2926_v48  ;;  %2628 = vmatprep.mubr.bf16.mxu1 %v3872_v26  ;;  %v2983_v48 = vcombine.high %v912_v53, %v916_v54  ;;  %v1088_v53 = vld [vmem:[#allocation5 + $0x750] sm:$0xff] }
 0x1cc   : > { %2638 = vmatpush1.bf16.msra.mxu0 %v3054_v52  ;;  %2598 = vmatprep.subr.bf16.mxu1 %v2935_v56  ;;  %v3111_v52 = vcombine.high %v1040_v55, %v1044_v44  ;;  %v920_v56 = vld [vmem:[#allocation5 + $0x210] sm:$0xff]  ;;  %v3150_v44 = vcombine.low %v1080_v38, %v1084_v39 }
 0x1cd   : > { %2639 = vmatprep.subr.bf16.mxu0 %v3063_v57  ;;  %2669 = vmatprep.mubr.bf16.mxu0 %v3878_v34  ;;  %v924_v57 = vld [vmem:[#allocation5 + $0x230] sm:$0xff] }
 0x1ce   : > { %v2990_v10 = vcombine.low %v920_v56, %v924_v57  ;;  %v1092_v54 = vld [vmem:[#allocation5 + $0x770] sm:$0xff] }
 0x1cf   : > { %2599 = vmatpush1.bf16.msra.mxu1 %v2934_v4  ;;  %v2991_v4 = vcombine.high %v920_v56, %v924_v57  ;;  %v1096_v56 = vld [vmem:[#allocation5 + $0x790] sm:$0xff] }
 0x1d0   : > { %2640 = vmatpush1.bf16.msra.mxu0 %v3062_v5  ;;  %2600 = vmatprep.subr.bf16.mxu1 %v2943_v60  ;;  %v3119_v5 = vcombine.high %v1048_v63, %v1052_v0  ;;  %v928_v60 = vld [vmem:[#allocation5 + $0x250] sm:$0xff]  ;;  %v3158_v0 = vcombine.low %v1088_v53, %v1092_v54 }
 0x1d1   : > { %2641 = vmatprep.subr.bf16.mxu0 %v3071_v6  ;;  %v932_v6 = vld [vmem:[#allocation5 + $0x270] sm:$0xff] }
 0x1d2   : > { %v2998_v20 = vcombine.low %v928_v60, %v932_v6  ;;  %v1100_v57 = vld [vmem:[#allocation5 + $0x7b0] sm:$0xff] }
 0x1d3   : > { %2601 = vmatpush1.bf16.msra.mxu1 %v2942_v14  ;;  %v2999_v14 = vcombine.high %v928_v60, %v932_v6  ;;  %v1104_v60 = vld [vmem:[#allocation5 + $0x7d0] sm:$0xff] }
 0x1d4   : > { %2642 = vmatpush1.bf16.msra.mxu0 %v3070_v15  ;;  %2602 = vmatprep.subr.bf16.mxu1 %v2951_v16  ;;  %v3127_v15 = vcombine.high %v1056_v7, %v1060_v9  ;;  %v936_v16 = vld [vmem:[#allocation5 + $0x290] sm:$0xff]  ;;  %v3166_v9 = vcombine.low %v1096_v56, %v1100_v57 }
 0x1d5   : > { %2643 = vmatprep.subr.bf16.mxu0 %v3079_v17  ;;  %v940_v17 = vld [vmem:[#allocation5 + $0x2b0] sm:$0xff] }
 0x1d6   : > { %v3006_v31 = vcombine.low %v936_v16, %v940_v17  ;;  %v1108_v6 = vld [vmem:[#allocation5 + $0x7f0] sm:$0xff] }
 0x1d7   : > { %2603 = vmatpush1.bf16.msra.mxu1 %v2950_v22  ;;  %v3007_v22 = vcombine.high %v936_v16, %v940_v17  ;;  %v3174_v17 = vcombine.low %v1104_v60, %v1108_v6 }
 0x1d8   : > { %2644 = vmatpush1.bf16.msra.mxu0 %v3078_v23  ;;  %2604 = vmatprep.subr.bf16.mxu1 %v2959_v24  ;;  %v3135_v23 = vcombine.high %v1064_v18, %v1068_v19  ;;  %v944_v24 = vld [vmem:[#allocation5 + $0x2d0] sm:$0xff]  ;;  %v865_v19 = vld [vmem:[#allocation5 + $0x58] sm:$0xff] }
 0x1d9   : > { %2645 = vmatprep.subr.bf16.mxu0 %v3087_v25  ;;  %v948_v25 = vld [vmem:[#allocation5 + $0x2f0] sm:$0xff] }
 0x1da   : > { %v3014_v40 = vcombine.low %v944_v24, %v948_v25 }
 0x1db   : > { %2605 = vmatpush1.bf16.msra.mxu1 %v2958_v32  ;;  %v3015_v32 = vcombine.high %v944_v24, %v948_v25  ;;  %v877_v24 = vld [vmem:[#allocation5 + $0xb8] sm:$0xff] }
 0x1dc   : > { %2646 = vmatpush1.bf16.msra.mxu0 %v3086_v33  ;;  %2606 = vmatprep.subr.bf16.mxu1 %v2967_v29  ;;  %v3143_v33 = vcombine.high %v1072_v28, %v1076_v30  ;;  %v952_v29 = vld [vmem:[#allocation5 + $0x310] sm:$0xff]  ;;  %v881_v30 = vld [vmem:[#allocation5 + $0xd8] sm:$0xff] }
 0x1dd   : > { %2647 = vmatprep.subr.bf16.mxu0 %v3095_v36  ;;  %v956_v36 = vld [vmem:[#allocation5 + $0x330] sm:$0xff] }
 0x1de   : > { %v3022_v55 = vcombine.low %v952_v29, %v956_v36 }
 0x1df   : > { %2607 = vmatpush1.bf16.msra.mxu1 %v2966_v42  ;;  %v3023_v42 = vcombine.high %v952_v29, %v956_v36  ;;  %v893_v29 = vld [vmem:[#allocation5 + $0x138] sm:$0xff] }
 0x1e0   : > { %2648 = vmatpush1.bf16.msra.mxu0 %v3094_v43  ;;  %2608 = vmatprep.subr.bf16.mxu1 %v2975_v49  ;;  %v3151_v43 = vcombine.high %v1080_v38, %v1084_v39  ;;  %v960_v49 = vld [vmem:[#allocation5 + $0x350] sm:$0xff]  ;;  %v897_v39 = vld [vmem:[#allocation5 + $0x158] sm:$0xff] }
 0x1e1   : > { %2649 = vmatprep.subr.bf16.mxu0 %v3103_v50  ;;  %v964_v50 = vld [vmem:[#allocation5 + $0x370] sm:$0xff] }
 0x1e2   : > { %v3030_v63 = vcombine.low %v960_v49, %v964_v50 }
 0x1e3   : > { %2609 = vmatpush1.bf16.msra.mxu1 %v2974_v46  ;;  %v3031_v46 = vcombine.high %v960_v49, %v964_v50 }
 0x1e4   : > { %2650 = vmatpush1.bf16.msra.mxu0 %v3102_v47  ;;  %2610 = vmatprep.subr.bf16.mxu1 %v2983_v48  ;;  %v3159_v47 = vcombine.high %v1088_v53, %v1092_v54  ;;  %v968_v48 = vld [vmem:[#allocation5 + $0x390] sm:$0xff]  ;;  %v913_v53 = vld [vmem:[#allocation5 + $0x1d8] sm:$0xff] }
 0x1e5   : > { %2651 = vmatprep.subr.bf16.mxu0 %v3111_v52  ;;  %v972_v52 = vld [vmem:[#allocation5 + $0x3b0] sm:$0xff]  ;;  %v917_v54 = vld [vmem:[#allocation5 + $0x1f8] sm:$0xff] }
 0x1e6   : > { %v3038_v7 = vcombine.low %v968_v48, %v972_v52 }
 0x1e7   : > { %2611 = vmatpush1.bf16.msra.mxu1 %v2982_v2  ;;  %v3039_v2 = vcombine.high %v968_v48, %v972_v52  ;;  %v2984_v48 = vcombine.low %v913_v53, %v917_v54 }
 0x1e8   : > { %2652 = vmatpush1.bf16.msra.mxu0 %v3110_v3  ;;  %2612 = vmatprep.subr.bf16.mxu1 %v2991_v4  ;;  %v3167_v3 = vcombine.high %v1096_v56, %v1100_v57  ;;  %v976_v4 = vld [vmem:[#allocation5 + $0x3d0] sm:$0xff]  ;;  %v929_v56 = vld [vmem:[#allocation5 + $0x258] sm:$0xff] }
 0x1e9   : > { %2653 = vmatprep.subr.bf16.mxu0 %v3119_v5  ;;  %v980_v5 = vld [vmem:[#allocation5 + $0x3f0] sm:$0xff]  ;;  %v933_v57 = vld [vmem:[#allocation5 + $0x278] sm:$0xff] }
 0x1ea   : > { %v3046_v16 = vcombine.low %v976_v4, %v980_v5 }
 0x1eb   : > { %2613 = vmatpush1.bf16.msra.mxu1 %v2990_v10  ;;  %v3047_v10 = vcombine.high %v976_v4, %v980_v5  ;;  %v3000_v4 = vcombine.low %v929_v56, %v933_v57 }
 0x1ec   : > { %2654 = vmatpush1.bf16.msra.mxu0 %v3118_v11  ;;  %2614 = vmatprep.subr.bf16.mxu1 %v2999_v14  ;;  %v3175_v11 = vcombine.high %v1104_v60, %v1108_v6  ;;  %v857_v14 = vld [vmem:[#allocation5 + $0x18] sm:$0xff] }
 0x1ed   : > { %2655 = vmatprep.subr.bf16.mxu0 %v3127_v15  ;;  %v861_v15 = vld [vmem:[#allocation5 + $0x38] sm:$0xff] }
 0x1ee   : > { %v2929_v18 = vcombine.high %v857_v14, %v861_v15  ;;  %v945_v60 = vld [vmem:[#allocation5 + $0x2d8] sm:$0xff] }
 0x1ef   : > { %2615 = vmatpush1.bf16.msra.mxu1 %v2998_v20  ;;  %v869_v20 = vld [vmem:[#allocation5 + $0x78] sm:$0xff] }
 0x1f0   : > { %2656 = vmatpush1.bf16.msra.mxu0 %v3126_v21  ;;  %2616 = vmatprep.subr.bf16.mxu1 %v3007_v22  ;;  %v2928_v21 = vcombine.low %v857_v14, %v861_v15  ;;  %v2937_v22 = vcombine.high %v865_v19, %v869_v20  ;;  %v2936_v25 = vcombine.low %v865_v19, %v869_v20  ;;  %v949_v6 = vld [vmem:[#allocation5 + $0x2f8] sm:$0xff] }
 0x1f1   : > { %2657 = vmatprep.subr.bf16.mxu0 %v3135_v23  ;;  %v873_v23 = vld [vmem:[#allocation5 + $0x98] sm:$0xff]  ;;  %v3016_v14 = vcombine.low %v945_v60, %v949_v6 }
 0x1f2   : > { %v2945_v28 = vcombine.high %v873_v23, %v877_v24  ;;  %v969_v20 = vld [vmem:[#allocation5 + $0x398] sm:$0xff] }
 0x1f3   : > { %2617 = vmatpush1.bf16.msra.mxu1 %v3006_v31  ;;  %v885_v31 = vld [vmem:[#allocation5 + $0xf8] sm:$0xff] }
 0x1f4   : > { %2658 = vmatpush1.bf16.msra.mxu0 %v3134_v62  ;;  %2618 = vmatprep.subr.bf16.mxu1 %v3015_v32  ;;  %v2944_v62 = vcombine.low %v873_v23, %v877_v24  ;;  %v2953_v32 = vcombine.high %v881_v30, %v885_v31  ;;  %v2952_v36 = vcombine.low %v881_v30, %v885_v31  ;;  %v977_v24 = vld [vmem:[#allocation5 + $0x3d8] sm:$0xff] }
 0x1f5   : > { %2659 = vmatprep.subr.bf16.mxu0 %v3143_v33  ;;  %v889_v33 = vld [vmem:[#allocation5 + $0x118] sm:$0xff] }
 0x1f6   : > { %v2961_v38 = vcombine.high %v889_v33, %v893_v29  ;;  %v985_v31 = vld [vmem:[#allocation5 + $0x418] sm:$0xff] }
 0x1f7   : > { %2619 = vmatpush1.bf16.msra.mxu1 %v3014_v40  ;;  %v901_v40 = vld [vmem:[#allocation5 + $0x178] sm:$0xff] }
 0x1f8   : > { %2660 = vmatpush1.bf16.msra.mxu0 %v3142_v41  ;;  %2620 = vmatprep.subr.bf16.mxu1 %v3023_v42  ;;  %v2969_v41 = vcombine.high %v897_v39, %v901_v40  ;;  %v905_v42 = vld [vmem:[#allocation5 + $0x198] sm:$0xff]  ;;  %v2968_v49 = vcombine.low %v897_v39, %v901_v40 }
 0x1f9   : > { %2661 = vmatprep.subr.bf16.mxu0 %v3151_v43  ;;  %v909_v43 = vld [vmem:[#allocation5 + $0x1b8] sm:$0xff] }
 0x1fa   : > { %v2977_v50 = vcombine.high %v905_v42, %v909_v43  ;;  %v1001_v40 = vld [vmem:[#allocation5 + $0x498] sm:$0xff] }
 0x1fb   : > { %2621 = vmatpush1.bf16.msra.mxu1 %v3022_v55  ;;  %v2976_v55 = vcombine.low %v905_v42, %v909_v43  ;;  %v1009_v43 = vld [vmem:[#allocation5 + $0x4d8] sm:$0xff] }
 0x1fc   : > { %2662 = vmatpush1.bf16.msra.mxu0 %v3150_v44  ;;  %2622 = vmatprep.subr.bf16.mxu1 %v3031_v46  ;;  %v2985_v44 = vcombine.high %v913_v53, %v917_v54  ;;  %v921_v46 = vld [vmem:[#allocation5 + $0x218] sm:$0xff] }
 0x1fd   : > { %2663 = vmatprep.subr.bf16.mxu0 %v3159_v47  ;;  %v925_v47 = vld [vmem:[#allocation5 + $0x238] sm:$0xff] }
 0x1fe   : > { %v2993_v52 = vcombine.high %v921_v46, %v925_v47  ;;  %v1017_v54 = vld [vmem:[#allocation5 + $0x518] sm:$0xff] }
 0x1ff   : > { %2623 = vmatpush1.bf16.msra.mxu1 %v3030_v63  ;;  %v2992_v63 = vcombine.low %v921_v46, %v925_v47  ;;  %v1025_v47 = vld [vmem:[#allocation5 + $0x558] sm:$0xff] }
 0x200   : > { %2664 = vmatpush1.bf16.msra.mxu0 %v3158_v0  ;;  %2624 = vmatprep.subr.bf16.mxu1 %v3039_v2  ;;  %v3001_v0 = vcombine.high %v929_v56, %v933_v57  ;;  %v937_v2 = vld [vmem:[#allocation5 + $0x298] sm:$0xff] }
 0x201   : > { %2665 = vmatprep.subr.bf16.mxu0 %v3167_v3  ;;  %v941_v3 = vld [vmem:[#allocation5 + $0x2b8] sm:$0xff] }
 0x202   : > { %v3009_v5 = vcombine.high %v937_v2, %v941_v3  ;;  %v1037_v56 = vld [vmem:[#allocation5 + $0x5b8] sm:$0xff] }
 0x203   : > { %2625 = vmatpush1.bf16.msra.mxu1 %v3038_v7  ;;  %v3008_v7 = vcombine.low %v937_v2, %v941_v3  ;;  %v1045_v2 = vld [vmem:[#allocation5 + $0x5f8] sm:$0xff] }
 0x204   : > { %2666 = vmatpush1.bf16.msra.mxu0 %v3166_v9  ;;  %2626 = vmatprep.subr.bf16.mxu1 %v3047_v10  ;;  %v3017_v9 = vcombine.high %v945_v60, %v949_v6  ;;  %v953_v10 = vld [vmem:[#allocation5 + $0x318] sm:$0xff] }
 0x205   : > { %2667 = vmatprep.subr.bf16.mxu0 %v3175_v11  ;;  %v957_v11 = vld [vmem:[#allocation5 + $0x338] sm:$0xff] }
 0x206   : > { %v3025_v15 = vcombine.high %v953_v10, %v957_v11  ;;  %v1053_v60 = vld [vmem:[#allocation5 + $0x638] sm:$0xff] }
 0x207   : > { %2627 = vmatpush1.bf16.msra.mxu1 %v3046_v16  ;;  %v961_v16 = vld [vmem:[#allocation5 + $0x358] sm:$0xff] }
 0x208   : > { %2668 = vmatpush1.bf16.msra.mxu0 %v3174_v17  ;;  %2678 = vmatprep.subr.bf16.mxu1 %v2929_v18  ;;  %v965_v17 = vld [vmem:[#allocation5 + $0x378] sm:$0xff]  ;;  %v3024_v18 = vcombine.low %v953_v10, %v957_v11 }
 0x209   : > { %v3033_v19 = vcombine.high %v961_v16, %v965_v17  ;;  %v1061_v10 = vld [vmem:[#allocation5 + $0x678] sm:$0xff] }
 0x20a   : > { %2629 = vmatmul.mubr.bf16.vlgmr.msra.gmra.mrb[8].mxu1 %v3874_v27 }
 0x20b   : > { %2679 = vmatpush1.bf16.msra.mxu1 %v2928_v21  ;;  %2710 = vmatprep.mubr.bf16.mxu1 %v3872_v26  ;;  %v2960_v26 = vcombine.low %v889_v33, %v893_v29  ;;  %v973_v21 = vld [vmem:[#allocation5 + $0x3b8] sm:$0xff] }
 0x20c   : > { %2670 = vmatmul.mubr.bf16.vlgmr.msra.gmra.mrb[12].mxu0 %v3894_v45  ;;  %2680 = vmatprep.subr.bf16.mxu1 %v2937_v22  ;;  %v3032_v22 = vcombine.low %v961_v16, %v965_v17  ;;  %v3041_v23 = vcombine.high %v969_v20, %v973_v21  ;;  %v993_v29 = vld [vmem:[#allocation5 + $0x458] sm:$0xff] }
 0x20d   : > { %v1069_v16 = vld [vmem:[#allocation5 + $0x6b8] sm:$0xff] }
 0x20f   : > { %2681 = vmatpush1.bf16.msra.mxu1 %v2936_v25  ;;  %v981_v25 = vld [vmem:[#allocation5 + $0x3f8] sm:$0xff] }
 0x210   : > { %2682 = vmatprep.subr.bf16.mxu1 %v2945_v28  ;;  %v3040_v28 = vcombine.low %v969_v20, %v973_v21  ;;  %v3049_v30 = vcombine.high %v977_v24, %v981_v25  ;;  %v1077_v20 = vld [vmem:[#allocation5 + $0x6f8] sm:$0xff] }
 0x213   : > { %2683 = vmatpush1.bf16.msra.mxu1 %v2944_v62  ;;  %v989_v62 = vld [vmem:[#allocation5 + $0x438] sm:$0xff] }
 0x214   : > { %2684 = vmatprep.subr.bf16.mxu1 %v2953_v32  ;;  %v3048_v32 = vcombine.low %v977_v24, %v981_v25  ;;  %v3057_v33 = vcombine.high %v985_v31, %v989_v62  ;;  %v1085_v24 = vld [vmem:[#allocation5 + $0x738] sm:$0xff] }
 0x217   : > { %2685 = vmatpush1.bf16.msra.mxu1 %v2952_v36  ;;  %v997_v36 = vld [vmem:[#allocation5 + $0x478] sm:$0xff] }
 0x218   : > { %2686 = vmatprep.subr.bf16.mxu1 %v2961_v38  ;;  %v3056_v38 = vcombine.low %v985_v31, %v989_v62  ;;  %v3065_v39 = vcombine.high %v993_v29, %v997_v36  ;;  %v1093_v31 = vld [vmem:[#allocation5 + $0x778] sm:$0xff] }
 0x21b   : > { %2687 = vmatpush1.bf16.msra.mxu1 %v2960_v26  ;;  %v1005_v26 = vld [vmem:[#allocation5 + $0x4b8] sm:$0xff] }
 0x21c   : > { %2688 = vmatprep.subr.bf16.mxu1 %v2969_v41  ;;  %v3064_v41 = vcombine.low %v993_v29, %v997_v36  ;;  %v3073_v42 = vcombine.high %v1001_v40, %v1005_v26  ;;  %v1101_v29 = vld [vmem:[#allocation5 + $0x7b8] sm:$0xff] }
 0x21f   : > { %2689 = vmatpush1.bf16.msra.mxu1 %v2968_v49  ;;  %v1013_v49 = vld [vmem:[#allocation5 + $0x4f8] sm:$0xff] }
 0x220   : > { %2690 = vmatprep.subr.bf16.mxu1 %v2977_v50  ;;  %v3072_v50 = vcombine.low %v1001_v40, %v1005_v26  ;;  %v3081_v53 = vcombine.high %v1009_v43, %v1013_v49  ;;  %v1109_v40 = vld [vmem:[#allocation5 + $0x7f8] sm:$0xff] }
 0x223   : > { %2691 = vmatpush1.bf16.msra.mxu1 %v2976_v55  ;;  %v1021_v55 = vld [vmem:[#allocation5 + $0x538] sm:$0xff] }
 0x224   : > { %2692 = vmatprep.subr.bf16.mxu1 %v2985_v44  ;;  %v3080_v44 = vcombine.low %v1009_v43, %v1013_v49  ;;  %v3089_v46 = vcombine.high %v1017_v54, %v1021_v55 }
 0x227   : > { %2693 = vmatpush1.bf16.msra.mxu1 %v2984_v48  ;;  %v3088_v48 = vcombine.low %v1017_v54, %v1021_v55 }
 0x228   : > { %2694 = vmatprep.subr.bf16.mxu1 %v2993_v52  ;;  %v1033_v52 = vld [vmem:[#allocation5 + $0x598] sm:$0xff] }
 0x229   : > { %v3104_v3 = vcombine.low %v1033_v52, %v1037_v56 }
 0x22b   : > { %2695 = vmatpush1.bf16.msra.mxu1 %v2992_v63  ;;  %v3105_v63 = vcombine.high %v1033_v52, %v1037_v56 }
 0x22c   : > { %2696 = vmatprep.subr.bf16.mxu1 %v3001_v0  ;;  %v1041_v0 = vld [vmem:[#allocation5 + $0x5d8] sm:$0xff] }
 0x22d   : > { %v3112_v6 = vcombine.low %v1041_v0, %v1045_v2 }
 0x22f   : > { %2697 = vmatpush1.bf16.msra.mxu1 %v3000_v4  ;;  %v3113_v4 = vcombine.high %v1041_v0, %v1045_v2 }
 0x230   : > { %2698 = vmatprep.subr.bf16.mxu1 %v3009_v5  ;;  %v1049_v5 = vld [vmem:[#allocation5 + $0x618] sm:$0xff] }
 0x231   : > { %v3120_v11 = vcombine.low %v1049_v5, %v1053_v60 }
 0x233   : > { %2699 = vmatpush1.bf16.msra.mxu1 %v3008_v7  ;;  %v3121_v7 = vcombine.high %v1049_v5, %v1053_v60 }
 0x234   : > { %2700 = vmatprep.subr.bf16.mxu1 %v3017_v9  ;;  %v1057_v9 = vld [vmem:[#allocation5 + $0x658] sm:$0xff] }
 0x235   : > { %v3128_v17 = vcombine.low %v1057_v9, %v1061_v10 }
 0x237   : > { %2701 = vmatpush1.bf16.msra.mxu1 %v3016_v14  ;;  %v3129_v14 = vcombine.high %v1057_v9, %v1061_v10 }
 0x238   : > { %2702 = vmatprep.subr.bf16.mxu1 %v3025_v15  ;;  %v1065_v15 = vld [vmem:[#allocation5 + $0x698] sm:$0xff] }
 0x239   : > { %v3136_v21 = vcombine.low %v1065_v15, %v1069_v16 }
 0x23b   : > { %2703 = vmatpush1.bf16.msra.mxu1 %v3024_v18  ;;  %v3137_v18 = vcombine.high %v1065_v15, %v1069_v16 }
 0x23c   : > { %2704 = vmatprep.subr.bf16.mxu1 %v3033_v19  ;;  %v1073_v19 = vld [vmem:[#allocation5 + $0x6d8] sm:$0xff] }
 0x23d   : > { %v3144_v25 = vcombine.low %v1073_v19, %v1077_v20 }
 0x23f   : > { %2705 = vmatpush1.bf16.msra.mxu1 %v3032_v22  ;;  %v3145_v22 = vcombine.high %v1073_v19, %v1077_v20 }
 0x240   : > { %2706 = vmatprep.subr.bf16.mxu1 %v3041_v23  ;;  %v1081_v23 = vld [vmem:[#allocation5 + $0x718] sm:$0xff] }
 0x241   : > { %v3152_v62 = vcombine.low %v1081_v23, %v1085_v24 }
 0x243   : > { %2707 = vmatpush1.bf16.msra.mxu1 %v3040_v28  ;;  %v3153_v28 = vcombine.high %v1081_v23, %v1085_v24 }
 0x244   : > { %2708 = vmatprep.subr.bf16.mxu1 %v3049_v30  ;;  %v1089_v30 = vld [vmem:[#allocation5 + $0x758] sm:$0xff] }
 0x245   : > { %v3160_v36 = vcombine.low %v1089_v30, %v1093_v31 }
 0x247   : > { %2709 = vmatpush1.bf16.msra.mxu1 %v3048_v32  ;;  %v3161_v32 = vcombine.high %v1089_v30, %v1093_v31 }
 0x248   : > { %2719 = vmatprep.subr.bf16.mxu1 %v3057_v33  ;;  %v1097_v33 = vld [vmem:[#allocation5 + $0x798] sm:$0xff] }
 0x249   : > { %v3168_v26 = vcombine.low %v1097_v33, %v1101_v29 }
 0x24a   : > { %2711 = vmatmul.mubr.bf16.vlgmr.msra.gmra.mrb[12].mxu1 %v3874_v27  ;;  %v1029_v27 = vld [vmem:[#allocation5 + $0x578] sm:$0xff] }
 0x24b   : > { %2720 = vmatpush1.bf16.msra.mxu1 %v3056_v38  ;;  %2751 = vmatprep.mubr.bf16.mxu1 %v3878_v34  ;;  %v3097_v34 = vcombine.high %v1025_v47, %v1029_v27  ;;  %v3096_v57 = vcombine.low %v1025_v47, %v1029_v27  ;;  %v3169_v38 = vcombine.high %v1097_v33, %v1101_v29  ;;  %v1110_v47 = vld [vmem:[%s3947_s6] sm:$0xff] }
 0x24c   : > { %2721 = vmatprep.subr.bf16.mxu1 %v3065_v39  ;;  %v1105_v39 = vld [vmem:[#allocation5 + $0x7d8] sm:$0xff]  ;;  %v1131_v27 = vrot.slane %v1110_v47, %v186_v35  ;;  %v1119_v35 = vrot.slane %v1110_v47, %v174_v61 }
 0x24f   : > { %2722 = vmatpush1.bf16.msra.mxu1 %v3064_v41  ;;  %v3177_v41 = vcombine.high %v1105_v39, %v1109_v40 }
 0x250   : > { %2723 = vmatprep.subr.bf16.mxu1 %v3073_v42  ;;  %v3176_v42 = vcombine.low %v1105_v39, %v1109_v40 }
 0x253   : > { %2724 = vmatpush1.bf16.msra.mxu1 %v3072_v50 }
 0x254   : > { %2725 = vmatprep.subr.bf16.mxu1 %v3081_v53 }
 0x257   : > { %2726 = vmatpush1.bf16.msra.mxu1 %v3080_v44 }
 0x258   : > { %2727 = vmatprep.subr.bf16.mxu1 %v3089_v46 }
 0x25b   : > { %2728 = vmatpush1.bf16.msra.mxu1 %v3088_v48  ;;  %v1135_v48 = vrot.slane %v1110_v47, %v190_v37 }
 0x25c   : > { %2729 = vmatprep.subr.bf16.mxu1 %v3097_v34 }
 0x25f   : > { %2730 = vmatpush1.bf16.msra.mxu1 %v3096_v57 }
 0x260   : > { %2731 = vmatprep.subr.bf16.mxu1 %v3105_v63 }
 0x263   : > { %2732 = vmatpush1.bf16.msra.mxu1 %v3104_v3 }
 0x264   : > { %2733 = vmatprep.subr.bf16.mxu1 %v3113_v4 }
 0x267   : > { %2734 = vmatpush1.bf16.msra.mxu1 %v3112_v6  ;;  %v1115_v6 = vrot.slane %v1110_v47, %v170_v59 }
 0x268   : > { %2735 = vmatprep.subr.bf16.mxu1 %v3121_v7 }
 0x26b   : > { %2736 = vmatpush1.bf16.msra.mxu1 %v3120_v11  ;;  %v1123_v11 = vrot.slane %v1110_v47, %v178_v12  ;;  %v1142_v12 = vsub.s32 7, %v3826_v58 }
 0x26c   : > { %2737 = vmatprep.subr.bf16.mxu1 %v3129_v14  ;;  %v1127_v14 = vrot.slane %v1110_v47, %v182_v13 }
 0x26d   : > { %v1143_v24 = vrot.slane %v1110_v47, %v1142_v12 }
 0x26f   : > { %2738 = vmatpush1.bf16.msra.mxu1 %v3128_v17 }
 0x270   : > { %2739 = vmatprep.subr.bf16.mxu1 %v3137_v18 }
 0x273   : > { %2740 = vmatpush1.bf16.msra.mxu1 %v3136_v21  ;;  %v1138_v21 = vsub.s32 6, %v3826_v58 }
 0x274   : > { %2741 = vmatprep.subr.bf16.mxu1 %v3145_v22 }
 0x275   : > { %v1139_v13 = vrot.slane %v1110_v47, %v1138_v21 }
 0x277   : > { %2742 = vmatpush1.bf16.msra.mxu1 %v3144_v25 }
 0x278   : > { %2743 = vmatprep.subr.bf16.mxu1 %v3153_v28 }
 0x27b   : > { %2744 = vmatpush1.bf16.msra.mxu1 %v3152_v62 }
 0x27c   : > { %2745 = vmatprep.subr.bf16.mxu1 %v3161_v32 }
 0x27f   : > { %2746 = vmatpush1.bf16.msra.mxu1 %v3160_v36 }
 0x280   : > { %2747 = vmatprep.subr.bf16.mxu1 %v3169_v38 }
 0x283   : > { %2748 = vmatpush1.bf16.msra.mxu1 %v3168_v26 }
 0x284   : > { %2749 = vmatprep.subr.bf16.mxu1 %v3177_v41 }
 0x287   : > { %2750 = vmatpush1.bf16.msra.mxu1 %v3176_v42 }
 0x28a   : > { %2752 = vmatmul.mubr.bf16.vlgmr.msra.gmra.mrb[12].mxu1 %v3894_v45 }
 0x29d   : > { %v2507_v43 = vpop.f32.mrb[4].mxu1  ;;  %v2589_v49 = vpop.f32.mrb[8].mxu0 }
 0x29e   : > { %v2509_v50 = vpop.f32.mrb[5].mxu1  ;;  %v2591_v53 = vpop.f32.mrb[9].mxu0  ;;  %v3183_v7 = vadd.f32 %v2507_v43, %v1115_v6  ;;  %v3185_v15 = vadd.f32 %v2589_v49, %v1123_v11 }
 0x29f   : > { %v2511_v54 = vpop.f32.mrb[6].mxu1  ;;  %v2593_v55 = vpop.f32.mrb[10].mxu0  ;;  %v3184_v37 = vadd.f32 %v2509_v50, %v1119_v35  ;;  %v3186_v16 = vadd.f32 %v2591_v53, %v1127_v14 }
 0x2a0   : > { %v2512_v44 = vpop.f32.mrb[7].mxu1  ;;  %v2594_v46 = vpop.f32.mrb[11].mxu0  ;;  %v3178_v9 = vmul.f32 -1.442695, %v3183_v7  ;;  %v3180_v17 = vmul.f32 -1.442695, %v3185_v15 }
 0x2a1   : > { %v3179_v10 = vmul.f32 -1.442695, %v3184_v37  ;;  %v3181_v18 = vmul.f32 -1.442695, %v3186_v16  ;;  %v3399_v44 = vld [vmem:[#allocation3 + $0x8] sm:$0xff] }
 0x2a2   : > { %3379 = vpow2.f32 %v3178_v9 }
 0x2a3   : > { %3381 = vpow2.f32 %v3179_v10 }
 0x2a4   : > { %3383 = vpow2.f32 %v3180_v17 }
 0x2a5   : > { %3385 = vpow2.f32 %v3181_v18 }
 0x2ac   : > { %v3380_v59 = vpop.eup %3379 }
 0x2ad   : > { %v3382_v19 = vpop.eup %3381  ;;  %v2766_v61 = vadd.f32 1.0, %v3380_v59 }
 0x2ae   : > { %v2767_v20 = vadd.f32 1.0, %v3382_v19  ;;  %v3384_v22 = vpop.eup %3383 }
 0x2af   : > { %3387 = vrcp.f32 %v2766_v61  ;;  %v3386_v23 = vpop.eup %3385  ;;  %v2778_v25 = vadd.f32 1.0, %v3384_v22 }
 0x2b0   : > { %3389 = vrcp.f32 %v2767_v20  ;;  %v2779_v28 = vadd.f32 1.0, %v3386_v23 }
 0x2b1   : > { %3391 = vrcp.f32 %v2778_v25 }
 0x2b2   : > { %3393 = vrcp.f32 %v2779_v28 }
 0x2b9   : > { %v3388_v32 = vpop.eup %3387 }
 0x2ba   : > { %v3390_v36 = vpop.eup %3389 }
 0x2bb   : > { %v3392_v41 = vpop.eup %3391 }
 0x2bc   : > { %v3394_v42 = vpop.eup %3393  ;;  %v2790_v43 = vsub.f32 1.0, %v3392_v41  ;;  %v2794_v54 = vmul.f32 %v3392_v41, %v3890_v51 }
 0x2bd   : > { %v2791_v50 = vsub.f32 1.0, %v3394_v42  ;;  %v2795_v46 = vmul.f32 %v3399_v44, %v3394_v42 }
 0x2dd   : > { %v2630_v34 = vpop.f32.mrb[8].mxu1 }
 0x2de   : > { %v2631_v45 = vadd.f32 %v2630_v34, %v1131_v27  ;;  %v2632_v52 = vpop.f32.mrb[9].mxu1 }
 0x2df   : > { %v2633_v56 = vadd.f32 %v2632_v52, %v1135_v48  ;;  %v2634_v57 = vpop.f32.mrb[10].mxu1  ;;  %v2671_v63 = vpop.f32.mrb[12].mxu0 }
 0x2e0   : > { %v2672_v0 = vadd.f32 %v2671_v63, %v2631_v45  ;;  %v2635_v2 = vpop.f32.mrb[11].mxu1  ;;  %v2673_v3 = vpop.f32.mrb[13].mxu0 }
 0x2e1   : > { %v2674_v4 = vadd.f32 %v2673_v3, %v2633_v56  ;;  %v2675_v5 = vpop.f32.mrb[14].mxu0 }
 0x2e2   : > { %v2676_v60 = vpop.f32.mrb[15].mxu0 }
 0x35d   : > { %v2753_v30 = vpop.f32.mrb[12].mxu1 }
 0x35e   : > { %v3187_v31 = vadd.f32 %v2753_v30, %v1139_v13  ;;  %v2755_v62 = vpop.f32.mrb[13].mxu1 }
 0x35f   : > { %v3188_v33 = vadd.f32 %v2755_v62, %v1143_v24  ;;  %v2757_v29 = vpop.f32.mrb[14].mxu1 }
 0x360   : > { %v2784_v38 = vmul.f32 %v3388_v32, %v3187_v31  ;;  %v2758_v39 = vpop.f32.mrb[15].mxu1 }
 0x361   : > { %v2785_v40 = vmul.f32 %v3390_v36, %v3188_v33 }
 0x362   : > { %v2786_v26 = vadd.f32 %v2784_v38, %v2672_v0 }
 0x363   : > { %v2787_v58 = vadd.f32 %v2785_v40, %v2674_v4 }
 0x364   : > { %3395 = vtanh.f32 %v2786_v26 }
 0x365   : > { %3397 = vtanh.f32 %v2787_v58 }
 0x36e   : > { %v3396_v49 = vpop.eup %3395 }
 0x36f   : > { %v3398_v53 = vpop.eup %3397  ;;  %v2792_v55 = vmul.f32 %v3396_v49, %v2790_v43  ;;  %52 = sbr.rel (!%p49_p9) target bundleno = 27 (0x1b), region = 60 }
 0x370   : > { %v2793_v47 = vmul.f32 %v3398_v53, %v2791_v50 }
 0x371   : > { %v2796_v27 = vadd.f32 %v2794_v54, %v2792_v55 }
 0x372   : > { %v2797_v48 = vadd.f32 %v2795_v46, %v2793_v47 }
 0x373   : > { %v2798_v34 = vsel %vm847_vm1, %v2796_v27, %v3890_v51 }
 0x374   : > { %2802 = vst [vmem:[#allocation3] sm:$0xff] %v2798_v34  ;;  %v2799_v45 = vsel %vm847_vm1, %v2797_v48, %v3399_v44 }
 0x375   : > { %2803 = vst [vmem:[#allocation3 + $0x8] sm:$0xff] %v2799_v45 }
 0x376 PF:  {}
 0x37b   :  { %v2804_v52 = vld [vmem:[#allocation3] sm:$0xff] }
 0x37c   :  { %v2805_v56 = vld [vmem:[#allocation3 + $0x8] sm:$0xff]  ;;  %2806 = vst [vmem:[%s3948_s7] sm:$0xff] %v2804_v52 }
 0x37d   :  { %2807 = vst [vmem:[%s3948_s7 + $0x8] sm:$0xff] %v2805_v56 }
 0x37e   :  { %2812 = vsyncpa [#allocation6], 1 }

</bundles_post_ra>
